<compile_context>
chip_gen: v7x
topology: tpu7x:2x2x1
jax: 0.10.0
libtpu: 0.0.40
codegen_flags: <defaults>
</compile_context>

<pallas_src>
import functools

import jax
import jax.numpy as jnp
from jax import lax
from jax.experimental import pallas as pl
from jax.experimental.pallas import tpu as pltpu


# ----------------------------- Pallas kernels ------------------------------

def conv_matmul_kernel(x_ref, w_ref, b_ref, o_ref):
    # x: (M, K), w: (K, Co), b: (1, Co) -> o: (M, Co)
    o_ref[...] = (
        jnp.dot(x_ref[...], w_ref[...], preferred_element_type=jnp.float32)
        + b_ref[...]
    )


def fused_attn_kernel(srcf_ref, tarf_ref,
                      srcwe_ref, srcwet_ref, tarwet_ref,
                      srcm_ref, srcmr_ref, tarmr_ref,
                      wfc_ref, wfct_ref, brow_ref, bcol_ref,
                      tar_rw_ref, label_ref):
    """One batch element: masked fc_w projection + 3 attention softmaxes + bmm.

    Shapes (per grid step, leading block dim of 1 stripped with [0]):
      srcf/tarf : (HW, C)      conv features in PyTorch-.view layout
      srcwe     : (Tm, Wd)     sliced src word embeddings
      srcwet    : (Wd, Tm)     same, pre-transposed
      tarwet    : (Wd, Tm)
      srcm      : (Tm, 1)      mask column  (f32)
      srcmr/tarmr: (1, Tm)     mask rows    (f32)
      wfc       : (Wd, C)      fc_w weight
      wfct      : (C, Wd)      fc_w weight, transposed
      brow/bcol : (1, C)/(C,1) fc_w bias
    Outputs: tar_rw, label : (HW, Tm)
    """
    w_fc = wfc_ref[...]
    w_fc_t = wfct_ref[...]
    b_row = brow_ref[...]
    b_col = bcol_ref[...]

    # masked word-embedding projections (fc_w), both orientations
    src_we_m = srcwe_ref[0] * srcm_ref[0]                         # (Tm, Wd)
    src_wp = jnp.dot(src_we_m, w_fc,
                     preferred_element_type=jnp.float32) + b_row  # (Tm, C)

    src_we_mt = srcwet_ref[0] * srcmr_ref[0]                      # (Wd, Tm)
    src_wp_t = jnp.dot(w_fc_t, src_we_mt,
                       preferred_element_type=jnp.float32) + b_col  # (C, Tm)

    tar_we_mt = tarwet_ref[0] * tarmr_ref[0]                      # (Wd, Tm)
    tar_wp_t = jnp.dot(w_fc_t, tar_we_mt,
                       preferred_element_type=jnp.float32) + b_col  # (C, Tm)

    def softmax_last(s):
        s = s - jnp.max(s, axis=-1, keepdims=True)
        e = jnp.exp(s)
        denom = jnp.sum(e, axis=-1, keepdims=True)
        return e * pl.reciprocal(denom, approx=False)

    # attention maps -- all plain (M, C) @ (C, Tm) contractions
    src_rw = softmax_last(
        jnp.dot(srcf_ref[0], src_wp_t, preferred_element_type=jnp.float32))
    src_tw = softmax_last(
        jnp.dot(src_wp, tar_wp_t, preferred_element_type=jnp.float32))
    label_ref[0] = jnp.dot(src_rw, src_tw,
                           preferred_element_type=jnp.float32)
    tar_rw_ref[0] = softmax_last(
        jnp.dot(tarf_ref[0], tar_wp_t, preferred_element_type=jnp.float32))


# ----------------------------- Pallas wrappers ------------------------------

def pallas_conv_matmul(x_col, w_col, b_row):
    """Single-step (M, K) @ (K, Co) + bias."""
    M, K = x_col.shape
    _, Co = w_col.shape
    return pl.pallas_call(
        conv_matmul_kernel,
        out_shape=jax.ShapeDtypeStruct((M, Co), jnp.float32),
        grid=(1,),
        in_specs=[
            pl.BlockSpec((M, K), lambda i: (0, 0)),
            pl.BlockSpec((K, Co), lambda i: (0, 0)),
            pl.BlockSpec((1, Co), lambda i: (0, 0)),
        ],
        out_specs=pl.BlockSpec((M, Co), lambda i: (0, 0)),
        compiler_params=pltpu.CompilerParams(
            dimension_semantics=("arbitrary",)),
    )(x_col, w_col, b_row)


def pallas_fused_attention(src_f, tar_f,
                           src_we, src_we_t, tar_we_t,
                           src_m_col, src_m_row, tar_m_row,
                           w_fc, w_fc_t, b_row, b_col):
    N, HW, C = src_f.shape
    _, Tm, Wd = src_we.shape
    out_shapes = (
        jax.ShapeDtypeStruct((N, HW, Tm), jnp.float32),  # tar_region_word_attn
        jax.ShapeDtypeStruct((N, HW, Tm), jnp.float32),  # ..._label
    )
    return pl.pallas_call(
        fused_attn_kernel,
        out_shape=out_shapes,
        grid=(N,),
        in_specs=[
            pl.BlockSpec((1, HW, C), lambda n: (n, 0, 0)),   # src_f
            pl.BlockSpec((1, HW, C), lambda n: (n, 0, 0)),   # tar_f
            pl.BlockSpec((1, Tm, Wd), lambda n: (n, 0, 0)),  # src_we
            pl.BlockSpec((1, Wd, Tm), lambda n: (n, 0, 0)),  # src_we_t
            pl.BlockSpec((1, Wd, Tm), lambda n: (n, 0, 0)),  # tar_we_t
            pl.BlockSpec((1, Tm, 1), lambda n: (n, 0, 0)),   # src_mask col
            pl.BlockSpec((1, 1, Tm), lambda n: (n, 0, 0)),   # src_mask row
            pl.BlockSpec((1, 1, Tm), lambda n: (n, 0, 0)),   # tar_mask row
            pl.BlockSpec((Wd, C), lambda n: (0, 0)),         # w_fc
            pl.BlockSpec((C, Wd), lambda n: (0, 0)),         # w_fc^T
            pl.BlockSpec((1, C), lambda n: (0, 0)),          # b_fc row
            pl.BlockSpec((C, 1), lambda n: (0, 0)),          # b_fc col
        ],
        out_specs=[
            pl.BlockSpec((1, HW, Tm), lambda n: (n, 0, 0)),
            pl.BlockSpec((1, HW, Tm), lambda n: (n, 0, 0)),
        ],
        compiler_params=pltpu.CompilerParams(
            dimension_semantics=("parallel",)),
    )(src_f, tar_f, src_we, src_we_t, tar_we_t,
      src_m_col, src_m_row, tar_m_row, w_fc, w_fc_t, b_row, b_col)


# ------------------------------ glue (JAX) ----------------------------------

def im2col_3x3(x_nchw):
    """x: (B, C, H, W) -> (B, H*W, C*9), patch ordering (cin, kh, kw)."""
    # TODO(synk): at large H, W move im2col into the Pallas kernel (9 shifted
    # (HW, C)@(C, Co) accumulations) instead of materializing 9x the input.
    B, C, H, W = x_nchw.shape
    xp = jnp.pad(x_nchw, ((0, 0), (0, 0), (1, 1), (1, 1)))
    patches = [xp[:, :, kh:kh + H, kw:kw + W]
               for kh in range(3) for kw in range(3)]      # each (B, C, H, W)
    p = jnp.stack(patches, axis=0)                          # (9, B, C, H, W)
    p = jnp.transpose(p, (1, 3, 4, 2, 0))                    # (B, H, W, C, 9)
    return p.reshape(B, H * W, C * 9)


def d_word_region_forward(params, src_img, tar_img, src_we, tar_we,
                          src_mask, tar_mask):
    w_conv, b_conv, w_fc, b_fc = params
    N, C, H, W = src_img.shape
    Co = w_conv.shape[0]
    HW = H * W

    # --- conv on both image features: ONE (2N*HW, C*9)@(C*9, Co) matmul ---
    imgs = jnp.concatenate([src_img, tar_img], axis=0)           # (2N, C, H, W)
    x_col = im2col_3x3(imgs).reshape(2 * N * HW, C * 9)           # (2N*HW, C*9)
    w_col = w_conv.reshape(Co, C * 9).T                           # (C*9, Co)
    out = pallas_conv_matmul(x_col, w_col, b_conv.reshape(1, Co))  # (2N*HW, Co)

    # PyTorch `.view(N, H*W, C)` of NCHW memory == raw reshape of (Co, HW).
    # Tiny (64 KB) layout fixup in XLA: (hw, co) -> NCHW -> flat view.
    feat = jnp.swapaxes(out.reshape(2 * N, HW, Co), 1, 2)         # (2N, Co, HW)
    feat = feat.reshape(2 * N, HW, Co)                            # view layout
    src_f, tar_f = feat[:N], feat[N:]

    # --- word-embedding slices / masks (tiny, prepared in both layouts) ---
    src_we_s = src_we[:, 1:-1, :]                                 # (N, Tm, Wd)
    tar_we_s = tar_we[:, 1:-1, :]
    src_m = src_mask[:, 1:-1].astype(jnp.float32)                 # (N, Tm)
    tar_m = tar_mask[:, 1:-1].astype(jnp.float32)

    src_we_t = jnp.swapaxes(src_we_s, 1, 2)                       # (N, Wd, Tm)
    tar_we_t = jnp.swapaxes(tar_we_s, 1, 2)
    src_m_col = src_m[..., None]                                  # (N, Tm, 1)
    src_m_row = src_m[:, None, :]                                 # (N, 1, Tm)
    tar_m_row = tar_m[:, None, :]

    w_fc_t = w_fc.T                                               # (C, Wd)
    b_row = b_fc.reshape(1, -1)
    b_col = b_fc.reshape(-1, 1)

    # --- fused masked-fc + attention + label pipeline (single kernel) ---
    tar_rw, label = pallas_fused_attention(
        src_f, tar_f, src_we_s, src_we_t, tar_we_t,
        src_m_col, src_m_row, tar_m_row, w_fc, w_fc_t, b_row, b_col)
    return tar_rw, label


# ----------------------------- reference (JAX) -------------------------------

def reference_forward(params, src_img, tar_img, src_we, tar_we,
                      src_mask, tar_mask):
    w_conv, b_conv, w_fc, b_fc = params
    N, C, H, W = src_img.shape

    def conv(x):
        y = lax.conv_general_dilated(
            x, w_conv, (1, 1), "SAME",
            dimension_numbers=("NCHW", "OIHW", "NCHW"))
        return y + b_conv[None, :, None, None]

    src_f = conv(src_img).reshape(N, H * W, C)
    tar_f = conv(tar_img).reshape(N, H * W, C)
    src_wp = (src_we[:, 1:-1, :] * src_mask[:, 1:-1][..., None]) @ w_fc + b_fc
    tar_wp = (tar_we[:, 1:-1, :] * tar_mask[:, 1:-1][..., None]) @ w_fc + b_fc
    src_rw = jax.nn.softmax(src_f @ jnp.swapaxes(src_wp, 1, 2), axis=-1)
    src_tw = jax.nn.softmax(src_wp @ jnp.swapaxes(tar_wp, 1, 2), axis=-1)
    label = src_rw @ src_tw
    tar_rw = jax.nn.softmax(tar_f @ jnp.swapaxes(tar_wp, 1, 2), axis=-1)
    return tar_rw, label


# --------------------------------- main --------------------------------------

if __name__ == "__main__":
    key = jax.random.PRNGKey(0)
    N, C, H, W = 2, 256, 4, 4       # conv is 256 -> 256, so C must be 256
    T, W_DIM = 8, 32                # seq len 8 (uses tokens 1..-1 -> 6), w_dim 32

    keys = jax.random.split(key, 10)
    # parameters (deterministic, synthetic)
    w_conv = jax.random.normal(keys[0], (C, C, 3, 3), jnp.float32) * 0.02
    b_conv = jax.random.normal(keys[1], (C,), jnp.float32) * 0.02
    w_fc = jax.random.normal(keys[2], (W_DIM, C), jnp.float32) * 0.05   # (in, out)
    b_fc = jax.random.normal(keys[3], (C,), jnp.float32) * 0.05
    params = (w_conv, b_conv, w_fc, b_fc)

    # inputs
    src_img = jax.random.normal(keys[4], (N, C, H, W), jnp.float32)
    tar_img = jax.random.normal(keys[5], (N, C, H, W), jnp.float32)
    src_we = jax.random.normal(keys[6], (N, T, W_DIM), jnp.float32)
    tar_we = jax.random.normal(keys[7], (N, T, W_DIM), jnp.float32)
    src_mask = (jax.random.uniform(keys[8], (N, T)) > 0.3).astype(jnp.float32)
    tar_mask = (jax.random.uniform(keys[9], (N, T)) > 0.3).astype(jnp.float32)

    fwd = jax.jit(functools.partial(d_word_region_forward, params))
    tar_attn, tar_attn_label = fwd(src_img, tar_img, src_we, tar_we,
                                   src_mask, tar_mask)
    jax.block_until_ready((tar_attn, tar_attn_label))

    ref_attn, ref_label = reference_forward(params, src_img, tar_img,
                                            src_we, tar_we, src_mask, tar_mask)
    assert tar_attn.shape == (N, H * W, T - 2)
    assert tar_attn_label.shape == (N, H * W, T - 2)
    assert jnp.allclose(tar_attn, ref_attn, rtol=1e-4, atol=1e-5)
    assert jnp.allclose(tar_attn_label, ref_label, rtol=1e-4, atol=1e-5)

    print("KERNEL_OK")
</pallas_src>

<mosaic_0001>
module attributes {stable_mosaic.version = 11 : i64} {
  func.func @conv_matmul_kernel(%arg0: i32, %arg1: memref<64x2304xf32, #tpu.memory_space<vmem>>, %arg2: memref<2304x256xf32, #tpu.memory_space<vmem>>, %arg3: memref<1x256xf32, #tpu.memory_space<vmem>>, %arg4: memref<64x256xf32, #tpu.memory_space<vmem>>) attributes {dimension_semantics = [#tpu.dimension_semantics<arbitrary>], iteration_bounds = array<i64: 1>, scalar_prefetch = 0 : i64, scratch_operands = 0 : i64, tpu.core_type = #tpu.core_type<tc>, window_params = [{pipeline_mode = #tpu.pipeline_mode<synchronous>, transform_indices = @transform_0, window_bounds = array<i64: 64, 2304>}, {pipeline_mode = #tpu.pipeline_mode<synchronous>, transform_indices = @transform_1, window_bounds = array<i64: 2304, 256>}, {pipeline_mode = #tpu.pipeline_mode<synchronous>, transform_indices = @transform_2, window_bounds = array<i64: 1, 256>}, {pipeline_mode = #tpu.pipeline_mode<synchronous>, transform_indices = @transform_3, window_bounds = array<i64: 64, 256>}]} {
    %c0 = arith.constant 0 : index
    %c0_0 = arith.constant 0 : index
    %0 = vector.load %arg1[%c0, %c0_0] : memref<64x2304xf32, #tpu.memory_space<vmem>>, vector<64x2304xf32>
    %c0_1 = arith.constant 0 : index
    %c0_2 = arith.constant 0 : index
    %1 = vector.load %arg2[%c0_1, %c0_2] : memref<2304x256xf32, #tpu.memory_space<vmem>>, vector<2304x256xf32>
    %cst = arith.constant dense<0.000000e+00> : vector<64x256xf32>
    %2 = tpu.matmul %0, %1, %cst {dimension_numbers = #tpu.dot_dimension_numbers<[1], [0], [0], [1], [0, 0, 1, 1], [], []>} : vector<64x2304xf32>, vector<2304x256xf32>, vector<64x256xf32> -> vector<64x256xf32>
    %c0_3 = arith.constant 0 : index
    %c0_4 = arith.constant 0 : index
    %3 = vector.load %arg3[%c0_3, %c0_4] : memref<1x256xf32, #tpu.memory_space<vmem>>, vector<1x256xf32>
    %4 = vector.broadcast %3 : vector<1x256xf32> to vector<64x256xf32>
    %5 = arith.addf %2, %4 : vector<64x256xf32>
    %c0_5 = arith.constant 0 : index
    %c0_6 = arith.constant 0 : index
    %6 = vector.load %arg4[%c0_5, %c0_6] : memref<64x256xf32, #tpu.memory_space<vmem>>, vector<64x256xf32>
    tpu.vector_store %arg4[%c0_5, %c0_6], %5 {strides = array<i32>} : memref<64x256xf32, #tpu.memory_space<vmem>>, vector<64x256xf32>,
    return
  }
  func.func @transform_0(%arg0: i32) -> (i32, i32) {
    %c0_i32 = arith.constant 0 : i32
    %c0_i32_0 = arith.constant 0 : i32
    %c0_i32_1 = arith.constant 0 : i32
    return %c0_i32, %c0_i32_0 : i32, i32
  }
  func.func @transform_1(%arg0: i32) -> (i32, i32) {
    %c0_i32 = arith.constant 0 : i32
    %c0_i32_0 = arith.constant 0 : i32
    %c0_i32_1 = arith.constant 0 : i32
    return %c0_i32, %c0_i32_0 : i32, i32
  }
  func.func @transform_2(%arg0: i32) -> (i32, i32) {
    %c0_i32 = arith.constant 0 : i32
    %c0_i32_0 = arith.constant 0 : i32
    %c0_i32_1 = arith.constant 0 : i32
    return %c0_i32, %c0_i32_0 : i32, i32
  }
  func.func @transform_3(%arg0: i32) -> (i32, i32) {
    %c0_i32 = arith.constant 0 : i32
    %c0_i32_0 = arith.constant 0 : i32
    %c0_i32_1 = arith.constant 0 : i32
    return %c0_i32, %c0_i32_0 : i32, i32
  }
}

module attributes {stable_mosaic.version = 11 : i64} {
  func.func @fused_attn_kernel(%arg0: i32, %arg1: memref<1x16x256xf32, #tpu.memory_space<vmem>>, %arg2: memref<1x16x256xf32, #tpu.memory_space<vmem>>, %arg3: memref<1x6x32xf32, #tpu.memory_space<vmem>>, %arg4: memref<1x32x6xf32, #tpu.memory_space<vmem>>, %arg5: memref<1x32x6xf32, #tpu.memory_space<vmem>>, %arg6: memref<1x6x1xf32, #tpu.memory_space<vmem>>, %arg7: memref<1x1x6xf32, #tpu.memory_space<vmem>>, %arg8: memref<1x1x6xf32, #tpu.memory_space<vmem>>, %arg9: memref<32x256xf32, #tpu.memory_space<vmem>>, %arg10: memref<256x32xf32, #tpu.memory_space<vmem>>, %arg11: memref<1x256xf32, #tpu.memory_space<vmem>>, %arg12: memref<256x1xf32, #tpu.memory_space<vmem>>, %arg13: memref<1x16x6xf32, #tpu.memory_space<vmem>>, %arg14: memref<1x16x6xf32, #tpu.memory_space<vmem>>) attributes {dimension_semantics = [#tpu.dimension_semantics<parallel>], iteration_bounds = array<i64: 2>, scalar_prefetch = 0 : i64, scratch_operands = 0 : i64, tpu.core_type = #tpu.core_type<tc>, window_params = [{transform_indices = @transform_0, window_bounds = array<i64: 1, 16, 256>}, {transform_indices = @transform_1, window_bounds = array<i64: 1, 16, 256>}, {transform_indices = @transform_2, window_bounds = array<i64: 1, 6, 32>}, {transform_indices = @transform_3, window_bounds = array<i64: 1, 32, 6>}, {transform_indices = @transform_4, window_bounds = array<i64: 1, 32, 6>}, {transform_indices = @transform_5, window_bounds = array<i64: 1, 6, 1>}, {transform_indices = @transform_6, window_bounds = array<i64: 1, 1, 6>}, {transform_indices = @transform_7, window_bounds = array<i64: 1, 1, 6>}, {pipeline_mode = #tpu.pipeline_mode<synchronous>, transform_indices = @transform_8, window_bounds = array<i64: 32, 256>}, {pipeline_mode = #tpu.pipeline_mode<synchronous>, transform_indices = @transform_9, window_bounds = array<i64: 256, 32>}, {pipeline_mode = #tpu.pipeline_mode<synchronous>, transform_indices = @transform_10, window_bounds = array<i64: 1, 256>}, {pipeline_mode = #tpu.pipeline_mode<synchronous>, transform_indices = @transform_11, window_bounds = array<i64: 256, 1>}, {transform_indices = @transform_12, window_bounds = array<i64: 1, 16, 6>}, {transform_indices = @transform_13, window_bounds = array<i64: 1, 16, 6>}]} {
    %c0 = arith.constant 0 : index
    %c0_0 = arith.constant 0 : index
    %0 = vector.load %arg9[%c0, %c0_0] : memref<32x256xf32, #tpu.memory_space<vmem>>, vector<32x256xf32>
    %c0_1 = arith.constant 0 : index
    %c0_2 = arith.constant 0 : index
    %1 = vector.load %arg10[%c0_1, %c0_2] : memref<256x32xf32, #tpu.memory_space<vmem>>, vector<256x32xf32>
    %c0_3 = arith.constant 0 : index
    %c0_4 = arith.constant 0 : index
    %2 = vector.load %arg11[%c0_3, %c0_4] : memref<1x256xf32, #tpu.memory_space<vmem>>, vector<1x256xf32>
    %c0_5 = arith.constant 0 : index
    %c0_6 = arith.constant 0 : index
    %3 = vector.load %arg12[%c0_5, %c0_6] : memref<256x1xf32, #tpu.memory_space<vmem>>, vector<256x1xf32>
    %c0_7 = arith.constant 0 : index
    %c0_8 = arith.constant 0 : index
    %c0_9 = arith.constant 0 : index
    %4 = vector.load %arg3[%c0_7, %c0_8, %c0_9] : memref<1x6x32xf32, #tpu.memory_space<vmem>>, vector<1x6x32xf32>
    %5 = vector.shape_cast %4 : vector<1x6x32xf32> to vector<6x32xf32>
    %c0_10 = arith.constant 0 : index
    %c0_11 = arith.constant 0 : index
    %c0_12 = arith.constant 0 : index
    %6 = vector.load %arg6[%c0_10, %c0_11, %c0_12] : memref<1x6x1xf32, #tpu.memory_space<vmem>>, vector<1x6x1xf32>
    %7 = vector.shape_cast %6 : vector<1x6x1xf32> to vector<6x1xf32>
    %8 = vector.broadcast %7 : vector<6x1xf32> to vector<6x32xf32>
    %9 = arith.mulf %5, %8 : vector<6x32xf32>
    %cst = arith.constant dense<0.000000e+00> : vector<6x256xf32>
    %10 = tpu.matmul %9, %0, %cst {dimension_numbers = #tpu.dot_dimension_numbers<[1], [0], [0], [1], [0, 0, 1, 1], [], []>} : vector<6x32xf32>, vector<32x256xf32>, vector<6x256xf32> -> vector<6x256xf32>
    %11 = vector.broadcast %2 : vector<1x256xf32> to vector<6x256xf32>
    %12 = arith.addf %10, %11 : vector<6x256xf32>
    %c0_13 = arith.constant 0 : index
    %c0_14 = arith.constant 0 : index
    %c0_15 = arith.constant 0 : index
    %13 = vector.load %arg4[%c0_13, %c0_14, %c0_15] : memref<1x32x6xf32, #tpu.memory_space<vmem>>, vector<1x32x6xf32>
    %14 = vector.shape_cast %13 : vector<1x32x6xf32> to vector<32x6xf32>
    %c0_16 = arith.constant 0 : index
    %c0_17 = arith.constant 0 : index
    %c0_18 = arith.constant 0 : index
    %15 = vector.load %arg7[%c0_16, %c0_17, %c0_18] : memref<1x1x6xf32, #tpu.memory_space<vmem>>, vector<1x1x6xf32>
    %16 = vector.shape_cast %15 : vector<1x1x6xf32> to vector<1x6xf32>
    %17 = vector.broadcast %16 : vector<1x6xf32> to vector<32x6xf32>
    %18 = arith.mulf %14, %17 : vector<32x6xf32>
    %cst_19 = arith.constant dense<0.000000e+00> : vector<256x6xf32>
    %19 = tpu.matmul %1, %18, %cst_19 {dimension_numbers = #tpu.dot_dimension_numbers<[1], [0], [0], [1], [0, 0, 1, 1], [], []>} : vector<256x32xf32>, vector<32x6xf32>, vector<256x6xf32> -> vector<256x6xf32>
    %20 = vector.broadcast %3 : vector<256x1xf32> to vector<256x6xf32>
    %21 = arith.addf %19, %20 : vector<256x6xf32>
    %c0_20 = arith.constant 0 : index
    %c0_21 = arith.constant 0 : index
    %c0_22 = arith.constant 0 : index
    %22 = vector.load %arg5[%c0_20, %c0_21, %c0_22] : memref<1x32x6xf32, #tpu.memory_space<vmem>>, vector<1x32x6xf32>
    %23 = vector.shape_cast %22 : vector<1x32x6xf32> to vector<32x6xf32>
    %c0_23 = arith.constant 0 : index
    %c0_24 = arith.constant 0 : index
    %c0_25 = arith.constant 0 : index
    %24 = vector.load %arg8[%c0_23, %c0_24, %c0_25] : memref<1x1x6xf32, #tpu.memory_space<vmem>>, vector<1x1x6xf32>
    %25 = vector.shape_cast %24 : vector<1x1x6xf32> to vector<1x6xf32>
    %26 = vector.broadcast %25 : vector<1x6xf32> to vector<32x6xf32>
    %27 = arith.mulf %23, %26 : vector<32x6xf32>
    %cst_26 = arith.constant dense<0.000000e+00> : vector<256x6xf32>
    %28 = tpu.matmul %1, %27, %cst_26 {dimension_numbers = #tpu.dot_dimension_numbers<[1], [0], [0], [1], [0, 0, 1, 1], [], []>} : vector<256x32xf32>, vector<32x6xf32>, vector<256x6xf32> -> vector<256x6xf32>
    %29 = vector.broadcast %3 : vector<256x1xf32> to vector<256x6xf32>
    %30 = arith.addf %28, %29 : vector<256x6xf32>
    %c0_27 = arith.constant 0 : index
    %c0_28 = arith.constant 0 : index
    %c0_29 = arith.constant 0 : index
    %31 = vector.load %arg1[%c0_27, %c0_28, %c0_29] : memref<1x16x256xf32, #tpu.memory_space<vmem>>, vector<1x16x256xf32>
    %32 = vector.shape_cast %31 : vector<1x16x256xf32> to vector<16x256xf32>
    %cst_30 = arith.constant dense<0.000000e+00> : vector<16x6xf32>
    %33 = tpu.matmul %32, %21, %cst_30 {dimension_numbers = #tpu.dot_dimension_numbers<[1], [0], [0], [1], [0, 0, 1, 1], [], []>} : vector<16x256xf32>, vector<256x6xf32>, vector<16x6xf32> -> vector<16x6xf32>
    %cst_31 = arith.constant dense<0xFF800000> : vector<16xf32>
    %34 = vector.multi_reduction <maximumf>, %33, %cst_31 [1] : vector<16x6xf32> to vector<16xf32>
    %35 = vector.shape_cast %34 : vector<16xf32> to vector<16x1xf32>
    %36 = vector.broadcast %35 : vector<16x1xf32> to vector<16x6xf32>
    %37 = arith.subf %33, %36 : vector<16x6xf32>
    %38 = math.exp %37 : vector<16x6xf32>
    %cst_32 = arith.constant dense<0.000000e+00> : vector<16xf32>
    %39 = vector.multi_reduction <add>, %38, %cst_32 [1] : vector<16x6xf32> to vector<16xf32>
    %40 = vector.shape_cast %39 : vector<16xf32> to vector<16x1xf32>
    %41 = tpu.reciprocal %40 : vector<16x1xf32> -> vector<16x1xf32>
    %42 = vector.broadcast %41 : vector<16x1xf32> to vector<16x6xf32>
    %43 = arith.mulf %38, %42 : vector<16x6xf32>
    %cst_33 = arith.constant dense<0.000000e+00> : vector<6x6xf32>
    %44 = tpu.matmul %12, %30, %cst_33 {dimension_numbers = #tpu.dot_dimension_numbers<[1], [0], [0], [1], [0, 0, 1, 1], [], []>} : vector<6x256xf32>, vector<256x6xf32>, vector<6x6xf32> -> vector<6x6xf32>
    %cst_34 = arith.constant dense<0xFF800000> : vector<6xf32>
    %45 = vector.multi_reduction <maximumf>, %44, %cst_34 [1] : vector<6x6xf32> to vector<6xf32>
    %46 = vector.shape_cast %45 : vector<6xf32> to vector<6x1xf32>
    %47 = vector.broadcast %46 : vector<6x1xf32> to vector<6x6xf32>
    %48 = arith.subf %44, %47 : vector<6x6xf32>
    %49 = math.exp %48 : vector<6x6xf32>
    %cst_35 = arith.constant dense<0.000000e+00> : vector<6xf32>
    %50 = vector.multi_reduction <add>, %49, %cst_35 [1] : vector<6x6xf32> to vector<6xf32>
    %51 = vector.shape_cast %50 : vector<6xf32> to vector<6x1xf32>
    %52 = tpu.reciprocal %51 : vector<6x1xf32> -> vector<6x1xf32>
    %53 = vector.broadcast %52 : vector<6x1xf32> to vector<6x6xf32>
    %54 = arith.mulf %49, %53 : vector<6x6xf32>
    %cst_36 = arith.constant dense<0.000000e+00> : vector<16x6xf32>
    %55 = tpu.matmul %43, %54, %cst_36 {dimension_numbers = #tpu.dot_dimension_numbers<[1], [0], [0], [1], [0, 0, 1, 1], [], []>} : vector<16x6xf32>, vector<6x6xf32>, vector<16x6xf32> -> vector<16x6xf32>
    %c0_37 = arith.constant 0 : index
    %c0_38 = arith.constant 0 : index
    %c0_39 = arith.constant 0 : index
    %56 = vector.load %arg14[%c0_37, %c0_38, %c0_39] : memref<1x16x6xf32, #tpu.memory_space<vmem>>, vector<1x16x6xf32>
    %57 = vector.shape_cast %56 : vector<1x16x6xf32> to vector<16x6xf32>
    %58 = vector.shape_cast %55 : vector<16x6xf32> to vector<1x16x6xf32>
    tpu.vector_store %arg14[%c0_37, %c0_38, %c0_39], %58 {strides = array<i32>} : memref<1x16x6xf32, #tpu.memory_space<vmem>>, vector<1x16x6xf32>,
    %c0_40 = arith.constant 0 : index
    %c0_41 = arith.constant 0 : index
    %c0_42 = arith.constant 0 : index
    %59 = vector.load %arg2[%c0_40, %c0_41, %c0_42] : memref<1x16x256xf32, #tpu.memory_space<vmem>>, vector<1x16x256xf32>
    %60 = vector.shape_cast %59 : vector<1x16x256xf32> to vector<16x256xf32>
    %cst_43 = arith.constant dense<0.000000e+00> : vector<16x6xf32>
    %61 = tpu.matmul %60, %30, %cst_43 {dimension_numbers = #tpu.dot_dimension_numbers<[1], [0], [0], [1], [0, 0, 1, 1], [], []>} : vector<16x256xf32>, vector<256x6xf32>, vector<16x6xf32> -> vector<16x6xf32>
    %cst_44 = arith.constant dense<0xFF800000> : vector<16xf32>
    %62 = vector.multi_reduction <maximumf>, %61, %cst_44 [1] : vector<16x6xf32> to vector<16xf32>
    %63 = vector.shape_cast %62 : vector<16xf32> to vector<16x1xf32>
    %64 = vector.broadcast %63 : vector<16x1xf32> to vector<16x6xf32>
    %65 = arith.subf %61, %64 : vector<16x6xf32>
    %66 = math.exp %65 : vector<16x6xf32>
    %cst_45 = arith.constant dense<0.000000e+00> : vector<16xf32>
    %67 = vector.multi_reduction <add>, %66, %cst_45 [1] : vector<16x6xf32> to vector<16xf32>
    %68 = vector.shape_cast %67 : vector<16xf32> to vector<16x1xf32>
    %69 = tpu.reciprocal %68 : vector<16x1xf32> -> vector<16x1xf32>
    %70 = vector.broadcast %69 : vector<16x1xf32> to vector<16x6xf32>
    %71 = arith.mulf %66, %70 : vector<16x6xf32>
    %c0_46 = arith.constant 0 : index
    %c0_47 = arith.constant 0 : index
    %c0_48 = arith.constant 0 : index
    %72 = vector.load %arg13[%c0_46, %c0_47, %c0_48] : memref<1x16x6xf32, #tpu.memory_space<vmem>>, vector<1x16x6xf32>
    %73 = vector.shape_cast %72 : vector<1x16x6xf32> to vector<16x6xf32>
    %74 = vector.shape_cast %71 : vector<16x6xf32> to vector<1x16x6xf32>
    tpu.vector_store %arg13[%c0_46, %c0_47, %c0_48], %74 {strides = array<i32>} : memref<1x16x6xf32, #tpu.memory_space<vmem>>, vector<1x16x6xf32>,
    return
  }
  func.func @transform_0(%arg0: i32) -> (i32, i32, i32) {
    %c0_i32 = arith.constant 0 : i32
    %c0_i32_0 = arith.constant 0 : i32
    %c0_i32_1 = arith.constant 0 : i32
    return %arg0, %c0_i32, %c0_i32_0 : i32, i32, i32
  }
  func.func @transform_1(%arg0: i32) -> (i32, i32, i32) {
    %c0_i32 = arith.constant 0 : i32
    %c0_i32_0 = arith.constant 0 : i32
    %c0_i32_1 = arith.constant 0 : i32
    return %arg0, %c0_i32, %c0_i32_0 : i32, i32, i32
  }
  func.func @transform_2(%arg0: i32) -> (i32, i32, i32) {
    %c0_i32 = arith.constant 0 : i32
    %c0_i32_0 = arith.constant 0 : i32
    %c0_i32_1 = arith.constant 0 : i32
    return %arg0, %c0_i32, %c0_i32_0 : i32, i32, i32
  }
  func.func @transform_3(%arg0: i32) -> (i32, i32, i32) {
    %c0_i32 = arith.constant 0 : i32
    %c0_i32_0 = arith.constant 0 : i32
    %c0_i32_1 = arith.constant 0 : i32
    return %arg0, %c0_i32, %c0_i32_0 : i32, i32, i32
  }
  func.func @transform_4(%arg0: i32) -> (i32, i32, i32) {
    %c0_i32 = arith.constant 0 : i32
    %c0_i32_0 = arith.constant 0 : i32
    %c0_i32_1 = arith.constant 0 : i32
    return %arg0, %c0_i32, %c0_i32_0 : i32, i32, i32
  }
  func.func @transform_5(%arg0: i32) -> (i32, i32, i32) {
    %c0_i32 = arith.constant 0 : i32
    %c0_i32_0 = arith.constant 0 : i32
    %c0_i32_1 = arith.constant 0 : i32
    return %arg0, %c0_i32, %c0_i32_0 : i32, i32, i32
  }
  func.func @transform_6(%arg0: i32) -> (i32, i32, i32) {
    %c0_i32 = arith.constant 0 : i32
    %c0_i32_0 = arith.constant 0 : i32
    %c0_i32_1 = arith.constant 0 : i32
    return %arg0, %c0_i32, %c0_i32_0 : i32, i32, i32
  }
  func.func @transform_7(%arg0: i32) -> (i32, i32, i32) {
    %c0_i32 = arith.constant 0 : i32
    %c0_i32_0 = arith.constant 0 : i32
    %c0_i32_1 = arith.constant 0 : i32
    return %arg0, %c0_i32, %c0_i32_0 : i32, i32, i32
  }
  func.func @transform_8(%arg0: i32) -> (i32, i32) {
    %c0_i32 = arith.constant 0 : i32
    %c0_i32_0 = arith.constant 0 : i32
    %c0_i32_1 = arith.constant 0 : i32
    return %c0_i32, %c0_i32_0 : i32, i32
  }
  func.func @transform_9(%arg0: i32) -> (i32, i32) {
    %c0_i32 = arith.constant 0 : i32
    %c0_i32_0 = arith.constant 0 : i32
    %c0_i32_1 = arith.constant 0 : i32
    return %c0_i32, %c0_i32_0 : i32, i32
  }
  func.func @transform_10(%arg0: i32) -> (i32, i32) {
    %c0_i32 = arith.constant 0 : i32
    %c0_i32_0 = arith.constant 0 : i32
    %c0_i32_1 = arith.constant 0 : i32
    return %c0_i32, %c0_i32_0 : i32, i32
  }
  func.func @transform_11(%arg0: i32) -> (i32, i32) {
    %c0_i32 = arith.constant 0 : i32
    %c0_i32_0 = arith.constant 0 : i32
    %c0_i32_1 = arith.constant 0 : i32
    return %c0_i32, %c0_i32_0 : i32, i32
  }
  func.func @transform_12(%arg0: i32) -> (i32, i32, i32) {
    %c0_i32 = arith.constant 0 : i32
    %c0_i32_0 = arith.constant 0 : i32
    %c0_i32_1 = arith.constant 0 : i32
    return %arg0, %c0_i32, %c0_i32_0 : i32, i32, i32
  }
  func.func @transform_13(%arg0: i32) -> (i32, i32, i32) {
    %c0_i32 = arith.constant 0 : i32
    %c0_i32_0 = arith.constant 0 : i32
    %c0_i32_1 = arith.constant 0 : i32
    return %arg0, %c0_i32, %c0_i32_0 : i32, i32, i32
  }
}

</mosaic_0001>

<bundles_post_ra>
// kernel: d_word_region_forward.2
= control target key start
LH: loop header
LB: loop body
LE: loop exit
PB: predicated region body
PF: predicated region fallthrough
CT: control target
= control target key end

     0   :  { %s4798_s1 = inlined_call_operand.vmem [shape: f32[2304,256], index: 1, kind: input, shape index: {}]   ;;  %s4799_s0 = inlined_call_operand.vmem [shape: f32[64,2304], index: 0, kind: input, shape index: {}]   ;;  %s4800_s2 = inlined_call_operand.vmem [shape: f32[1,256], index: 2, kind: input, shape index: {}]   ;;  %s4801_s3 = inlined_call_operand.vmem [shape: f32[64,256], index: 3, kind: output, shape index: {}]  }
   0x1   :  { %v159_v0 = vld [vmem:[%s4798_s1 + $0x8] sm:$0xff]  ;;  %v161_v1 = vld [vmem:[%s4798_s1 + $0x18] sm:$0xff]  ;;  %v158_v5 = vld [vmem:[%s4798_s1] sm:$0xff] }
   0x2   :  { %v415_v2 = vld [vmem:[%s4798_s1 + $0x808] sm:$0xff]  ;;  %v1783_v3 = vpack.c.bf16 %v161_v1, %v159_v0  ;;  %v417_v4 = vld [vmem:[%s4798_s1 + $0x818] sm:$0xff]  ;;  %v160_v6 = vld [vmem:[%s4798_s1 + $0x10] sm:$0xff] }
   0x3   :  { %v2039_v7 = vpack.c.bf16 %v417_v4, %v415_v2  ;;  %v1785_v8 = vpack.c.bf16 %v160_v6, %v158_v5  ;;  %v414_v9 = vld [vmem:[%s4798_s1 + $0x800] sm:$0xff]  ;;  %v416_v10 = vld [vmem:[%s4798_s1 + $0x810] sm:$0xff]  ;;  %v163_v11 = vld [vmem:[%s4798_s1 + $0x28] sm:$0xff] }
   0x4   :  { %1784 = vmatprep.subr.bf16.mxu1 %v1783_v3  ;;  %v2041_v12 = vpack.c.bf16 %v416_v10, %v414_v9  ;;  %v165_v13 = vld [vmem:[%s4798_s1 + $0x38] sm:$0xff]  ;;  %v419_v14 = vld [vmem:[%s4798_s1 + $0x828] sm:$0xff]  ;;  %v162_v18 = vld [vmem:[%s4798_s1 + $0x20] sm:$0xff] }
   0x5   :  { %v421_v15 = vld [vmem:[%s4798_s1 + $0x838] sm:$0xff]  ;;  %2040 = vmatprep.subr.bf16.mxu0 %v2039_v7  ;;  %1786 = vmatpush1.bf16.msra.mxu1 %v1785_v8  ;;  %v1787_v16 = vpack.c.bf16 %v165_v13, %v163_v11  ;;  %v164_v19 = vld [vmem:[%s4798_s1 + $0x30] sm:$0xff]  ;;  %v418_v20 = vld [vmem:[%s4798_s1 + $0x820] sm:$0xff] }
   0x6   :  { %v2043_v17 = vpack.c.bf16 %v421_v15, %v419_v14  ;;  %2042 = vmatpush1.bf16.msra.mxu0 %v2041_v12  ;;  %v1789_v21 = vpack.c.bf16 %v164_v19, %v162_v18  ;;  %v420_v22 = vld [vmem:[%s4798_s1 + $0x830] sm:$0xff]  ;;  %v167_v23 = vld [vmem:[%s4798_s1 + $0x48] sm:$0xff]  ;;  %v169_v24 = vld [vmem:[%s4798_s1 + $0x58] sm:$0xff] }
   0x7   :  { %1788 = vmatprep.subr.bf16.mxu1 %v1787_v16  ;;  %v2045_v25 = vpack.c.bf16 %v420_v22, %v418_v20  ;;  %v1791_v26 = vpack.c.bf16 %v169_v24, %v167_v23  ;;  %v423_v27 = vld [vmem:[%s4798_s1 + $0x848] sm:$0xff]  ;;  %v425_v28 = vld [vmem:[%s4798_s1 + $0x858] sm:$0xff]  ;;  %v166_v29 = vld [vmem:[%s4798_s1 + $0x40] sm:$0xff] }
   0x8   :  { %2044 = vmatprep.subr.bf16.mxu0 %v2043_v17  ;;  %v2047_v30 = vpack.c.bf16 %v425_v28, %v423_v27  ;;  %v168_v31 = vld [vmem:[%s4798_s1 + $0x50] sm:$0xff]  ;;  %v422_v32 = vld [vmem:[%s4798_s1 + $0x840] sm:$0xff]  ;;  %v171_v35 = vld [vmem:[%s4798_s1 + $0x68] sm:$0xff] }
   0x9   :  { %v424_v33 = vld [vmem:[%s4798_s1 + $0x850] sm:$0xff]  ;;  %1790 = vmatpush1.bf16.msra.mxu1 %v1789_v21  ;;  %v1793_v34 = vpack.c.bf16 %v168_v31, %v166_v29  ;;  %v173_v36 = vld [vmem:[%s4798_s1 + $0x78] sm:$0xff]  ;;  %v427_v37 = vld [vmem:[%s4798_s1 + $0x868] sm:$0xff] }
   0xa   :  { %2046 = vmatpush1.bf16.msra.mxu0 %v2045_v25  ;;  %1792 = vmatprep.subr.bf16.mxu1 %v1791_v26  ;;  %v2049_v38 = vpack.c.bf16 %v424_v33, %v422_v32  ;;  %v1795_v39 = vpack.c.bf16 %v173_v36, %v171_v35  ;;  %v429_v40 = vld [vmem:[%s4798_s1 + $0x878] sm:$0xff]  ;;  %v170_v41 = vld [vmem:[%s4798_s1 + $0x60] sm:$0xff]  ;;  %v172_v42 = vld [vmem:[%s4798_s1 + $0x70] sm:$0xff] }
   0xb   :  { %2048 = vmatprep.subr.bf16.mxu0 %v2047_v30  ;;  %v2051_v43 = vpack.c.bf16 %v429_v40, %v427_v37  ;;  %v426_v44 = vld [vmem:[%s4798_s1 + $0x860] sm:$0xff]  ;;  %v428_v45 = vld [vmem:[%s4798_s1 + $0x870] sm:$0xff]  ;;  %v175_v46 = vld [vmem:[%s4798_s1 + $0x88] sm:$0xff]  ;;  %v1797_v50 = vpack.c.bf16 %v172_v42, %v170_v41 }
   0xc   :  { %v177_v47 = vld [vmem:[%s4798_s1 + $0x98] sm:$0xff]  ;;  %v431_v48 = vld [vmem:[%s4798_s1 + $0x888] sm:$0xff]  ;;  %v2053_v51 = vpack.c.bf16 %v428_v45, %v426_v44  ;;  %v174_v53 = vld [vmem:[%s4798_s1 + $0x80] sm:$0xff] }
   0xd   :  { %v433_v49 = vld [vmem:[%s4798_s1 + $0x898] sm:$0xff]  ;;  %1794 = vmatpush1.bf16.msra.mxu1 %v1793_v34  ;;  %v1799_v52 = vpack.c.bf16 %v177_v47, %v175_v46  ;;  %v176_v54 = vld [vmem:[%s4798_s1 + $0x90] sm:$0xff]  ;;  %v430_v55 = vld [vmem:[%s4798_s1 + $0x880] sm:$0xff] }
   0xe   :  { %2050 = vmatpush1.bf16.msra.mxu0 %v2049_v38  ;;  %1796 = vmatprep.subr.bf16.mxu1 %v1795_v39  ;;  %v2055_v56 = vpack.c.bf16 %v433_v49, %v431_v48  ;;  %v432_v57 = vld [vmem:[%s4798_s1 + $0x890] sm:$0xff]  ;;  %v179_v58 = vld [vmem:[%s4798_s1 + $0xa8] sm:$0xff]  ;;  %v181_v59 = vld [vmem:[%s4798_s1 + $0xb8] sm:$0xff]  ;;  %v1801_v62 = vpack.c.bf16 %v176_v54, %v174_v53 }
   0xf   :  { %2052 = vmatprep.subr.bf16.mxu0 %v2051_v43  ;;  %v435_v60 = vld [vmem:[%s4798_s1 + $0x8a8] sm:$0xff]  ;;  %v437_v61 = vld [vmem:[%s4798_s1 + $0x8b8] sm:$0xff]  ;;  %v2057_v63 = vpack.c.bf16 %v432_v57, %v430_v55  ;;  %v1803_v0 = vpack.c.bf16 %v181_v59, %v179_v58  ;;  %v178_v1 = vld [vmem:[%s4798_s1 + $0xa0] sm:$0xff] }
  0x10   :  { %v180_v2 = vld [vmem:[%s4798_s1 + $0xb0] sm:$0xff]  ;;  %v434_v3 = vld [vmem:[%s4798_s1 + $0x8a0] sm:$0xff]  ;;  %v2059_v4 = vpack.c.bf16 %v437_v61, %v435_v60  ;;  %v183_v6 = vld [vmem:[%s4798_s1 + $0xc8] sm:$0xff] }
  0x11   :  { %1798 = vmatpush1.bf16.msra.mxu1 %v1797_v50  ;;  %v436_v5 = vld [vmem:[%s4798_s1 + $0x8b0] sm:$0xff]  ;;  %v185_v7 = vld [vmem:[%s4798_s1 + $0xd8] sm:$0xff]  ;;  %v439_v8 = vld [vmem:[%s4798_s1 + $0x8c8] sm:$0xff]  ;;  %v1805_v10 = vpack.c.bf16 %v180_v2, %v178_v1 }
  0x12   :  { %2054 = vmatpush1.bf16.msra.mxu0 %v2053_v51  ;;  %1800 = vmatprep.subr.bf16.mxu1 %v1799_v52  ;;  %v441_v9 = vld [vmem:[%s4798_s1 + $0x8d8] sm:$0xff]  ;;  %v2061_v11 = vpack.c.bf16 %v436_v5, %v434_v3  ;;  %v1807_v12 = vpack.c.bf16 %v185_v7, %v183_v6  ;;  %v182_v13 = vld [vmem:[%s4798_s1 + $0xc0] sm:$0xff]  ;;  %v184_v14 = vld [vmem:[%s4798_s1 + $0xd0] sm:$0xff] }
  0x13   :  { %2056 = vmatprep.subr.bf16.mxu0 %v2055_v56  ;;  %v438_v15 = vld [vmem:[%s4798_s1 + $0x8c0] sm:$0xff]  ;;  %v2063_v16 = vpack.c.bf16 %v441_v9, %v439_v8  ;;  %v440_v17 = vld [vmem:[%s4798_s1 + $0x8d0] sm:$0xff]  ;;  %v187_v18 = vld [vmem:[%s4798_s1 + $0xe8] sm:$0xff]  ;;  %v1809_v22 = vpack.c.bf16 %v184_v14, %v182_v13 }
  0x14   :  { %v189_v19 = vld [vmem:[%s4798_s1 + $0xf8] sm:$0xff]  ;;  %v443_v20 = vld [vmem:[%s4798_s1 + $0x8e8] sm:$0xff]  ;;  %v2065_v23 = vpack.c.bf16 %v440_v17, %v438_v15  ;;  %v186_v25 = vld [vmem:[%s4798_s1 + $0xe0] sm:$0xff] }
  0x15   :  { %1802 = vmatpush1.bf16.msra.mxu1 %v1801_v62  ;;  %v445_v21 = vld [vmem:[%s4798_s1 + $0x8f8] sm:$0xff]  ;;  %v1811_v24 = vpack.c.bf16 %v189_v19, %v187_v18  ;;  %v188_v26 = vld [vmem:[%s4798_s1 + $0xf0] sm:$0xff]  ;;  %v442_v27 = vld [vmem:[%s4798_s1 + $0x8e0] sm:$0xff] }
  0x16   :  { %2058 = vmatpush1.bf16.msra.mxu0 %v2057_v63  ;;  %1804 = vmatprep.subr.bf16.mxu1 %v1803_v0  ;;  %v2067_v28 = vpack.c.bf16 %v445_v21, %v443_v20  ;;  %v444_v29 = vld [vmem:[%s4798_s1 + $0x8f0] sm:$0xff]  ;;  %v191_v30 = vld [vmem:[%s4798_s1 + $0x108] sm:$0xff]  ;;  %v193_v31 = vld [vmem:[%s4798_s1 + $0x118] sm:$0xff]  ;;  %v1813_v34 = vpack.c.bf16 %v188_v26, %v186_v25 }
  0x17   :  { %2060 = vmatprep.subr.bf16.mxu0 %v2059_v4  ;;  %v447_v32 = vld [vmem:[%s4798_s1 + $0x908] sm:$0xff]  ;;  %v449_v33 = vld [vmem:[%s4798_s1 + $0x918] sm:$0xff]  ;;  %v2069_v35 = vpack.c.bf16 %v444_v29, %v442_v27  ;;  %v1815_v36 = vpack.c.bf16 %v193_v31, %v191_v30  ;;  %v190_v37 = vld [vmem:[%s4798_s1 + $0x100] sm:$0xff] }
  0x18   :  { %v192_v38 = vld [vmem:[%s4798_s1 + $0x110] sm:$0xff]  ;;  %v446_v39 = vld [vmem:[%s4798_s1 + $0x900] sm:$0xff]  ;;  %v2071_v40 = vpack.c.bf16 %v449_v33, %v447_v32  ;;  %v195_v42 = vld [vmem:[%s4798_s1 + $0x128] sm:$0xff] }
  0x19   :  { %1806 = vmatpush1.bf16.msra.mxu1 %v1805_v10  ;;  %v448_v41 = vld [vmem:[%s4798_s1 + $0x910] sm:$0xff]  ;;  %v197_v43 = vld [vmem:[%s4798_s1 + $0x138] sm:$0xff]  ;;  %v451_v44 = vld [vmem:[%s4798_s1 + $0x928] sm:$0xff]  ;;  %v1817_v46 = vpack.c.bf16 %v192_v38, %v190_v37 }
  0x1a   :  { %2062 = vmatpush1.bf16.msra.mxu0 %v2061_v11  ;;  %1808 = vmatprep.subr.bf16.mxu1 %v1807_v12  ;;  %v453_v45 = vld [vmem:[%s4798_s1 + $0x938] sm:$0xff]  ;;  %v2073_v47 = vpack.c.bf16 %v448_v41, %v446_v39  ;;  %v1819_v48 = vpack.c.bf16 %v197_v43, %v195_v42  ;;  %v194_v49 = vld [vmem:[%s4798_s1 + $0x120] sm:$0xff]  ;;  %v196_v50 = vld [vmem:[%s4798_s1 + $0x130] sm:$0xff] }
  0x1b   :  { %2064 = vmatprep.subr.bf16.mxu0 %v2063_v16  ;;  %v450_v51 = vld [vmem:[%s4798_s1 + $0x920] sm:$0xff]  ;;  %v2075_v52 = vpack.c.bf16 %v453_v45, %v451_v44  ;;  %v452_v53 = vld [vmem:[%s4798_s1 + $0x930] sm:$0xff]  ;;  %v199_v54 = vld [vmem:[%s4798_s1 + $0x148] sm:$0xff]  ;;  %v1821_v58 = vpack.c.bf16 %v196_v50, %v194_v49 }
  0x1c   :  { %v201_v55 = vld [vmem:[%s4798_s1 + $0x158] sm:$0xff]  ;;  %v455_v56 = vld [vmem:[%s4798_s1 + $0x948] sm:$0xff]  ;;  %v2077_v59 = vpack.c.bf16 %v452_v53, %v450_v51  ;;  %v198_v61 = vld [vmem:[%s4798_s1 + $0x140] sm:$0xff] }
  0x1d   :  { %1810 = vmatpush1.bf16.msra.mxu1 %v1809_v22  ;;  %v457_v57 = vld [vmem:[%s4798_s1 + $0x958] sm:$0xff]  ;;  %v1823_v60 = vpack.c.bf16 %v201_v55, %v199_v54  ;;  %v200_v62 = vld [vmem:[%s4798_s1 + $0x150] sm:$0xff]  ;;  %v454_v63 = vld [vmem:[%s4798_s1 + $0x940] sm:$0xff] }
  0x1e   :  { %2066 = vmatpush1.bf16.msra.mxu0 %v2065_v23  ;;  %1812 = vmatprep.subr.bf16.mxu1 %v1811_v24  ;;  %v2079_v0 = vpack.c.bf16 %v457_v57, %v455_v56  ;;  %v456_v1 = vld [vmem:[%s4798_s1 + $0x950] sm:$0xff]  ;;  %v203_v2 = vld [vmem:[%s4798_s1 + $0x168] sm:$0xff]  ;;  %v205_v3 = vld [vmem:[%s4798_s1 + $0x178] sm:$0xff]  ;;  %v1825_v6 = vpack.c.bf16 %v200_v62, %v198_v61 }
  0x1f   :  { %2068 = vmatprep.subr.bf16.mxu0 %v2067_v28  ;;  %v459_v4 = vld [vmem:[%s4798_s1 + $0x968] sm:$0xff]  ;;  %v461_v5 = vld [vmem:[%s4798_s1 + $0x978] sm:$0xff]  ;;  %v202_v7 = vld [vmem:[%s4798_s1 + $0x160] sm:$0xff]  ;;  %v2081_v8 = vpack.c.bf16 %v456_v1, %v454_v63  ;;  %v1827_v9 = vpack.c.bf16 %v205_v3, %v203_v2 }
  0x20   :  { %v204_v10 = vld [vmem:[%s4798_s1 + $0x170] sm:$0xff]  ;;  %v458_v11 = vld [vmem:[%s4798_s1 + $0x960] sm:$0xff]  ;;  %v2083_v13 = vpack.c.bf16 %v461_v5, %v459_v4  ;;  %v207_v14 = vld [vmem:[%s4798_s1 + $0x188] sm:$0xff] }
  0x21   :  { %1814 = vmatpush1.bf16.msra.mxu1 %v1813_v34  ;;  %v460_v12 = vld [vmem:[%s4798_s1 + $0x970] sm:$0xff]  ;;  %v209_v15 = vld [vmem:[%s4798_s1 + $0x198] sm:$0xff]  ;;  %v15_v16 = vld [vmem:[%s4799_s0 + $0x8] sm:$0xff]  ;;  %v1829_v20 = vpack.c.bf16 %v204_v10, %v202_v7 }
  0x22   :  { %2070 = vmatpush1.bf16.msra.mxu0 %v2069_v35  ;;  %1816 = vmatprep.subr.bf16.mxu1 %v1815_v36  ;;  %v463_v17 = vld [vmem:[%s4798_s1 + $0x988] sm:$0xff]  ;;  %v465_v18 = vld [vmem:[%s4798_s1 + $0x998] sm:$0xff]  ;;  %v2085_v21 = vpack.c.bf16 %v460_v12, %v458_v11  ;;  %v1831_v22 = vpack.c.bf16 %v209_v15, %v207_v14  ;;  %v206_v23 = vld [vmem:[%s4798_s1 + $0x180] sm:$0xff] }
  0x23   :  { %2072 = vmatprep.subr.bf16.mxu0 %v2071_v40  ;;  %810 = vmatprep.mubr.f32.mxu1 %v15_v16  ;;  %v23_v19 = vld [vmem:[%s4799_s0 + $0x48] sm:$0xff]  ;;  %v208_v24 = vld [vmem:[%s4798_s1 + $0x190] sm:$0xff]  ;;  %v462_v25 = vld [vmem:[%s4798_s1 + $0x980] sm:$0xff]  ;;  %v2087_v26 = vpack.c.bf16 %v465_v18, %v463_v17 }
  0x24   :  { %1262 = vmatprep.mubr.f32.mxu0 %v23_v19  ;;  %v464_v27 = vld [vmem:[%s4798_s1 + $0x990] sm:$0xff]  ;;  %v211_v28 = vld [vmem:[%s4798_s1 + $0x1a8] sm:$0xff]  ;;  %v213_v29 = vld [vmem:[%s4798_s1 + $0x1b8] sm:$0xff]  ;;  %v1833_v32 = vpack.c.bf16 %v208_v24, %v206_v23 }
  0x25   :  { %1818 = vmatpush1.bf16.msra.mxu1 %v1817_v46  ;;  %v467_v30 = vld [vmem:[%s4798_s1 + $0x9a8] sm:$0xff]  ;;  %v469_v31 = vld [vmem:[%s4798_s1 + $0x9b8] sm:$0xff]  ;;  %v2089_v33 = vpack.c.bf16 %v464_v27, %v462_v25  ;;  %v1835_v34 = vpack.c.bf16 %v213_v29, %v211_v28  ;;  %v210_v35 = vld [vmem:[%s4798_s1 + $0x1a0] sm:$0xff] }
  0x26   :  { %2074 = vmatpush1.bf16.msra.mxu0 %v2073_v47  ;;  %1820 = vmatprep.subr.bf16.mxu1 %v1819_v48  ;;  %v212_v36 = vld [vmem:[%s4798_s1 + $0x1b0] sm:$0xff]  ;;  %v466_v37 = vld [vmem:[%s4798_s1 + $0x9a0] sm:$0xff]  ;;  %v2091_v38 = vpack.c.bf16 %v469_v31, %v467_v30  ;;  %v215_v40 = vld [vmem:[%s4798_s1 + $0x1c8] sm:$0xff] }
  0x27   :  { %2076 = vmatprep.subr.bf16.mxu0 %v2075_v52  ;;  %v468_v39 = vld [vmem:[%s4798_s1 + $0x9b0] sm:$0xff]  ;;  %v217_v41 = vld [vmem:[%s4798_s1 + $0x1d8] sm:$0xff]  ;;  %v471_v42 = vld [vmem:[%s4798_s1 + $0x9c8] sm:$0xff]  ;;  %v1837_v44 = vpack.c.bf16 %v212_v36, %v210_v35 }
  0x28   :  { %v473_v43 = vld [vmem:[%s4798_s1 + $0x9d8] sm:$0xff]  ;;  %v2093_v45 = vpack.c.bf16 %v468_v39, %v466_v37  ;;  %v1839_v46 = vpack.c.bf16 %v217_v41, %v215_v40  ;;  %v214_v47 = vld [vmem:[%s4798_s1 + $0x1c0] sm:$0xff]  ;;  %v216_v48 = vld [vmem:[%s4798_s1 + $0x1d0] sm:$0xff] }
  0x29   :  { %1822 = vmatpush1.bf16.msra.mxu1 %v1821_v58  ;;  %v470_v49 = vld [vmem:[%s4798_s1 + $0x9c0] sm:$0xff]  ;;  %v2095_v50 = vpack.c.bf16 %v473_v43, %v471_v42  ;;  %v472_v51 = vld [vmem:[%s4798_s1 + $0x9d0] sm:$0xff]  ;;  %v219_v52 = vld [vmem:[%s4798_s1 + $0x1e8] sm:$0xff]  ;;  %v1841_v56 = vpack.c.bf16 %v216_v48, %v214_v47 }
  0x2a   :  { %2078 = vmatpush1.bf16.msra.mxu0 %v2077_v59  ;;  %1824 = vmatprep.subr.bf16.mxu1 %v1823_v60  ;;  %v221_v53 = vld [vmem:[%s4798_s1 + $0x1f8] sm:$0xff]  ;;  %v475_v54 = vld [vmem:[%s4798_s1 + $0x9e8] sm:$0xff]  ;;  %v2097_v57 = vpack.c.bf16 %v472_v51, %v470_v49  ;;  %v218_v59 = vld [vmem:[%s4798_s1 + $0x1e0] sm:$0xff] }
  0x2b   :  { %2080 = vmatprep.subr.bf16.mxu0 %v2079_v0  ;;  %v477_v55 = vld [vmem:[%s4798_s1 + $0x9f8] sm:$0xff]  ;;  %v1843_v58 = vpack.c.bf16 %v221_v53, %v219_v52  ;;  %v220_v60 = vld [vmem:[%s4798_s1 + $0x1f0] sm:$0xff]  ;;  %v474_v61 = vld [vmem:[%s4798_s1 + $0x9e0] sm:$0xff] }
  0x2c   :  { %v2099_v62 = vpack.c.bf16 %v477_v55, %v475_v54  ;;  %v476_v63 = vld [vmem:[%s4798_s1 + $0x9f0] sm:$0xff]  ;;  %v223_v0 = vld [vmem:[%s4798_s1 + $0x208] sm:$0xff]  ;;  %v225_v1 = vld [vmem:[%s4798_s1 + $0x218] sm:$0xff]  ;;  %v1845_v4 = vpack.c.bf16 %v220_v60, %v218_v59 }
  0x2d   :  { %1826 = vmatpush1.bf16.msra.mxu1 %v1825_v6  ;;  %v479_v2 = vld [vmem:[%s4798_s1 + $0xa08] sm:$0xff]  ;;  %v481_v3 = vld [vmem:[%s4798_s1 + $0xa18] sm:$0xff]  ;;  %v2101_v5 = vpack.c.bf16 %v476_v63, %v474_v61  ;;  %v1847_v6 = vpack.c.bf16 %v225_v1, %v223_v0  ;;  %v222_v7 = vld [vmem:[%s4798_s1 + $0x200] sm:$0xff] }
  0x2e   :  { %2082 = vmatpush1.bf16.msra.mxu0 %v2081_v8  ;;  %1828 = vmatprep.subr.bf16.mxu1 %v1827_v9  ;;  %v224_v8 = vld [vmem:[%s4798_s1 + $0x210] sm:$0xff]  ;;  %v478_v9 = vld [vmem:[%s4798_s1 + $0xa00] sm:$0xff]  ;;  %v2103_v10 = vpack.c.bf16 %v481_v3, %v479_v2  ;;  %v227_v12 = vld [vmem:[%s4798_s1 + $0x228] sm:$0xff] }
  0x2f   :  { %2084 = vmatprep.subr.bf16.mxu0 %v2083_v13  ;;  %v480_v11 = vld [vmem:[%s4798_s1 + $0xa10] sm:$0xff]  ;;  %v229_v13 = vld [vmem:[%s4798_s1 + $0x238] sm:$0xff]  ;;  %v483_v14 = vld [vmem:[%s4798_s1 + $0xa28] sm:$0xff]  ;;  %v1849_v17 = vpack.c.bf16 %v224_v8, %v222_v7 }
  0x30   :  { %v485_v15 = vld [vmem:[%s4798_s1 + $0xa38] sm:$0xff]  ;;  %v14_v16 = vld [vmem:[%s4799_s0] sm:$0xff]  ;;  %v2105_v19 = vpack.c.bf16 %v480_v11, %v478_v9  ;;  %v484_v25 = vld [vmem:[%s4798_s1 + $0xa30] sm:$0xff] }
  0x31   :  { %1830 = vmatpush1.bf16.msra.mxu1 %v1829_v20  ;;  %v22_v18 = vld [vmem:[%s4799_s0 + $0x40] sm:$0xff]  ;;  %v1851_v20 = vpack.c.bf16 %v229_v13, %v227_v12  ;;  %v2107_v24 = vpack.c.bf16 %v485_v15, %v483_v14  ;;  %v233_v27 = vld [vmem:[%s4798_s1 + $0x258] sm:$0xff]  ;;  %v487_v28 = vld [vmem:[%s4798_s1 + $0xa48] sm:$0xff] }
  0x32   :  { %2086 = vmatpush1.bf16.msra.mxu0 %v2085_v21  ;;  %1832 = vmatprep.subr.bf16.mxu1 %v1831_v22  ;;  %v226_v21 = vld [vmem:[%s4798_s1 + $0x220] sm:$0xff]  ;;  %v228_v22 = vld [vmem:[%s4798_s1 + $0x230] sm:$0xff]  ;;  %v489_v29 = vld [vmem:[%s4798_s1 + $0xa58] sm:$0xff] }
  0x33   :  { %2088 = vmatprep.subr.bf16.mxu0 %v2087_v26  ;;  %v482_v23 = vld [vmem:[%s4798_s1 + $0xa20] sm:$0xff]  ;;  %v231_v26 = vld [vmem:[%s4798_s1 + $0x248] sm:$0xff]  ;;  %v1853_v30 = vpack.c.bf16 %v228_v22, %v226_v21  ;;  %v488_v37 = vld [vmem:[%s4798_s1 + $0xa50] sm:$0xff]  ;;  %v2111_v39 = vpack.c.bf16 %v489_v29, %v487_v28 }
  0x34   :  { %v230_v31 = vld [vmem:[%s4798_s1 + $0x240] sm:$0xff]  ;;  %v1855_v35 = vpack.c.bf16 %v233_v27, %v231_v26  ;;  %v235_v40 = vld [vmem:[%s4798_s1 + $0x268] sm:$0xff]  ;;  %v237_v41 = vld [vmem:[%s4798_s1 + $0x278] sm:$0xff] }
  0x35   :  { %1834 = vmatpush1.bf16.msra.mxu1 %v1833_v32  ;;  %v232_v32 = vld [vmem:[%s4798_s1 + $0x250] sm:$0xff]  ;;  %v486_v36 = vld [vmem:[%s4798_s1 + $0xa40] sm:$0xff]  ;;  %v491_v43 = vld [vmem:[%s4798_s1 + $0xa68] sm:$0xff]  ;;  %v1859_v51 = vpack.c.bf16 %v237_v41, %v235_v40 }
  0x36   :  { %2090 = vmatpush1.bf16.msra.mxu0 %v2089_v33  ;;  %1836 = vmatprep.subr.bf16.mxu1 %v1835_v34  ;;  %v33_v33 = vld [vmem:[%s4799_s0 + $0x98] sm:$0xff]  ;;  %v2109_v34 = vpack.c.bf16 %v484_v25, %v482_v23  ;;  %v32_v42 = vld [vmem:[%s4799_s0 + $0x90] sm:$0xff]  ;;  %v234_v47 = vld [vmem:[%s4798_s1 + $0x260] sm:$0xff] }
  0x37   :  { %2092 = vmatprep.subr.bf16.mxu0 %v2091_v38  ;;  %v41_v38 = vld [vmem:[%s4799_s0 + $0xd8] sm:$0xff]  ;;  %v236_v48 = vld [vmem:[%s4798_s1 + $0x270] sm:$0xff]  ;;  %v51_v49 = vld [vmem:[%s4799_s0 + $0x128] sm:$0xff] }
  0x38   :  { %v490_v52 = vld [vmem:[%s4798_s1 + $0xa60] sm:$0xff]  ;;  %v492_v53 = vld [vmem:[%s4798_s1 + $0xa70] sm:$0xff]  ;;  %v59_v54 = vld [vmem:[%s4799_s0 + $0x168] sm:$0xff] }
  0x39   :  { %1838 = vmatpush1.bf16.msra.mxu1 %v1837_v44  ;;  %v493_v44 = vld [vmem:[%s4798_s1 + $0xa78] sm:$0xff]  ;;  %v495_v59 = vld [vmem:[%s4798_s1 + $0xa88] sm:$0xff]  ;;  %v58_v61 = vld [vmem:[%s4799_s0 + $0x160] sm:$0xff]  ;;  %v2117_v2 = vpack.c.bf16 %v492_v53, %v490_v52 }
  0x3a   :  { %2094 = vmatpush1.bf16.msra.mxu0 %v2093_v45  ;;  %1840 = vmatprep.subr.bf16.mxu1 %v1839_v46  ;;  %v40_v45 = vld [vmem:[%s4799_s0 + $0xd0] sm:$0xff]  ;;  %v1857_v46 = vpack.c.bf16 %v232_v32, %v230_v31  ;;  %v2115_v55 = vpack.c.bf16 %v493_v44, %v491_v43  ;;  %v497_v60 = vld [vmem:[%s4798_s1 + $0xa98] sm:$0xff]  ;;  %v238_v63 = vld [vmem:[%s4798_s1 + $0x280] sm:$0xff] }
  0x3b   :  { %2096 = vmatprep.subr.bf16.mxu0 %v2095_v50  ;;  %v2113_v50 = vpack.c.bf16 %v488_v37, %v486_v36  ;;  %v240_v0 = vld [vmem:[%s4798_s1 + $0x290] sm:$0xff]  ;;  %v69_v1 = vld [vmem:[%s4799_s0 + $0x1b8] sm:$0xff]  ;;  %v2119_v7 = vpack.c.bf16 %v497_v60, %v495_v59  ;;  %v243_v8 = vld [vmem:[%s4798_s1 + $0x2a8] sm:$0xff] }
  0x3c   :  { %v245_v9 = vld [vmem:[%s4798_s1 + $0x2b8] sm:$0xff]  ;;  %v499_v11 = vld [vmem:[%s4798_s1 + $0xaa8] sm:$0xff]  ;;  %v76_v13 = vld [vmem:[%s4799_s0 + $0x1f0] sm:$0xff]  ;;  %v1865_v14 = vpack.c.bf16 %v240_v0, %v238_v63 }
  0x3d   :  { %1842 = vmatpush1.bf16.msra.mxu1 %v1841_v56  ;;  %v239_v56 = vld [vmem:[%s4798_s1 + $0x288] sm:$0xff]  ;;  %v501_v12 = vld [vmem:[%s4798_s1 + $0xab8] sm:$0xff]  ;;  %v242_v15 = vld [vmem:[%s4798_s1 + $0x2a0] sm:$0xff] }
  0x3e   :  { %2098 = vmatpush1.bf16.msra.mxu0 %v2097_v57  ;;  %1844 = vmatprep.subr.bf16.mxu1 %v1843_v58  ;;  %v241_v57 = vld [vmem:[%s4798_s1 + $0x298] sm:$0xff]  ;;  %v50_v58 = vld [vmem:[%s4799_s0 + $0x120] sm:$0xff]  ;;  %v500_v21 = vld [vmem:[%s4798_s1 + $0xab0] sm:$0xff]  ;;  %v2123_v23 = vpack.c.bf16 %v501_v12, %v499_v11 }
  0x3f   :  { %2100 = vmatprep.subr.bf16.mxu0 %v2099_v62  ;;  %v1861_v62 = vpack.c.bf16 %v236_v48, %v234_v47  ;;  %v1863_v3 = vpack.c.bf16 %v241_v57, %v239_v56  ;;  %v95_v22 = vld [vmem:[%s4799_s0 + $0x288] sm:$0xff]  ;;  %v249_v25 = vld [vmem:[%s4798_s1 + $0x2d8] sm:$0xff]  ;;  %v86_v26 = vld [vmem:[%s4799_s0 + $0x240] sm:$0xff] }
  0x40   :  { %v503_v27 = vld [vmem:[%s4798_s1 + $0xac8] sm:$0xff]  ;;  %v505_v28 = vld [vmem:[%s4798_s1 + $0xad8] sm:$0xff]  ;;  %v94_v29 = vld [vmem:[%s4799_s0 + $0x280] sm:$0xff] }
  0x41   :  { %1846 = vmatpush1.bf16.msra.mxu1 %v1845_v4  ;;  %v494_v4 = vld [vmem:[%s4798_s1 + $0xa80] sm:$0xff]  ;;  %v248_v32 = vld [vmem:[%s4798_s1 + $0x2d0] sm:$0xff]  ;;  %v251_v40 = vld [vmem:[%s4798_s1 + $0x2e8] sm:$0xff] }
  0x42   :  { %2102 = vmatpush1.bf16.msra.mxu0 %v2101_v5  ;;  %1848 = vmatprep.subr.bf16.mxu1 %v1847_v6  ;;  %v496_v5 = vld [vmem:[%s4798_s1 + $0xa90] sm:$0xff]  ;;  %v77_v6 = vld [vmem:[%s4799_s0 + $0x1f8] sm:$0xff]  ;;  %v246_v31 = vld [vmem:[%s4798_s1 + $0x2c0] sm:$0xff] }
  0x43   :  { %2104 = vmatprep.subr.bf16.mxu0 %v2103_v10  ;;  %v68_v10 = vld [vmem:[%s4799_s0 + $0x1b0] sm:$0xff]  ;;  %v502_v36 = vld [vmem:[%s4798_s1 + $0xac0] sm:$0xff]  ;;  %v253_v41 = vld [vmem:[%s4798_s1 + $0x2f8] sm:$0xff] }
  0x44   :  { %811 = vmatmul.mubr.f32.vlgmr.msra.gmra.mrb[0].mxu1 %v14_v16  ;;  %v244_v16 = vld [vmem:[%s4798_s1 + $0x2b0] sm:$0xff]  ;;  %v507_v43 = vld [vmem:[%s4798_s1 + $0xae8] sm:$0xff]  ;;  %v509_v44 = vld [vmem:[%s4798_s1 + $0xaf8] sm:$0xff] }
  0x45   :  { %1850 = vmatpush1.bf16.msra.mxu1 %v1849_v17  ;;  %1263 = vmatmul.mubr.f32.vlgmr.msra.gmra.mrb[0].mxu0 %v22_v18  ;;  %v87_v17 = vld [vmem:[%s4799_s0 + $0x248] sm:$0xff]  ;;  %v2121_v18 = vpack.c.bf16 %v496_v5, %v494_v4  ;;  %v504_v37 = vld [vmem:[%s4798_s1 + $0xad0] sm:$0xff]  ;;  %v250_v47 = vld [vmem:[%s4798_s1 + $0x2e0] sm:$0xff] }
  0x46   :  { %2106 = vmatpush1.bf16.msra.mxu0 %v2105_v19  ;;  %1852 = vmatprep.subr.bf16.mxu1 %v1851_v20  ;;  %v1867_v19 = vpack.c.bf16 %v245_v9, %v243_v8  ;;  %v498_v20 = vld [vmem:[%s4798_s1 + $0xaa0] sm:$0xff]  ;;  %v252_v48 = vld [vmem:[%s4798_s1 + $0x2f0] sm:$0xff]  ;;  %v255_v56 = vld [vmem:[%s4798_s1 + $0x308] sm:$0xff] }
  0x47   :  { %2108 = vmatprep.subr.bf16.mxu0 %v2107_v24  ;;  %816 = vmatprep.mubr.f32.mxu1 %v33_v33  ;;  %v247_v24 = vld [vmem:[%s4798_s1 + $0x2c8] sm:$0xff]  ;;  %v105_v33 = vld [vmem:[%s4799_s0 + $0x2d8] sm:$0xff]  ;;  %v506_v52 = vld [vmem:[%s4798_s1 + $0xae0] sm:$0xff] }
  0x48   :  { %1268 = vmatprep.mubr.f32.mxu0 %v41_v38  ;;  %817 = vmatmul.mubr.f32.gmra.mrb[2].mxu1 %v32_v42  ;;  %v113_v38 = vld [vmem:[%s4799_s0 + $0x318] sm:$0xff]  ;;  %v104_v42 = vld [vmem:[%s4799_s0 + $0x2d0] sm:$0xff]  ;;  %v511_v59 = vld [vmem:[%s4798_s1 + $0xb08] sm:$0xff] }
  0x49   :  { %1854 = vmatpush1.bf16.msra.mxu1 %v1853_v30  ;;  %1269 = vmatmul.mubr.f32.gmra.mrb[2].mxu0 %v40_v45  ;;  %v1869_v30 = vpack.c.bf16 %v244_v16, %v242_v15  ;;  %v112_v45 = vld [vmem:[%s4799_s0 + $0x310] sm:$0xff]  ;;  %v257_v57 = vld [vmem:[%s4798_s1 + $0x318] sm:$0xff]  ;;  %v254_v63 = vld [vmem:[%s4798_s1 + $0x300] sm:$0xff] }
  0x4a   :  { %2110 = vmatpush1.bf16.msra.mxu0 %v2109_v34  ;;  %1856 = vmatprep.subr.bf16.mxu1 %v1855_v35  ;;  %v2125_v34 = vpack.c.bf16 %v500_v21, %v498_v20  ;;  %v1871_v35 = vpack.c.bf16 %v249_v25, %v247_v24  ;;  %v508_v53 = vld [vmem:[%s4798_s1 + $0xaf0] sm:$0xff]  ;;  %v513_v60 = vld [vmem:[%s4798_s1 + $0xb18] sm:$0xff]  ;;  %v510_v4 = vld [vmem:[%s4798_s1 + $0xb00] sm:$0xff] }
  0x4b   :  { %2112 = vmatprep.subr.bf16.mxu0 %v2111_v39  ;;  %822 = vmatprep.mubr.f32.mxu1 %v51_v49  ;;  %v2127_v39 = vpack.c.bf16 %v505_v28, %v503_v27  ;;  %v123_v49 = vld [vmem:[%s4799_s0 + $0x368] sm:$0xff]  ;;  %v256_v0 = vld [vmem:[%s4798_s1 + $0x310] sm:$0xff]  ;;  %v261_v9 = vld [vmem:[%s4798_s1 + $0x338] sm:$0xff] }
  0x4c   :  { %1274 = vmatprep.mubr.f32.mxu0 %v59_v54  ;;  %823 = vmatmul.mubr.f32.gmra.mrb[4].mxu1 %v50_v58  ;;  %v131_v54 = vld [vmem:[%s4799_s0 + $0x3a8] sm:$0xff]  ;;  %v122_v58 = vld [vmem:[%s4799_s0 + $0x360] sm:$0xff]  ;;  %v512_v5 = vld [vmem:[%s4798_s1 + $0xb10] sm:$0xff] }
  0x4d   :  { %1858 = vmatpush1.bf16.msra.mxu1 %v1857_v46  ;;  %1275 = vmatmul.mubr.f32.gmra.mrb[4].mxu0 %v58_v61  ;;  %v1873_v46 = vpack.c.bf16 %v248_v32, %v246_v31  ;;  %v130_v61 = vld [vmem:[%s4799_s0 + $0x3a0] sm:$0xff]  ;;  %v259_v8 = vld [vmem:[%s4798_s1 + $0x328] sm:$0xff]  ;;  %v517_v12 = vld [vmem:[%s4798_s1 + $0xb38] sm:$0xff] }
  0x4e   :  { %2114 = vmatpush1.bf16.msra.mxu0 %v2113_v50  ;;  %1860 = vmatprep.subr.bf16.mxu1 %v1859_v51  ;;  %v2129_v50 = vpack.c.bf16 %v504_v37, %v502_v36  ;;  %v1875_v51 = vpack.c.bf16 %v253_v41, %v251_v40  ;;  %v515_v11 = vld [vmem:[%s4798_s1 + $0xb28] sm:$0xff]  ;;  %v258_v15 = vld [vmem:[%s4798_s1 + $0x320] sm:$0xff]  ;;  %v17_v16 = vld [vmem:[%s4799_s0 + $0x18] sm:$0xff] }
  0x4f   :  { %2116 = vmatprep.subr.bf16.mxu0 %v2115_v55  ;;  %828 = vmatprep.mubr.f32.mxu1 %v69_v1  ;;  %v2131_v55 = vpack.c.bf16 %v509_v44, %v507_v43  ;;  %v141_v1 = vld [vmem:[%s4799_s0 + $0x3f8] sm:$0xff]  ;;  %v514_v20 = vld [vmem:[%s4798_s1 + $0xb20] sm:$0xff]  ;;  %v263_v24 = vld [vmem:[%s4798_s1 + $0x348] sm:$0xff] }
  0x50   :  { %1280 = vmatprep.mubr.f32.mxu0 %v77_v6  ;;  %829 = vmatmul.mubr.f32.gmra.mrb[6].mxu1 %v68_v10  ;;  %v149_v6 = vld [vmem:[%s4799_s0 + $0x438] sm:$0xff]  ;;  %v140_v10 = vld [vmem:[%s4799_s0 + $0x3f0] sm:$0xff]  ;;  %v262_v31 = vld [vmem:[%s4798_s1 + $0x340] sm:$0xff] }
  0x51   :  { %1862 = vmatpush1.bf16.msra.mxu1 %v1861_v62  ;;  %1281 = vmatmul.mubr.f32.gmra.mrb[6].mxu0 %v76_v13  ;;  %v1877_v62 = vpack.c.bf16 %v252_v48, %v250_v47  ;;  %v148_v13 = vld [vmem:[%s4799_s0 + $0x430] sm:$0xff]  ;;  %v25_v21 = vld [vmem:[%s4799_s0 + $0x58] sm:$0xff]  ;;  %v267_v36 = vld [vmem:[%s4798_s1 + $0x368] sm:$0xff] }
  0x52   :  { %2118 = vmatpush1.bf16.msra.mxu0 %v2117_v2  ;;  %1864 = vmatprep.subr.bf16.mxu1 %v1863_v3  ;;  %v2133_v2 = vpack.c.bf16 %v508_v53, %v506_v52  ;;  %v1879_v3 = vpack.c.bf16 %v257_v57, %v255_v56  ;;  %v265_v25 = vld [vmem:[%s4798_s1 + $0x358] sm:$0xff]  ;;  %v264_v32 = vld [vmem:[%s4798_s1 + $0x350] sm:$0xff]  ;;  %v266_v43 = vld [vmem:[%s4798_s1 + $0x360] sm:$0xff] }
  0x53   :  { %2120 = vmatprep.subr.bf16.mxu0 %v2119_v7  ;;  %834 = vmatprep.mubr.f32.mxu1 %v87_v17  ;;  %v2135_v7 = vpack.c.bf16 %v513_v60, %v511_v59  ;;  %v2137_v17 = vpack.c.bf16 %v512_v5, %v510_v4  ;;  %v521_v27 = vld [vmem:[%s4798_s1 + $0xb58] sm:$0xff]  ;;  %v1889_v40 = vpack.c.bf16 %v264_v32, %v262_v31  ;;  %v268_v44 = vld [vmem:[%s4798_s1 + $0x370] sm:$0xff]  ;;  %v271_v48 = vld [vmem:[%s4798_s1 + $0x388] sm:$0xff] }
  0x54   :  { %1286 = vmatprep.mubr.f32.mxu0 %v95_v22  ;;  %835 = vmatmul.mubr.f32.gmra.mrb[8].mxu1 %v86_v26  ;;  %v2139_v22 = vpack.c.bf16 %v517_v12, %v515_v11  ;;  %v519_v26 = vld [vmem:[%s4798_s1 + $0xb48] sm:$0xff]  ;;  %v269_v37 = vld [vmem:[%s4798_s1 + $0x378] sm:$0xff]  ;;  %v524_v47 = vld [vmem:[%s4798_s1 + $0xb70] sm:$0xff]  ;;  %v1893_v52 = vpack.c.bf16 %v268_v44, %v266_v43 }
  0x55   :  { %1866 = vmatpush1.bf16.msra.mxu1 %v1865_v14  ;;  %1287 = vmatmul.mubr.f32.gmra.mrb[8].mxu0 %v94_v29  ;;  %v1881_v14 = vpack.c.bf16 %v256_v0, %v254_v63  ;;  %v272_v56 = vld [vmem:[%s4798_s1 + $0x390] sm:$0xff]  ;;  %v526_v57 = vld [vmem:[%s4798_s1 + $0xb80] sm:$0xff]  ;;  %v275_v60 = vld [vmem:[%s4798_s1 + $0x3a8] sm:$0xff] }
  0x56   :  { %2122 = vmatpush1.bf16.msra.mxu0 %v2121_v18  ;;  %1868 = vmatprep.subr.bf16.mxu1 %v1867_v19  ;;  %v1883_v18 = vpack.c.bf16 %v261_v9, %v259_v8  ;;  %v260_v19 = vld [vmem:[%s4798_s1 + $0x330] sm:$0xff]  ;;  %v533_v63 = vld [vmem:[%s4798_s1 + $0xbb8] sm:$0xff]  ;;  %v530_v5 = vld [vmem:[%s4798_s1 + $0xba0] sm:$0xff] }
  0x57   :  { %2124 = vmatprep.subr.bf16.mxu0 %v2123_v23  ;;  %840 = vmatprep.mubr.f32.mxu1 %v105_v33  ;;  %v516_v23 = vld [vmem:[%s4798_s1 + $0xb30] sm:$0xff]  ;;  %v1885_v28 = vpack.c.bf16 %v260_v19, %v258_v15  ;;  %v518_v33 = vld [vmem:[%s4798_s1 + $0xb40] sm:$0xff]  ;;  %v279_v8 = vld [vmem:[%s4798_s1 + $0x3c8] sm:$0xff] }
  0x58   :  { %1292 = vmatprep.mubr.f32.mxu0 %v113_v38  ;;  %841 = vmatmul.mubr.f32.gmra.mrb[10].mxu1 %v104_v42  ;;  %v2141_v29 = vpack.c.bf16 %v516_v23, %v514_v20  ;;  %v523_v38 = vld [vmem:[%s4798_s1 + $0xb68] sm:$0xff]  ;;  %v1891_v42 = vpack.c.bf16 %v269_v37, %v267_v36  ;;  %v528_v59 = vld [vmem:[%s4798_s1 + $0xb90] sm:$0xff]  ;;  %v281_v9 = vld [vmem:[%s4798_s1 + $0x3d8] sm:$0xff] }
  0x59   :  { %1870 = vmatpush1.bf16.msra.mxu1 %v1869_v30  ;;  %1293 = vmatmul.mubr.f32.gmra.mrb[10].mxu0 %v112_v45  ;;  %v1887_v30 = vpack.c.bf16 %v265_v25, %v263_v24  ;;  %v522_v45 = vld [vmem:[%s4798_s1 + $0xb60] sm:$0xff]  ;;  %v276_v4 = vld [vmem:[%s4798_s1 + $0x3b0] sm:$0xff]  ;;  %v537_v11 = vld [vmem:[%s4798_s1 + $0xbd8] sm:$0xff] }
  0x5a   :  { %2126 = vmatpush1.bf16.msra.mxu0 %v2125_v34  ;;  %1872 = vmatprep.subr.bf16.mxu1 %v1871_v35  ;;  %v2143_v34 = vpack.c.bf16 %v521_v27, %v519_v26  ;;  %v520_v35 = vld [vmem:[%s4798_s1 + $0xb50] sm:$0xff]  ;;  %v2149_v53 = vpack.c.bf16 %v524_v47, %v522_v45  ;;  %v278_v15 = vld [vmem:[%s4798_s1 + $0x3c0] sm:$0xff]  ;;  %v283_v20 = vld [vmem:[%s4798_s1 + $0x3e8] sm:$0xff] }
  0x5b   :  { %2128 = vmatprep.subr.bf16.mxu0 %v2127_v39  ;;  %846 = vmatprep.mubr.f32.mxu1 %v123_v49  ;;  %v525_v39 = vld [vmem:[%s4798_s1 + $0xb78] sm:$0xff]  ;;  %v2145_v41 = vpack.c.bf16 %v520_v35, %v518_v33  ;;  %v536_v19 = vld [vmem:[%s4798_s1 + $0xbd0] sm:$0xff]  ;;  %v282_v27 = vld [vmem:[%s4798_s1 + $0x3e0] sm:$0xff] }
  0x5c   :  { %1298 = vmatprep.mubr.f32.mxu0 %v131_v54  ;;  %847 = vmatmul.mubr.f32.gmra.mrb[12].mxu1 %v122_v58  ;;  %v273_v49 = vld [vmem:[%s4798_s1 + $0x398] sm:$0xff]  ;;  %v540_v31 = vld [vmem:[%s4798_s1 + $0xbf0] sm:$0xff]  ;;  %v287_v32 = vld [vmem:[%s4798_s1 + $0x408] sm:$0xff] }
  0x5d   :  { %1874 = vmatpush1.bf16.msra.mxu1 %v1873_v46  ;;  %1299 = vmatmul.mubr.f32.gmra.mrb[12].mxu0 %v130_v61  ;;  %v2147_v46 = vpack.c.bf16 %v525_v39, %v523_v38  ;;  %v1895_v54 = vpack.c.bf16 %v273_v49, %v271_v48  ;;  %v277_v61 = vld [vmem:[%s4798_s1 + $0x3b8] sm:$0xff]  ;;  %v286_v39 = vld [vmem:[%s4798_s1 + $0x400] sm:$0xff]  ;;  %v544_v43 = vld [vmem:[%s4798_s1 + $0xc10] sm:$0xff] }
  0x5e   :  { %2130 = vmatpush1.bf16.msra.mxu0 %v2129_v50  ;;  %1876 = vmatprep.subr.bf16.mxu1 %v1875_v51  ;;  %v527_v50 = vld [vmem:[%s4798_s1 + $0xb88] sm:$0xff]  ;;  %v529_v51 = vld [vmem:[%s4798_s1 + $0xb98] sm:$0xff]  ;;  %v16_v48 = vld [vmem:[%s4799_s0 + $0x10] sm:$0xff] }
  0x5f   :  { %2132 = vmatprep.subr.bf16.mxu0 %v2131_v55  ;;  %852 = vmatprep.mubr.f32.mxu1 %v141_v1  ;;  %v270_v55 = vld [vmem:[%s4798_s1 + $0x380] sm:$0xff]  ;;  %v2151_v58 = vpack.c.bf16 %v529_v51, %v527_v50  ;;  %v2153_v1 = vpack.c.bf16 %v528_v59, %v526_v57  ;;  %v541_v23 = vld [vmem:[%s4798_s1 + $0xbf8] sm:$0xff]  ;;  %v291_v44 = vld [vmem:[%s4798_s1 + $0x428] sm:$0xff] }
  0x60   :  { %1304 = vmatprep.mubr.f32.mxu0 %v149_v6  ;;  %853 = vmatmul.mubr.f32.gmra.mrb[14].mxu1 %v140_v10  ;;  %v1897_v0 = vpack.c.bf16 %v272_v56, %v270_v55  ;;  %v535_v10 = vld [vmem:[%s4798_s1 + $0xbc8] sm:$0xff]  ;;  %v289_v33 = vld [vmem:[%s4798_s1 + $0x418] sm:$0xff]  ;;  %v24_v50 = vld [vmem:[%s4799_s0 + $0x50] sm:$0xff] }
  0x61   :  { %1878 = vmatpush1.bf16.msra.mxu1 %v1877_v62  ;;  %1305 = vmatmul.mubr.f32.gmra.mrb[14].mxu0 %v148_v13  ;;  %v531_v62 = vld [vmem:[%s4798_s1 + $0xba8] sm:$0xff]  ;;  %v545_v35 = vld [vmem:[%s4798_s1 + $0xc18] sm:$0xff]  ;;  %v1911_v38 = vpack.c.bf16 %v289_v33, %v287_v32  ;;  %v546_v55 = vld [vmem:[%s4798_s1 + $0xc20] sm:$0xff] }
  0x62   :  { %2134 = vmatpush1.bf16.msra.mxu0 %v2133_v2  ;;  %1880 = vmatprep.subr.bf16.mxu1 %v1879_v3  ;;  %v1899_v2 = vpack.c.bf16 %v277_v61, %v275_v60  ;;  %v274_v3 = vld [vmem:[%s4798_s1 + $0x3a0] sm:$0xff]  ;;  %v2155_v6 = vpack.c.bf16 %v533_v63, %v531_v62  ;;  %v293_v45 = vld [vmem:[%s4798_s1 + $0x438] sm:$0xff]  ;;  %v548_v57 = vld [vmem:[%s4798_s1 + $0xc30] sm:$0xff] }
  0x63   :  { %2136 = vmatprep.subr.bf16.mxu0 %v2135_v7  ;;  %923 = vmatprep.mubr.f32.mxu1 %v17_v16  ;;  %v532_v7 = vld [vmem:[%s4798_s1 + $0xbb0] sm:$0xff]  ;;  %v1901_v12 = vpack.c.bf16 %v276_v4, %v274_v3  ;;  %v549_v47 = vld [vmem:[%s4798_s1 + $0xc38] sm:$0xff]  ;;  %v551_v60 = vld [vmem:[%s4798_s1 + $0xc48] sm:$0xff]  ;;  %v2173_v3 = vpack.c.bf16 %v548_v57, %v546_v55 }
  0x64   :  { %1375 = vmatprep.mubr.f32.mxu0 %v25_v21  ;;  %v2157_v13 = vpack.c.bf16 %v532_v7, %v530_v5  ;;  %v280_v16 = vld [vmem:[%s4798_s1 + $0x3d0] sm:$0xff]  ;;  %v285_v21 = vld [vmem:[%s4798_s1 + $0x3f8] sm:$0xff]  ;;  %v35_v62 = vld [vmem:[%s4799_s0 + $0xa8] sm:$0xff] }
  0x65   :  { %1882 = vmatpush1.bf16.msra.mxu1 %v1881_v14  ;;  %v1903_v14 = vpack.c.bf16 %v281_v9, %v279_v8  ;;  %v1905_v24 = vpack.c.bf16 %v280_v16, %v278_v15  ;;  %v1907_v26 = vpack.c.bf16 %v285_v21, %v283_v20  ;;  %v297_v59 = vld [vmem:[%s4798_s1 + $0x458] sm:$0xff]  ;;  %v296_v5 = vld [vmem:[%s4798_s1 + $0x450] sm:$0xff]  ;;  %v42_v7 = vld [vmem:[%s4799_s0 + $0xe0] sm:$0xff] }
  0x66   :  { %2138 = vmatpush1.bf16.msra.mxu0 %v2137_v17  ;;  %1884 = vmatprep.subr.bf16.mxu1 %v1883_v18  ;;  %v534_v17 = vld [vmem:[%s4798_s1 + $0xbc0] sm:$0xff]  ;;  %v2159_v18 = vpack.c.bf16 %v537_v11, %v535_v10  ;;  %v553_v61 = vld [vmem:[%s4798_s1 + $0xc58] sm:$0xff]  ;;  %v552_v9 = vld [vmem:[%s4798_s1 + $0xc50] sm:$0xff] }
  0x67   :  { %2140 = vmatprep.subr.bf16.mxu0 %v2139_v22  ;;  %v539_v22 = vld [vmem:[%s4798_s1 + $0xbe8] sm:$0xff]  ;;  %v2161_v25 = vpack.c.bf16 %v536_v19, %v534_v17  ;;  %v2175_v8 = vpack.c.bf16 %v553_v61, %v551_v60  ;;  %v301_v11 = vld [vmem:[%s4798_s1 + $0x478] sm:$0xff]  ;;  %v298_v16 = vld [vmem:[%s4798_s1 + $0x460] sm:$0xff] }
  0x68   :  { %v299_v10 = vld [vmem:[%s4798_s1 + $0x468] sm:$0xff]  ;;  %v61_v17 = vld [vmem:[%s4799_s0 + $0x178] sm:$0xff]  ;;  %v300_v21 = vld [vmem:[%s4798_s1 + $0x470] sm:$0xff] }
  0x69   :  { %1886 = vmatpush1.bf16.msra.mxu1 %v1885_v28  ;;  %v284_v28 = vld [vmem:[%s4798_s1 + $0x3f0] sm:$0xff]  ;;  %v1923_v20 = vpack.c.bf16 %v301_v11, %v299_v10  ;;  %v302_v32 = vld [vmem:[%s4798_s1 + $0x480] sm:$0xff]  ;;  %v79_v33 = vld [vmem:[%s4799_s0 + $0x208] sm:$0xff] }
  0x6a   :  { %2142 = vmatpush1.bf16.msra.mxu0 %v2141_v29  ;;  %1888 = vmatprep.subr.bf16.mxu1 %v1887_v30  ;;  %v538_v29 = vld [vmem:[%s4798_s1 + $0xbe0] sm:$0xff]  ;;  %v2163_v30 = vpack.c.bf16 %v541_v23, %v539_v22  ;;  %v1909_v36 = vpack.c.bf16 %v284_v28, %v282_v27  ;;  %v60_v23 = vld [vmem:[%s4799_s0 + $0x170] sm:$0xff]  ;;  %v305_v27 = vld [vmem:[%s4798_s1 + $0x498] sm:$0xff] }
  0x6b   :  { %2144 = vmatprep.subr.bf16.mxu0 %v2143_v34  ;;  %v543_v34 = vld [vmem:[%s4798_s1 + $0xc08] sm:$0xff]  ;;  %v2165_v37 = vpack.c.bf16 %v540_v31, %v538_v29  ;;  %v554_v22 = vld [vmem:[%s4798_s1 + $0xc60] sm:$0xff]  ;;  %v561_v29 = vld [vmem:[%s4798_s1 + $0xc98] sm:$0xff]  ;;  %v1925_v31 = vpack.c.bf16 %v300_v21, %v298_v16 }
  0x6c   :  { %v559_v28 = vld [vmem:[%s4798_s1 + $0xc88] sm:$0xff]  ;;  %v96_v55 = vld [vmem:[%s4799_s0 + $0x290] sm:$0xff]  ;;  %v569_v61 = vld [vmem:[%s4798_s1 + $0xcd8] sm:$0xff] }
  0x6d   :  { %1890 = vmatpush1.bf16.msra.mxu1 %v1889_v40  ;;  %v288_v40 = vld [vmem:[%s4798_s1 + $0x410] sm:$0xff]  ;;  %v567_v60 = vld [vmem:[%s4798_s1 + $0xcc8] sm:$0xff]  ;;  %v317_v11 = vld [vmem:[%s4798_s1 + $0x4f8] sm:$0xff] }
  0x6e   :  { %2146 = vmatpush1.bf16.msra.mxu0 %v2145_v41  ;;  %1892 = vmatprep.subr.bf16.mxu1 %v1891_v42  ;;  %v542_v41 = vld [vmem:[%s4798_s1 + $0xc00] sm:$0xff]  ;;  %v2167_v42 = vpack.c.bf16 %v545_v35, %v543_v34  ;;  %v1913_v49 = vpack.c.bf16 %v288_v40, %v286_v39  ;;  %v2183_v40 = vpack.c.bf16 %v561_v29, %v559_v28  ;;  %v564_v57 = vld [vmem:[%s4798_s1 + $0xcb0] sm:$0xff]  ;;  %v315_v10 = vld [vmem:[%s4798_s1 + $0x4e8] sm:$0xff] }
  0x6f   :  { %2148 = vmatprep.subr.bf16.mxu0 %v2147_v46  ;;  %v547_v46 = vld [vmem:[%s4798_s1 + $0xc28] sm:$0xff]  ;;  %v2169_v51 = vpack.c.bf16 %v544_v43, %v542_v41  ;;  %v70_v34 = vld [vmem:[%s4799_s0 + $0x1c0] sm:$0xff]  ;;  %v560_v41 = vld [vmem:[%s4798_s1 + $0xc90] sm:$0xff] }
  0x70   :  { %v2171_v56 = vpack.c.bf16 %v549_v47, %v547_v46  ;;  %v78_v39 = vld [vmem:[%s4799_s0 + $0x200] sm:$0xff]  ;;  %v309_v43 = vld [vmem:[%s4798_s1 + $0x4b8] sm:$0xff]  ;;  %v316_v21 = vld [vmem:[%s4798_s1 + $0x4f0] sm:$0xff] }
  0x71   :  { %1894 = vmatpush1.bf16.msra.mxu1 %v1893_v52  ;;  %v1915_v52 = vpack.c.bf16 %v293_v45, %v291_v44  ;;  %v563_v44 = vld [vmem:[%s4798_s1 + $0xca8] sm:$0xff]  ;;  %v565_v45 = vld [vmem:[%s4798_s1 + $0xcb8] sm:$0xff]  ;;  %v314_v16 = vld [vmem:[%s4798_s1 + $0x4e0] sm:$0xff] }
  0x72   :  { %2150 = vmatpush1.bf16.msra.mxu0 %v2149_v53  ;;  %1896 = vmatprep.subr.bf16.mxu1 %v1895_v54  ;;  %v290_v53 = vld [vmem:[%s4798_s1 + $0x420] sm:$0xff]  ;;  %v292_v54 = vld [vmem:[%s4798_s1 + $0x430] sm:$0xff]  ;;  %v89_v46 = vld [vmem:[%s4799_s0 + $0x258] sm:$0xff] }
  0x73   :  { %2152 = vmatprep.subr.bf16.mxu0 %v2151_v58  ;;  %v295_v58 = vld [vmem:[%s4798_s1 + $0x448] sm:$0xff]  ;;  %v1917_v63 = vpack.c.bf16 %v292_v54, %v290_v53  ;;  %v308_v53 = vld [vmem:[%s4798_s1 + $0x4b0] sm:$0xff]  ;;  %v562_v54 = vld [vmem:[%s4798_s1 + $0xca0] sm:$0xff] }
  0x74   :  { %v1919_v4 = vpack.c.bf16 %v297_v59, %v295_v58  ;;  %v311_v58 = vld [vmem:[%s4798_s1 + $0x4c8] sm:$0xff]  ;;  %v313_v59 = vld [vmem:[%s4798_s1 + $0x4d8] sm:$0xff] }
  0x75   :  { %1898 = vmatpush1.bf16.msra.mxu1 %v1897_v0  ;;  %v294_v0 = vld [vmem:[%s4798_s1 + $0x440] sm:$0xff]  ;;  %v575_v28 = vld [vmem:[%s4798_s1 + $0xd08] sm:$0xff]  ;;  %v577_v29 = vld [vmem:[%s4798_s1 + $0xd18] sm:$0xff] }
  0x76   :  { %2154 = vmatpush1.bf16.msra.mxu0 %v2153_v1  ;;  %1900 = vmatprep.subr.bf16.mxu1 %v1899_v2  ;;  %v43_v1 = vld [vmem:[%s4799_s0 + $0xe8] sm:$0xff]  ;;  %v34_v2 = vld [vmem:[%s4799_s0 + $0xa0] sm:$0xff]  ;;  %v1921_v15 = vpack.c.bf16 %v296_v5, %v294_v0  ;;  %v312_v5 = vld [vmem:[%s4798_s1 + $0x4d0] sm:$0xff] }
  0x77   :  { %2156 = vmatprep.subr.bf16.mxu0 %v2155_v6  ;;  %v550_v6 = vld [vmem:[%s4798_s1 + $0xc40] sm:$0xff] }
  0x78   :  { %v2177_v19 = vpack.c.bf16 %v552_v9, %v550_v6  ;;  %v310_v0 = vld [vmem:[%s4798_s1 + $0x4c0] sm:$0xff]  ;;  %v568_v9 = vld [vmem:[%s4798_s1 + $0xcd0] sm:$0xff] }
  0x79   :  { %1902 = vmatpush1.bf16.msra.mxu1 %v1901_v12  ;;  %v555_v12 = vld [vmem:[%s4798_s1 + $0xc68] sm:$0xff]  ;;  %v566_v6 = vld [vmem:[%s4798_s1 + $0xcc0] sm:$0xff] }
  0x7a   :  { %2158 = vmatpush1.bf16.msra.mxu0 %v2157_v13  ;;  %1904 = vmatprep.subr.bf16.mxu1 %v1903_v14  ;;  %v557_v13 = vld [vmem:[%s4798_s1 + $0xc78] sm:$0xff] }
  0x7b   :  { %2160 = vmatprep.subr.bf16.mxu0 %v2159_v18  ;;  %v53_v14 = vld [vmem:[%s4799_s0 + $0x138] sm:$0xff]  ;;  %v52_v18 = vld [vmem:[%s4799_s0 + $0x130] sm:$0xff] }
  0x7d   :  { %1906 = vmatpush1.bf16.msra.mxu1 %v1905_v24  ;;  %v2179_v24 = vpack.c.bf16 %v557_v13, %v555_v12  ;;  %v571_v12 = vld [vmem:[%s4798_s1 + $0xce8] sm:$0xff]  ;;  %v573_v13 = vld [vmem:[%s4798_s1 + $0xcf8] sm:$0xff] }
  0x7e   :  { %2162 = vmatpush1.bf16.msra.mxu0 %v2161_v25  ;;  %1908 = vmatprep.subr.bf16.mxu1 %v1907_v26  ;;  %v556_v25 = vld [vmem:[%s4798_s1 + $0xc70] sm:$0xff]  ;;  %v303_v26 = vld [vmem:[%s4798_s1 + $0x488] sm:$0xff] }
  0x7f   :  { %2164 = vmatprep.subr.bf16.mxu0 %v2163_v30  ;;  %v71_v30 = vld [vmem:[%s4799_s0 + $0x1c8] sm:$0xff]  ;;  %v2181_v35 = vpack.c.bf16 %v556_v25, %v554_v22  ;;  %v570_v22 = vld [vmem:[%s4798_s1 + $0xce0] sm:$0xff]  ;;  %v572_v25 = vld [vmem:[%s4798_s1 + $0xcf0] sm:$0xff] }
  0x81   :  { %1910 = vmatpush1.bf16.msra.mxu1 %v1909_v36  ;;  %v1927_v36 = vpack.c.bf16 %v305_v27, %v303_v26  ;;  %v319_v26 = vld [vmem:[%s4798_s1 + $0x508] sm:$0xff]  ;;  %v321_v27 = vld [vmem:[%s4798_s1 + $0x518] sm:$0xff] }
  0x82   :  { %2166 = vmatpush1.bf16.msra.mxu0 %v2165_v37  ;;  %1912 = vmatprep.subr.bf16.mxu1 %v1911_v38  ;;  %v304_v37 = vld [vmem:[%s4798_s1 + $0x490] sm:$0xff]  ;;  %v558_v38 = vld [vmem:[%s4798_s1 + $0xc80] sm:$0xff] }
  0x83   :  { %2168 = vmatprep.subr.bf16.mxu0 %v2167_v42  ;;  %v307_v42 = vld [vmem:[%s4798_s1 + $0x4a8] sm:$0xff]  ;;  %v1929_v47 = vpack.c.bf16 %v304_v37, %v302_v32  ;;  %v318_v32 = vld [vmem:[%s4798_s1 + $0x500] sm:$0xff]  ;;  %v320_v37 = vld [vmem:[%s4798_s1 + $0x510] sm:$0xff] }
  0x84   :  { %924 = vmatmul.mubr.f32.vlgmr.msra.gmra.mrb[0].mxu1 %v16_v48  ;;  %v306_v48 = vld [vmem:[%s4798_s1 + $0x4a0] sm:$0xff] }
  0x85   :  { %1914 = vmatpush1.bf16.msra.mxu1 %v1913_v49  ;;  %1376 = vmatmul.mubr.f32.vlgmr.msra.gmra.mrb[0].mxu0 %v24_v50  ;;  %v97_v49 = vld [vmem:[%s4799_s0 + $0x298] sm:$0xff]  ;;  %v88_v50 = vld [vmem:[%s4799_s0 + $0x250] sm:$0xff] }
  0x86   :  { %2170 = vmatpush1.bf16.msra.mxu0 %v2169_v51  ;;  %1916 = vmatprep.subr.bf16.mxu1 %v1915_v52  ;;  %v2185_v51 = vpack.c.bf16 %v560_v41, %v558_v38  ;;  %v1931_v52 = vpack.c.bf16 %v309_v43, %v307_v42  ;;  %v574_v38 = vld [vmem:[%s4798_s1 + $0xd00] sm:$0xff]  ;;  %v576_v41 = vld [vmem:[%s4798_s1 + $0xd10] sm:$0xff]  ;;  %v323_v42 = vld [vmem:[%s4798_s1 + $0x528] sm:$0xff] }
  0x87   :  { %2172 = vmatprep.subr.bf16.mxu0 %v2171_v56  ;;  %929 = vmatprep.mubr.f32.mxu1 %v35_v62  ;;  %v2187_v56 = vpack.c.bf16 %v565_v45, %v563_v44  ;;  %v107_v62 = vld [vmem:[%s4799_s0 + $0x2e8] sm:$0xff]  ;;  %v325_v43 = vld [vmem:[%s4798_s1 + $0x538] sm:$0xff] }
  0x88   :  { %1381 = vmatprep.mubr.f32.mxu0 %v43_v1  ;;  %930 = vmatmul.mubr.f32.gmra.mrb[2].mxu1 %v34_v2  ;;  %v115_v1 = vld [vmem:[%s4799_s0 + $0x328] sm:$0xff]  ;;  %v106_v2 = vld [vmem:[%s4799_s0 + $0x2e0] sm:$0xff]  ;;  %v581_v45 = vld [vmem:[%s4798_s1 + $0xd38] sm:$0xff] }
  0x89   :  { %1918 = vmatpush1.bf16.msra.mxu1 %v1917_v63  ;;  %1382 = vmatmul.mubr.f32.gmra.mrb[2].mxu0 %v42_v7  ;;  %v1933_v63 = vpack.c.bf16 %v308_v53, %v306_v48  ;;  %v114_v7 = vld [vmem:[%s4799_s0 + $0x320] sm:$0xff]  ;;  %v579_v44 = vld [vmem:[%s4798_s1 + $0xd28] sm:$0xff] }
  0x8a   :  { %2174 = vmatpush1.bf16.msra.mxu0 %v2173_v3  ;;  %1920 = vmatprep.subr.bf16.mxu1 %v1919_v4  ;;  %v2189_v3 = vpack.c.bf16 %v564_v57, %v562_v54  ;;  %v1935_v4 = vpack.c.bf16 %v313_v59, %v311_v58  ;;  %v27_v48 = vld [vmem:[%s4799_s0 + $0x68] sm:$0xff]  ;;  %v578_v53 = vld [vmem:[%s4798_s1 + $0xd20] sm:$0xff]  ;;  %v2203_v54 = vpack.c.bf16 %v581_v45, %v579_v44  ;;  %v329_v57 = vld [vmem:[%s4798_s1 + $0x558] sm:$0xff] }
  0x8b   :  { %2176 = vmatprep.subr.bf16.mxu0 %v2175_v8  ;;  %935 = vmatprep.mubr.f32.mxu1 %v53_v14  ;;  %v2191_v8 = vpack.c.bf16 %v569_v61, %v567_v60  ;;  %v125_v14 = vld [vmem:[%s4799_s0 + $0x378] sm:$0xff]  ;;  %v583_v58 = vld [vmem:[%s4798_s1 + $0xd48] sm:$0xff] }
  0x8c   :  { %1387 = vmatprep.mubr.f32.mxu0 %v61_v17  ;;  %936 = vmatmul.mubr.f32.gmra.mrb[4].mxu1 %v52_v18  ;;  %v133_v17 = vld [vmem:[%s4799_s0 + $0x3b8] sm:$0xff]  ;;  %v124_v18 = vld [vmem:[%s4799_s0 + $0x370] sm:$0xff] }
  0x8d   :  { %1922 = vmatpush1.bf16.msra.mxu1 %v1921_v15  ;;  %1388 = vmatmul.mubr.f32.gmra.mrb[4].mxu0 %v60_v23  ;;  %v1937_v15 = vpack.c.bf16 %v312_v5, %v310_v0  ;;  %v132_v23 = vld [vmem:[%s4799_s0 + $0x3b0] sm:$0xff]  ;;  %v585_v59 = vld [vmem:[%s4798_s1 + $0xd58] sm:$0xff] }
  0x8e   :  { %2178 = vmatpush1.bf16.msra.mxu0 %v2177_v19  ;;  %1924 = vmatprep.subr.bf16.mxu1 %v1923_v20  ;;  %v2193_v19 = vpack.c.bf16 %v568_v9, %v566_v6  ;;  %v1939_v20 = vpack.c.bf16 %v317_v11, %v315_v10  ;;  %v328_v0 = vld [vmem:[%s4798_s1 + $0x550] sm:$0xff]  ;;  %v333_v5 = vld [vmem:[%s4798_s1 + $0x578] sm:$0xff]  ;;  %v587_v6 = vld [vmem:[%s4798_s1 + $0xd68] sm:$0xff] }
  0x8f   :  { %2180 = vmatprep.subr.bf16.mxu0 %v2179_v24  ;;  %941 = vmatprep.mubr.f32.mxu1 %v71_v30  ;;  %v2195_v24 = vpack.c.bf16 %v573_v13, %v571_v12  ;;  %v143_v30 = vld [vmem:[%s4799_s0 + $0x408] sm:$0xff]  ;;  %v330_v11 = vld [vmem:[%s4798_s1 + $0x560] sm:$0xff]  ;;  %v332_v12 = vld [vmem:[%s4798_s1 + $0x570] sm:$0xff] }
  0x90   :  { %1393 = vmatprep.mubr.f32.mxu0 %v79_v33  ;;  %942 = vmatmul.mubr.f32.gmra.mrb[6].mxu1 %v70_v34  ;;  %v151_v33 = vld [vmem:[%s4799_s0 + $0x448] sm:$0xff]  ;;  %v142_v34 = vld [vmem:[%s4799_s0 + $0x400] sm:$0xff] }
  0x91   :  { %1926 = vmatpush1.bf16.msra.mxu1 %v1925_v31  ;;  %1394 = vmatmul.mubr.f32.gmra.mrb[6].mxu0 %v78_v39  ;;  %v1941_v31 = vpack.c.bf16 %v316_v21, %v314_v16  ;;  %v150_v39 = vld [vmem:[%s4799_s0 + $0x440] sm:$0xff]  ;;  %v335_v16 = vld [vmem:[%s4798_s1 + $0x588] sm:$0xff] }
  0x92   :  { %2182 = vmatpush1.bf16.msra.mxu0 %v2181_v35  ;;  %1928 = vmatprep.subr.bf16.mxu1 %v1927_v36  ;;  %v2197_v35 = vpack.c.bf16 %v572_v25, %v570_v22  ;;  %v1943_v36 = vpack.c.bf16 %v321_v27, %v319_v26  ;;  %v586_v13 = vld [vmem:[%s4798_s1 + $0xd60] sm:$0xff]  ;;  %v592_v27 = vld [vmem:[%s4798_s1 + $0xd90] sm:$0xff] }
  0x93   :  { %2184 = vmatprep.subr.bf16.mxu0 %v2183_v40  ;;  %947 = vmatprep.mubr.f32.mxu1 %v89_v46  ;;  %v2199_v40 = vpack.c.bf16 %v577_v29, %v575_v28  ;;  %v19_v46 = vld [vmem:[%s4799_s0 + $0x28] sm:$0xff]  ;;  %v590_v25 = vld [vmem:[%s4798_s1 + $0xd80] sm:$0xff]  ;;  %v341_v29 = vld [vmem:[%s4798_s1 + $0x5b8] sm:$0xff] }
  0x94   :  { %1399 = vmatprep.mubr.f32.mxu0 %v97_v49  ;;  %948 = vmatmul.mubr.f32.gmra.mrb[8].mxu1 %v88_v50  ;;  %v2201_v49 = vpack.c.bf16 %v576_v41, %v574_v38  ;;  %v1947_v50 = vpack.c.bf16 %v325_v43, %v323_v42  ;;  %v339_v28 = vld [vmem:[%s4798_s1 + $0x5a8] sm:$0xff]  ;;  %v345_v41 = vld [vmem:[%s4798_s1 + $0x5d8] sm:$0xff] }
  0x95   :  { %1930 = vmatpush1.bf16.msra.mxu1 %v1929_v47  ;;  %1400 = vmatmul.mubr.f32.gmra.mrb[8].mxu0 %v96_v55  ;;  %v1945_v47 = vpack.c.bf16 %v320_v37, %v318_v32  ;;  %v580_v55 = vld [vmem:[%s4798_s1 + $0xd30] sm:$0xff]  ;;  %v594_v37 = vld [vmem:[%s4798_s1 + $0xda0] sm:$0xff]  ;;  %v599_v42 = vld [vmem:[%s4798_s1 + $0xdc8] sm:$0xff] }
  0x96   :  { %2186 = vmatpush1.bf16.msra.mxu0 %v2185_v51  ;;  %1932 = vmatprep.subr.bf16.mxu1 %v1931_v52  ;;  %v322_v51 = vld [vmem:[%s4798_s1 + $0x520] sm:$0xff]  ;;  %v324_v52 = vld [vmem:[%s4798_s1 + $0x530] sm:$0xff]  ;;  %v2205_v61 = vpack.c.bf16 %v580_v55, %v578_v53  ;;  %v601_v43 = vld [vmem:[%s4798_s1 + $0xdd8] sm:$0xff] }
  0x97   :  { %2188 = vmatprep.subr.bf16.mxu0 %v2187_v56  ;;  %953 = vmatprep.mubr.f32.mxu1 %v107_v62  ;;  %v327_v56 = vld [vmem:[%s4798_s1 + $0x548] sm:$0xff]  ;;  %v1949_v60 = vpack.c.bf16 %v324_v52, %v322_v51  ;;  %v600_v51 = vld [vmem:[%s4798_s1 + $0xdd0] sm:$0xff]  ;;  %v349_v53 = vld [vmem:[%s4798_s1 + $0x5f8] sm:$0xff] }
  0x98   :  { %1405 = vmatprep.mubr.f32.mxu0 %v115_v1  ;;  %954 = vmatmul.mubr.f32.gmra.mrb[10].mxu1 %v106_v2  ;;  %v1951_v62 = vpack.c.bf16 %v329_v57, %v327_v56  ;;  %v582_v1 = vld [vmem:[%s4798_s1 + $0xd40] sm:$0xff]  ;;  %v2207_v2 = vpack.c.bf16 %v585_v59, %v583_v58  ;;  %v347_v52 = vld [vmem:[%s4798_s1 + $0x5e8] sm:$0xff]  ;;  %v605_v55 = vld [vmem:[%s4798_s1 + $0xdf8] sm:$0xff] }
  0x99   :  { %1934 = vmatpush1.bf16.msra.mxu1 %v1933_v63  ;;  %1406 = vmatmul.mubr.f32.gmra.mrb[10].mxu0 %v114_v7  ;;  %v326_v63 = vld [vmem:[%s4798_s1 + $0x540] sm:$0xff]  ;;  %v589_v7 = vld [vmem:[%s4798_s1 + $0xd78] sm:$0xff]  ;;  %v1971_v58 = vpack.c.bf16 %v349_v53, %v347_v52  ;;  %v364_v53 = vld [vmem:[%s4798_s1 + $0x670] sm:$0xff] }
  0x9a   :  { %2190 = vmatpush1.bf16.msra.mxu0 %v2189_v3  ;;  %1936 = vmatprep.subr.bf16.mxu1 %v1935_v4  ;;  %v584_v3 = vld [vmem:[%s4798_s1 + $0xd50] sm:$0xff]  ;;  %v331_v4 = vld [vmem:[%s4798_s1 + $0x568] sm:$0xff]  ;;  %v346_v59 = vld [vmem:[%s4798_s1 + $0x5e0] sm:$0xff] }
  0x9b   :  { %2192 = vmatprep.subr.bf16.mxu0 %v2191_v8  ;;  %959 = vmatprep.mubr.f32.mxu1 %v125_v14  ;;  %v1953_v8 = vpack.c.bf16 %v328_v0, %v326_v63  ;;  %v2209_v9 = vpack.c.bf16 %v584_v3, %v582_v1  ;;  %v1955_v10 = vpack.c.bf16 %v333_v5, %v331_v4  ;;  %v604_v63 = vld [vmem:[%s4798_s1 + $0xdf0] sm:$0xff]  ;;  %v351_v0 = vld [vmem:[%s4798_s1 + $0x608] sm:$0xff]  ;;  %v353_v1 = vld [vmem:[%s4798_s1 + $0x618] sm:$0xff] }
  0x9c   :  { %1411 = vmatprep.mubr.f32.mxu0 %v133_v17  ;;  %960 = vmatmul.mubr.f32.gmra.mrb[12].mxu1 %v124_v18  ;;  %v2211_v14 = vpack.c.bf16 %v589_v7, %v587_v6  ;;  %v337_v17 = vld [vmem:[%s4798_s1 + $0x598] sm:$0xff]  ;;  %v591_v18 = vld [vmem:[%s4798_s1 + $0xd88] sm:$0xff]  ;;  %v1975_v6 = vpack.c.bf16 %v353_v1, %v351_v0  ;;  %v350_v7 = vld [vmem:[%s4798_s1 + $0x600] sm:$0xff] }
  0x9d   :  { %1938 = vmatpush1.bf16.msra.mxu1 %v1937_v15  ;;  %1412 = vmatmul.mubr.f32.gmra.mrb[12].mxu0 %v132_v23  ;;  %v588_v15 = vld [vmem:[%s4798_s1 + $0xd70] sm:$0xff]  ;;  %v1959_v22 = vpack.c.bf16 %v337_v17, %v335_v16  ;;  %v334_v23 = vld [vmem:[%s4798_s1 + $0x580] sm:$0xff]  ;;  %v609_v3 = vld [vmem:[%s4798_s1 + $0xe18] sm:$0xff] }
  0x9e   :  { %2194 = vmatpush1.bf16.msra.mxu0 %v2193_v19  ;;  %1940 = vmatprep.subr.bf16.mxu1 %v1939_v20  ;;  %v593_v19 = vld [vmem:[%s4798_s1 + $0xd98] sm:$0xff]  ;;  %v1957_v20 = vpack.c.bf16 %v332_v12, %v330_v11  ;;  %v2213_v21 = vpack.c.bf16 %v588_v15, %v586_v13  ;;  %v608_v11 = vld [vmem:[%s4798_s1 + $0xe10] sm:$0xff]  ;;  %v355_v12 = vld [vmem:[%s4798_s1 + $0x628] sm:$0xff] }
  0x9f   :  { %2196 = vmatprep.subr.bf16.mxu0 %v2195_v24  ;;  %965 = vmatprep.mubr.f32.mxu1 %v143_v30  ;;  %v336_v24 = vld [vmem:[%s4798_s1 + $0x590] sm:$0xff]  ;;  %v2215_v26 = vpack.c.bf16 %v593_v19, %v591_v18  ;;  %v595_v30 = vld [vmem:[%s4798_s1 + $0xda8] sm:$0xff]  ;;  %v357_v13 = vld [vmem:[%s4798_s1 + $0x638] sm:$0xff] }
  0xa0   :  { %1417 = vmatprep.mubr.f32.mxu0 %v151_v33  ;;  %966 = vmatmul.mubr.f32.gmra.mrb[14].mxu1 %v142_v34  ;;  %v1961_v32 = vpack.c.bf16 %v336_v24, %v334_v23  ;;  %v2217_v33 = vpack.c.bf16 %v592_v27, %v590_v25  ;;  %v1963_v34 = vpack.c.bf16 %v341_v29, %v339_v28  ;;  %v613_v15 = vld [vmem:[%s4798_s1 + $0xe38] sm:$0xff]  ;;  %v18_v16 = vld [vmem:[%s4799_s0 + $0x20] sm:$0xff]  ;;  %v612_v25 = vld [vmem:[%s4798_s1 + $0xe30] sm:$0xff] }
  0xa1   :  { %1942 = vmatpush1.bf16.msra.mxu1 %v1941_v31  ;;  %1418 = vmatmul.mubr.f32.gmra.mrb[14].mxu0 %v150_v39  ;;  %v597_v31 = vld [vmem:[%s4798_s1 + $0xdb8] sm:$0xff]  ;;  %v596_v39 = vld [vmem:[%s4798_s1 + $0xdb0] sm:$0xff]  ;;  %v26_v18 = vld [vmem:[%s4799_s0 + $0x60] sm:$0xff] }
  0xa2   :  { %2198 = vmatpush1.bf16.msra.mxu0 %v2197_v35  ;;  %1944 = vmatprep.subr.bf16.mxu1 %v1943_v36  ;;  %v338_v35 = vld [vmem:[%s4798_s1 + $0x5a0] sm:$0xff]  ;;  %v340_v36 = vld [vmem:[%s4798_s1 + $0x5b0] sm:$0xff]  ;;  %v2219_v38 = vpack.c.bf16 %v597_v31, %v595_v30  ;;  %v2221_v45 = vpack.c.bf16 %v596_v39, %v594_v37  ;;  %v361_v27 = vld [vmem:[%s4798_s1 + $0x658] sm:$0xff] }
  0xa3   :  { %2200 = vmatprep.subr.bf16.mxu0 %v2199_v40  ;;  %1036 = vmatprep.mubr.f32.mxu1 %v19_v46  ;;  %v343_v40 = vld [vmem:[%s4798_s1 + $0x5c8] sm:$0xff]  ;;  %v1965_v44 = vpack.c.bf16 %v340_v36, %v338_v35  ;;  %v610_v23 = vld [vmem:[%s4798_s1 + $0xe20] sm:$0xff]  ;;  %v617_v29 = vld [vmem:[%s4798_s1 + $0xe58] sm:$0xff] }
  0xa4   :  { %1488 = vmatprep.mubr.f32.mxu0 %v27_v48  ;;  %v1967_v46 = vpack.c.bf16 %v345_v41, %v343_v40  ;;  %v344_v48 = vld [vmem:[%s4798_s1 + $0x5d0] sm:$0xff]  ;;  %v615_v28 = vld [vmem:[%s4798_s1 + $0xe48] sm:$0xff]  ;;  %v37_v30 = vld [vmem:[%s4799_s0 + $0xb8] sm:$0xff]  ;;  %v2237_v35 = vpack.c.bf16 %v612_v25, %v610_v23 }
  0xa5   :  { %1946 = vmatpush1.bf16.msra.mxu1 %v1945_v47  ;;  %v342_v47 = vld [vmem:[%s4798_s1 + $0x5c0] sm:$0xff]  ;;  %v360_v37 = vld [vmem:[%s4798_s1 + $0x650] sm:$0xff]  ;;  %v2239_v40 = vpack.c.bf16 %v617_v29, %v615_v28  ;;  %v81_v1 = vld [vmem:[%s4799_s0 + $0x218] sm:$0xff] }
  0xa6   :  { %2202 = vmatpush1.bf16.msra.mxu0 %v2201_v49  ;;  %1948 = vmatprep.subr.bf16.mxu1 %v1947_v50  ;;  %v598_v49 = vld [vmem:[%s4798_s1 + $0xdc0] sm:$0xff]  ;;  %v2223_v50 = vpack.c.bf16 %v601_v43, %v599_v42  ;;  %v1969_v56 = vpack.c.bf16 %v344_v48, %v342_v47  ;;  %v44_v39 = vld [vmem:[%s4799_s0 + $0xf0] sm:$0xff]  ;;  %v363_v42 = vld [vmem:[%s4798_s1 + $0x668] sm:$0xff] }
  0xa7   :  { %2204 = vmatprep.subr.bf16.mxu0 %v2203_v54  ;;  %v603_v54 = vld [vmem:[%s4798_s1 + $0xde8] sm:$0xff]  ;;  %v2225_v57 = vpack.c.bf16 %v600_v51, %v598_v49  ;;  %v616_v41 = vld [vmem:[%s4798_s1 + $0xe50] sm:$0xff]  ;;  %v365_v43 = vld [vmem:[%s4798_s1 + $0x678] sm:$0xff] }
  0xa8   :  { %v362_v48 = vld [vmem:[%s4798_s1 + $0x660] sm:$0xff]  ;;  %v63_v49 = vld [vmem:[%s4799_s0 + $0x188] sm:$0xff]  ;;  %v1987_v52 = vpack.c.bf16 %v365_v43, %v363_v42  ;;  %v628_v25 = vld [vmem:[%s4798_s1 + $0xeb0] sm:$0xff] }
  0xa9   :  { %1950 = vmatpush1.bf16.msra.mxu1 %v1949_v60  ;;  %v348_v60 = vld [vmem:[%s4798_s1 + $0x5f0] sm:$0xff]  ;;  %v366_v0 = vld [vmem:[%s4798_s1 + $0x680] sm:$0xff]  ;;  %v631_v28 = vld [vmem:[%s4798_s1 + $0xec8] sm:$0xff] }
  0xaa   :  { %2206 = vmatpush1.bf16.msra.mxu0 %v2205_v61  ;;  %1952 = vmatprep.subr.bf16.mxu1 %v1951_v62  ;;  %v602_v61 = vld [vmem:[%s4798_s1 + $0xde0] sm:$0xff]  ;;  %v2227_v62 = vpack.c.bf16 %v605_v55, %v603_v54  ;;  %v1973_v4 = vpack.c.bf16 %v348_v60, %v346_v59  ;;  %v369_v59 = vld [vmem:[%s4798_s1 + $0x698] sm:$0xff]  ;;  %v623_v60 = vld [vmem:[%s4798_s1 + $0xe88] sm:$0xff] }
  0xab   :  { %2208 = vmatprep.subr.bf16.mxu0 %v2207_v2  ;;  %v607_v2 = vld [vmem:[%s4798_s1 + $0xe08] sm:$0xff]  ;;  %v2229_v5 = vpack.c.bf16 %v604_v63, %v602_v61  ;;  %v618_v54 = vld [vmem:[%s4798_s1 + $0xe60] sm:$0xff]  ;;  %v625_v61 = vld [vmem:[%s4798_s1 + $0xe98] sm:$0xff]  ;;  %v1989_v63 = vpack.c.bf16 %v364_v53, %v362_v48 }
  0xac   :  { %v62_v55 = vld [vmem:[%s4799_s0 + $0x180] sm:$0xff]  ;;  %v633_v29 = vld [vmem:[%s4798_s1 + $0xed8] sm:$0xff]  ;;  %v379_v42 = vld [vmem:[%s4798_s1 + $0x6e8] sm:$0xff] }
  0xad   :  { %1954 = vmatpush1.bf16.msra.mxu1 %v1953_v8  ;;  %v352_v8 = vld [vmem:[%s4798_s1 + $0x610] sm:$0xff]  ;;  %v98_v23 = vld [vmem:[%s4799_s0 + $0x2a0] sm:$0xff]  ;;  %v381_v43 = vld [vmem:[%s4798_s1 + $0x6f8] sm:$0xff] }
  0xae   :  { %2210 = vmatpush1.bf16.msra.mxu0 %v2209_v9  ;;  %1956 = vmatprep.subr.bf16.mxu1 %v1955_v10  ;;  %v606_v9 = vld [vmem:[%s4798_s1 + $0xe00] sm:$0xff]  ;;  %v2231_v10 = vpack.c.bf16 %v609_v3, %v607_v2  ;;  %v1977_v17 = vpack.c.bf16 %v352_v8, %v350_v7  ;;  %v72_v2 = vld [vmem:[%s4799_s0 + $0x1d0] sm:$0xff]  ;;  %v2247_v8 = vpack.c.bf16 %v625_v61, %v623_v60  ;;  %v639_v60 = vld [vmem:[%s4798_s1 + $0xf08] sm:$0xff] }
  0xaf   :  { %2212 = vmatprep.subr.bf16.mxu0 %v2211_v14  ;;  %v611_v14 = vld [vmem:[%s4798_s1 + $0xe28] sm:$0xff]  ;;  %v2233_v19 = vpack.c.bf16 %v608_v11, %v606_v9  ;;  %v80_v7 = vld [vmem:[%s4799_s0 + $0x210] sm:$0xff]  ;;  %v373_v11 = vld [vmem:[%s4798_s1 + $0x6b8] sm:$0xff] }
  0xb0   :  { %v2235_v24 = vpack.c.bf16 %v613_v15, %v611_v14  ;;  %v624_v9 = vld [vmem:[%s4798_s1 + $0xe90] sm:$0xff]  ;;  %v91_v14 = vld [vmem:[%s4799_s0 + $0x268] sm:$0xff]  ;;  %v378_v48 = vld [vmem:[%s4798_s1 + $0x6e0] sm:$0xff] }
  0xb1   :  { %1958 = vmatpush1.bf16.msra.mxu1 %v1957_v20  ;;  %v1979_v20 = vpack.c.bf16 %v357_v13, %v355_v12  ;;  %v627_v12 = vld [vmem:[%s4798_s1 + $0xea8] sm:$0xff]  ;;  %v629_v13 = vld [vmem:[%s4798_s1 + $0xeb8] sm:$0xff]  ;;  %v380_v53 = vld [vmem:[%s4798_s1 + $0x6f0] sm:$0xff] }
  0xb2   :  { %2214 = vmatpush1.bf16.msra.mxu0 %v2213_v21  ;;  %1960 = vmatprep.subr.bf16.mxu1 %v1959_v22  ;;  %v354_v21 = vld [vmem:[%s4798_s1 + $0x620] sm:$0xff]  ;;  %v356_v22 = vld [vmem:[%s4798_s1 + $0x630] sm:$0xff]  ;;  %v641_v61 = vld [vmem:[%s4798_s1 + $0xf18] sm:$0xff] }
  0xb3   :  { %2216 = vmatprep.subr.bf16.mxu0 %v2215_v26  ;;  %v359_v26 = vld [vmem:[%s4798_s1 + $0x648] sm:$0xff]  ;;  %v1981_v31 = vpack.c.bf16 %v356_v22, %v354_v21  ;;  %v372_v21 = vld [vmem:[%s4798_s1 + $0x6b0] sm:$0xff]  ;;  %v626_v22 = vld [vmem:[%s4798_s1 + $0xea0] sm:$0xff] }
  0xb4   :  { %v1983_v36 = vpack.c.bf16 %v361_v27, %v359_v26  ;;  %v375_v26 = vld [vmem:[%s4798_s1 + $0x6c8] sm:$0xff]  ;;  %v377_v27 = vld [vmem:[%s4798_s1 + $0x6d8] sm:$0xff] }
  0xb5   :  { %1962 = vmatpush1.bf16.msra.mxu1 %v1961_v32  ;;  %v358_v32 = vld [vmem:[%s4798_s1 + $0x640] sm:$0xff] }
  0xb6   :  { %2218 = vmatpush1.bf16.msra.mxu0 %v2217_v33  ;;  %1964 = vmatprep.subr.bf16.mxu1 %v1963_v34  ;;  %v45_v33 = vld [vmem:[%s4799_s0 + $0xf8] sm:$0xff]  ;;  %v36_v34 = vld [vmem:[%s4799_s0 + $0xb0] sm:$0xff]  ;;  %v1985_v47 = vpack.c.bf16 %v360_v37, %v358_v32  ;;  %v374_v32 = vld [vmem:[%s4798_s1 + $0x6c0] sm:$0xff] }
  0xb7   :  { %2220 = vmatprep.subr.bf16.mxu0 %v2219_v38  ;;  %v614_v38 = vld [vmem:[%s4798_s1 + $0xe40] sm:$0xff]  ;;  %v376_v37 = vld [vmem:[%s4798_s1 + $0x6d0] sm:$0xff] }
  0xb8   :  { %v2241_v51 = vpack.c.bf16 %v616_v41, %v614_v38  ;;  %v630_v38 = vld [vmem:[%s4798_s1 + $0xec0] sm:$0xff]  ;;  %v632_v41 = vld [vmem:[%s4798_s1 + $0xed0] sm:$0xff] }
  0xb9   :  { %1966 = vmatpush1.bf16.msra.mxu1 %v1965_v44  ;;  %v619_v44 = vld [vmem:[%s4798_s1 + $0xe68] sm:$0xff] }
  0xba   :  { %2222 = vmatpush1.bf16.msra.mxu0 %v2221_v45  ;;  %1968 = vmatprep.subr.bf16.mxu1 %v1967_v46  ;;  %v621_v45 = vld [vmem:[%s4798_s1 + $0xe78] sm:$0xff]  ;;  %v55_v46 = vld [vmem:[%s4799_s0 + $0x148] sm:$0xff] }
  0xbb   :  { %2224 = vmatprep.subr.bf16.mxu0 %v2223_v50  ;;  %v54_v50 = vld [vmem:[%s4799_s0 + $0x140] sm:$0xff] }
  0xbd   :  { %1970 = vmatpush1.bf16.msra.mxu1 %v1969_v56  ;;  %v2243_v56 = vpack.c.bf16 %v621_v45, %v619_v44  ;;  %v635_v44 = vld [vmem:[%s4798_s1 + $0xee8] sm:$0xff]  ;;  %v637_v45 = vld [vmem:[%s4798_s1 + $0xef8] sm:$0xff] }
  0xbe   :  { %2226 = vmatpush1.bf16.msra.mxu0 %v2225_v57  ;;  %1972 = vmatprep.subr.bf16.mxu1 %v1971_v58  ;;  %v620_v57 = vld [vmem:[%s4798_s1 + $0xe70] sm:$0xff]  ;;  %v367_v58 = vld [vmem:[%s4798_s1 + $0x688] sm:$0xff] }
  0xbf   :  { %2228 = vmatprep.subr.bf16.mxu0 %v2227_v62  ;;  %v73_v62 = vld [vmem:[%s4799_s0 + $0x1d8] sm:$0xff]  ;;  %v2245_v3 = vpack.c.bf16 %v620_v57, %v618_v54  ;;  %v634_v54 = vld [vmem:[%s4798_s1 + $0xee0] sm:$0xff]  ;;  %v636_v57 = vld [vmem:[%s4798_s1 + $0xef0] sm:$0xff] }
  0xc1   :  { %1974 = vmatpush1.bf16.msra.mxu1 %v1973_v4  ;;  %v1991_v4 = vpack.c.bf16 %v369_v59, %v367_v58  ;;  %v383_v58 = vld [vmem:[%s4798_s1 + $0x708] sm:$0xff]  ;;  %v385_v59 = vld [vmem:[%s4798_s1 + $0x718] sm:$0xff] }
  0xc2   :  { %2230 = vmatpush1.bf16.msra.mxu0 %v2229_v5  ;;  %1976 = vmatprep.subr.bf16.mxu1 %v1975_v6  ;;  %v368_v5 = vld [vmem:[%s4798_s1 + $0x690] sm:$0xff]  ;;  %v622_v6 = vld [vmem:[%s4798_s1 + $0xe80] sm:$0xff] }
  0xc3   :  { %2232 = vmatprep.subr.bf16.mxu0 %v2231_v10  ;;  %v371_v10 = vld [vmem:[%s4798_s1 + $0x6a8] sm:$0xff]  ;;  %v1993_v15 = vpack.c.bf16 %v368_v5, %v366_v0  ;;  %v382_v0 = vld [vmem:[%s4798_s1 + $0x700] sm:$0xff]  ;;  %v384_v5 = vld [vmem:[%s4798_s1 + $0x710] sm:$0xff] }
  0xc4   :  { %1037 = vmatmul.mubr.f32.vlgmr.msra.gmra.mrb[0].mxu1 %v18_v16  ;;  %v370_v16 = vld [vmem:[%s4798_s1 + $0x6a0] sm:$0xff] }
  0xc5   :  { %1978 = vmatpush1.bf16.msra.mxu1 %v1977_v17  ;;  %1489 = vmatmul.mubr.f32.vlgmr.msra.gmra.mrb[0].mxu0 %v26_v18  ;;  %v99_v17 = vld [vmem:[%s4799_s0 + $0x2a8] sm:$0xff]  ;;  %v90_v18 = vld [vmem:[%s4799_s0 + $0x260] sm:$0xff] }
  0xc6   :  { %2234 = vmatpush1.bf16.msra.mxu0 %v2233_v19  ;;  %1980 = vmatprep.subr.bf16.mxu1 %v1979_v20  ;;  %v2249_v19 = vpack.c.bf16 %v624_v9, %v622_v6  ;;  %v1995_v20 = vpack.c.bf16 %v373_v11, %v371_v10  ;;  %v638_v6 = vld [vmem:[%s4798_s1 + $0xf00] sm:$0xff]  ;;  %v640_v9 = vld [vmem:[%s4798_s1 + $0xf10] sm:$0xff]  ;;  %v387_v10 = vld [vmem:[%s4798_s1 + $0x728] sm:$0xff] }
  0xc7   :  { %2236 = vmatprep.subr.bf16.mxu0 %v2235_v24  ;;  %1042 = vmatprep.mubr.f32.mxu1 %v37_v30  ;;  %v2251_v24 = vpack.c.bf16 %v629_v13, %v627_v12  ;;  %v109_v30 = vld [vmem:[%s4799_s0 + $0x2f8] sm:$0xff]  ;;  %v643_v12 = vld [vmem:[%s4798_s1 + $0xf28] sm:$0xff] }
  0xc8   :  { %1494 = vmatprep.mubr.f32.mxu0 %v45_v33  ;;  %1043 = vmatmul.mubr.f32.gmra.mrb[2].mxu1 %v36_v34  ;;  %v117_v33 = vld [vmem:[%s4799_s0 + $0x338] sm:$0xff]  ;;  %v108_v34 = vld [vmem:[%s4799_s0 + $0x2f0] sm:$0xff] }
  0xc9   :  { %1982 = vmatpush1.bf16.msra.mxu1 %v1981_v31  ;;  %1495 = vmatmul.mubr.f32.gmra.mrb[2].mxu0 %v44_v39  ;;  %v1997_v31 = vpack.c.bf16 %v372_v21, %v370_v16  ;;  %v116_v39 = vld [vmem:[%s4799_s0 + $0x330] sm:$0xff]  ;;  %v389_v11 = vld [vmem:[%s4798_s1 + $0x738] sm:$0xff]  ;;  %v642_v21 = vld [vmem:[%s4798_s1 + $0xf20] sm:$0xff] }
  0xca   :  { %2238 = vmatpush1.bf16.msra.mxu0 %v2237_v35  ;;  %1984 = vmatprep.subr.bf16.mxu1 %v1983_v36  ;;  %v2253_v35 = vpack.c.bf16 %v628_v25, %v626_v22  ;;  %v1999_v36 = vpack.c.bf16 %v377_v27, %v375_v26  ;;  %v645_v13 = vld [vmem:[%s4798_s1 + $0xf38] sm:$0xff]  ;;  %v647_v26 = vld [vmem:[%s4798_s1 + $0xf48] sm:$0xff] }
  0xcb   :  { %2240 = vmatprep.subr.bf16.mxu0 %v2239_v40  ;;  %1048 = vmatprep.mubr.f32.mxu1 %v55_v46  ;;  %v2255_v40 = vpack.c.bf16 %v633_v29, %v631_v28  ;;  %v127_v46 = vld [vmem:[%s4799_s0 + $0x388] sm:$0xff]  ;;  %v29_v16 = vld [vmem:[%s4799_s0 + $0x78] sm:$0xff]  ;;  %v2267_v22 = vpack.c.bf16 %v645_v13, %v643_v12 }
  0xcc   :  { %1500 = vmatprep.mubr.f32.mxu0 %v63_v49  ;;  %1049 = vmatmul.mubr.f32.gmra.mrb[4].mxu1 %v54_v50  ;;  %v135_v49 = vld [vmem:[%s4799_s0 + $0x3c8] sm:$0xff]  ;;  %v126_v50 = vld [vmem:[%s4799_s0 + $0x380] sm:$0xff]  ;;  %v393_v25 = vld [vmem:[%s4798_s1 + $0x758] sm:$0xff] }
  0xcd   :  { %1986 = vmatpush1.bf16.msra.mxu1 %v1985_v47  ;;  %1501 = vmatmul.mubr.f32.gmra.mrb[4].mxu0 %v62_v55  ;;  %v2001_v47 = vpack.c.bf16 %v376_v37, %v374_v32  ;;  %v134_v55 = vld [vmem:[%s4799_s0 + $0x3c0] sm:$0xff]  ;;  %v649_v27 = vld [vmem:[%s4798_s1 + $0xf58] sm:$0xff]  ;;  %v392_v32 = vld [vmem:[%s4798_s1 + $0x750] sm:$0xff] }
  0xce   :  { %2242 = vmatpush1.bf16.msra.mxu0 %v2241_v51  ;;  %1988 = vmatprep.subr.bf16.mxu1 %v1987_v52  ;;  %v2257_v51 = vpack.c.bf16 %v632_v41, %v630_v38  ;;  %v2003_v52 = vpack.c.bf16 %v381_v43, %v379_v42  ;;  %v397_v37 = vld [vmem:[%s4798_s1 + $0x778] sm:$0xff]  ;;  %v651_v38 = vld [vmem:[%s4798_s1 + $0xf68] sm:$0xff]  ;;  %v394_v43 = vld [vmem:[%s4798_s1 + $0x760] sm:$0xff] }
  0xcf   :  { %2244 = vmatprep.subr.bf16.mxu0 %v2243_v56  ;;  %1054 = vmatprep.mubr.f32.mxu1 %v73_v62  ;;  %v2259_v56 = vpack.c.bf16 %v637_v45, %v635_v44  ;;  %v145_v62 = vld [vmem:[%s4799_s0 + $0x418] sm:$0xff]  ;;  %v396_v44 = vld [vmem:[%s4798_s1 + $0x770] sm:$0xff]  ;;  %v650_v45 = vld [vmem:[%s4798_s1 + $0xf60] sm:$0xff] }
  0xd0   :  { %1506 = vmatprep.mubr.f32.mxu0 %v81_v1  ;;  %1055 = vmatmul.mubr.f32.gmra.mrb[6].mxu1 %v72_v2  ;;  %v153_v1 = vld [vmem:[%s4799_s0 + $0x458] sm:$0xff]  ;;  %v144_v2 = vld [vmem:[%s4799_s0 + $0x410] sm:$0xff] }
  0xd1   :  { %1990 = vmatpush1.bf16.msra.mxu1 %v1989_v63  ;;  %1507 = vmatmul.mubr.f32.gmra.mrb[6].mxu0 %v80_v7  ;;  %v2005_v63 = vpack.c.bf16 %v380_v53, %v378_v48  ;;  %v152_v7 = vld [vmem:[%s4799_s0 + $0x450] sm:$0xff]  ;;  %v399_v48 = vld [vmem:[%s4798_s1 + $0x788] sm:$0xff] }
  0xd2   :  { %2246 = vmatpush1.bf16.msra.mxu0 %v2245_v3  ;;  %1992 = vmatprep.subr.bf16.mxu1 %v1991_v4  ;;  %v2261_v3 = vpack.c.bf16 %v636_v57, %v634_v54  ;;  %v2007_v4 = vpack.c.bf16 %v385_v59, %v383_v58  ;;  %v654_v57 = vld [vmem:[%s4798_s1 + $0xf80] sm:$0xff]  ;;  %v656_v59 = vld [vmem:[%s4798_s1 + $0xf90] sm:$0xff] }
  0xd3   :  { %2248 = vmatprep.subr.bf16.mxu0 %v2247_v8  ;;  %1060 = vmatprep.mubr.f32.mxu1 %v91_v14  ;;  %v2263_v8 = vpack.c.bf16 %v641_v61, %v639_v60  ;;  %v21_v14 = vld [vmem:[%s4799_s0 + $0x38] sm:$0xff]  ;;  %v403_v60 = vld [vmem:[%s4798_s1 + $0x7a8] sm:$0xff] }
  0xd4   :  { %1512 = vmatprep.mubr.f32.mxu0 %v99_v17  ;;  %1061 = vmatmul.mubr.f32.gmra.mrb[8].mxu1 %v90_v18  ;;  %v2265_v17 = vpack.c.bf16 %v640_v9, %v638_v6  ;;  %v2011_v18 = vpack.c.bf16 %v389_v11, %v387_v10  ;;  %v405_v61 = vld [vmem:[%s4798_s1 + $0x7b8] sm:$0xff]  ;;  %v663_v10 = vld [vmem:[%s4798_s1 + $0xfc8] sm:$0xff] }
  0xd5   :  { %1994 = vmatpush1.bf16.msra.mxu1 %v1993_v15  ;;  %1513 = vmatmul.mubr.f32.gmra.mrb[8].mxu0 %v98_v23  ;;  %v2009_v15 = vpack.c.bf16 %v384_v5, %v382_v0  ;;  %v644_v23 = vld [vmem:[%s4798_s1 + $0xf30] sm:$0xff]  ;;  %v658_v5 = vld [vmem:[%s4798_s1 + $0xfa0] sm:$0xff]  ;;  %v409_v9 = vld [vmem:[%s4798_s1 + $0x7d8] sm:$0xff] }
  0xd6   :  { %2250 = vmatpush1.bf16.msra.mxu0 %v2249_v19  ;;  %1996 = vmatprep.subr.bf16.mxu1 %v1995_v20  ;;  %v386_v19 = vld [vmem:[%s4798_s1 + $0x720] sm:$0xff]  ;;  %v388_v20 = vld [vmem:[%s4798_s1 + $0x730] sm:$0xff]  ;;  %v2269_v29 = vpack.c.bf16 %v644_v23, %v642_v21  ;;  %v665_v11 = vld [vmem:[%s4798_s1 + $0xfd8] sm:$0xff] }
  0xd7   :  { %2252 = vmatprep.subr.bf16.mxu0 %v2251_v24  ;;  %1066 = vmatprep.mubr.f32.mxu1 %v109_v30  ;;  %v391_v24 = vld [vmem:[%s4798_s1 + $0x748] sm:$0xff]  ;;  %v2013_v28 = vpack.c.bf16 %v388_v20, %v386_v19  ;;  %v664_v19 = vld [vmem:[%s4798_s1 + $0xfd0] sm:$0xff]  ;;  %v413_v21 = vld [vmem:[%s4798_s1 + $0x7f8] sm:$0xff] }
  0xd8   :  { %1518 = vmatprep.mubr.f32.mxu0 %v117_v33  ;;  %1067 = vmatmul.mubr.f32.gmra.mrb[10].mxu1 %v108_v34  ;;  %v2015_v30 = vpack.c.bf16 %v393_v25, %v391_v24  ;;  %v646_v33 = vld [vmem:[%s4798_s1 + $0xf40] sm:$0xff]  ;;  %v2271_v34 = vpack.c.bf16 %v649_v27, %v647_v26  ;;  %v411_v20 = vld [vmem:[%s4798_s1 + $0x7e8] sm:$0xff]  ;;  %v669_v23 = vld [vmem:[%s4798_s1 + $0xff8] sm:$0xff] }
  0xd9   :  { %1998 = vmatpush1.bf16.msra.mxu1 %v1997_v31  ;;  %1519 = vmatmul.mubr.f32.gmra.mrb[10].mxu0 %v116_v39  ;;  %v390_v31 = vld [vmem:[%s4798_s1 + $0x740] sm:$0xff]  ;;  %v653_v39 = vld [vmem:[%s4798_s1 + $0xf78] sm:$0xff]  ;;  %v2035_v26 = vpack.c.bf16 %v413_v21, %v411_v20  ;;  %v692_v21 = vld [vmem:[%s4798_s1 + $0x10b0] sm:$0xff] }
  0xda   :  { %2254 = vmatpush1.bf16.msra.mxu0 %v2253_v35  ;;  %2000 = vmatprep.subr.bf16.mxu1 %v1999_v36  ;;  %v648_v35 = vld [vmem:[%s4798_s1 + $0xf50] sm:$0xff]  ;;  %v395_v36 = vld [vmem:[%s4798_s1 + $0x768] sm:$0xff]  ;;  %v410_v27 = vld [vmem:[%s4798_s1 + $0x7e0] sm:$0xff] }
  0xdb   :  { %2256 = vmatprep.subr.bf16.mxu0 %v2255_v40  ;;  %1072 = vmatprep.mubr.f32.mxu1 %v127_v46  ;;  %v2017_v40 = vpack.c.bf16 %v392_v32, %v390_v31  ;;  %v2273_v41 = vpack.c.bf16 %v648_v35, %v646_v33  ;;  %v2019_v42 = vpack.c.bf16 %v397_v37, %v395_v36  ;;  %v668_v31 = vld [vmem:[%s4798_s1 + $0xff0] sm:$0xff]  ;;  %v671_v32 = vld [vmem:[%s4798_s1 + $0x1008] sm:$0xff]  ;;  %v673_v33 = vld [vmem:[%s4798_s1 + $0x1018] sm:$0xff] }
  0xdc   :  { %1524 = vmatprep.mubr.f32.mxu0 %v135_v49  ;;  %1073 = vmatmul.mubr.f32.gmra.mrb[12].mxu1 %v126_v50  ;;  %v2275_v46 = vpack.c.bf16 %v653_v39, %v651_v38  ;;  %v401_v49 = vld [vmem:[%s4798_s1 + $0x798] sm:$0xff]  ;;  %v655_v50 = vld [vmem:[%s4798_s1 + $0xf88] sm:$0xff]  ;;  %v2295_v36 = vpack.c.bf16 %v673_v33, %v671_v32  ;;  %v670_v37 = vld [vmem:[%s4798_s1 + $0x1000] sm:$0xff] }
  0xdd   :  { %2002 = vmatpush1.bf16.msra.mxu1 %v2001_v47  ;;  %1525 = vmatmul.mubr.f32.gmra.mrb[12].mxu0 %v134_v55  ;;  %v652_v47 = vld [vmem:[%s4798_s1 + $0xf70] sm:$0xff]  ;;  %v2023_v54 = vpack.c.bf16 %v401_v49, %v399_v48  ;;  %v398_v55 = vld [vmem:[%s4798_s1 + $0x780] sm:$0xff]  ;;  %v675_v39 = vld [vmem:[%s4798_s1 + $0x1028] sm:$0xff] }
  0xde   :  { %2258 = vmatpush1.bf16.msra.mxu0 %v2257_v51  ;;  %2004 = vmatprep.subr.bf16.mxu1 %v2003_v52  ;;  %v657_v51 = vld [vmem:[%s4798_s1 + $0xf98] sm:$0xff]  ;;  %v2021_v52 = vpack.c.bf16 %v396_v44, %v394_v43  ;;  %v2277_v53 = vpack.c.bf16 %v652_v47, %v650_v45  ;;  %v672_v38 = vld [vmem:[%s4798_s1 + $0x1010] sm:$0xff]  ;;  %v674_v44 = vld [vmem:[%s4798_s1 + $0x1020] sm:$0xff] }
  0xdf   :  { %2260 = vmatprep.subr.bf16.mxu0 %v2259_v56  ;;  %1078 = vmatprep.mubr.f32.mxu1 %v145_v62  ;;  %v400_v56 = vld [vmem:[%s4798_s1 + $0x790] sm:$0xff]  ;;  %v2279_v58 = vpack.c.bf16 %v657_v51, %v655_v50  ;;  %v659_v62 = vld [vmem:[%s4798_s1 + $0xfa8] sm:$0xff]  ;;  %v681_v50 = vld [vmem:[%s4798_s1 + $0x1058] sm:$0xff] }
  0xe0   :  { %1530 = vmatprep.mubr.f32.mxu0 %v153_v1  ;;  %1079 = vmatmul.mubr.f32.gmra.mrb[14].mxu1 %v144_v2  ;;  %v2025_v0 = vpack.c.bf16 %v400_v56, %v398_v55  ;;  %v2281_v1 = vpack.c.bf16 %v656_v59, %v654_v57  ;;  %v2027_v2 = vpack.c.bf16 %v405_v61, %v403_v60  ;;  %v28_v43 = vld [vmem:[%s4799_s0 + $0x70] sm:$0xff]  ;;  %v47_v48 = vld [vmem:[%s4799_s0 + $0x108] sm:$0xff]  ;;  %v38_v51 = vld [vmem:[%s4799_s0 + $0xc0] sm:$0xff] }
  0xe1   :  { %2006 = vmatpush1.bf16.msra.mxu1 %v2005_v63  ;;  %1531 = vmatmul.mubr.f32.gmra.mrb[14].mxu0 %v152_v7  ;;  %v661_v63 = vld [vmem:[%s4798_s1 + $0xfb8] sm:$0xff]  ;;  %v660_v7 = vld [vmem:[%s4798_s1 + $0xfb0] sm:$0xff]  ;;  %v679_v49 = vld [vmem:[%s4798_s1 + $0x1048] sm:$0xff] }
  0xe2   :  { %2262 = vmatpush1.bf16.msra.mxu0 %v2261_v3  ;;  %2008 = vmatprep.subr.bf16.mxu1 %v2007_v4  ;;  %v402_v3 = vld [vmem:[%s4798_s1 + $0x7a0] sm:$0xff]  ;;  %v404_v4 = vld [vmem:[%s4798_s1 + $0x7b0] sm:$0xff]  ;;  %v2283_v6 = vpack.c.bf16 %v661_v63, %v659_v62  ;;  %v2285_v13 = vpack.c.bf16 %v660_v7, %v658_v5  ;;  %v57_v56 = vld [vmem:[%s4799_s0 + $0x158] sm:$0xff]  ;;  %v2303_v57 = vpack.c.bf16 %v681_v50, %v679_v49 }
  0xe3   :  { %2264 = vmatprep.subr.bf16.mxu0 %v2263_v8  ;;  %1149 = vmatprep.mubr.f32.mxu1 %v21_v14  ;;  %v407_v8 = vld [vmem:[%s4798_s1 + $0x7c8] sm:$0xff]  ;;  %v2029_v12 = vpack.c.bf16 %v404_v4, %v402_v3  ;;  %v676_v45 = vld [vmem:[%s4798_s1 + $0x1030] sm:$0xff]  ;;  %v685_v60 = vld [vmem:[%s4798_s1 + $0x1078] sm:$0xff] }
  0xe4   :  { %1601 = vmatprep.mubr.f32.mxu0 %v29_v16  ;;  %v2031_v14 = vpack.c.bf16 %v409_v9, %v407_v8  ;;  %v408_v16 = vld [vmem:[%s4798_s1 + $0x7d0] sm:$0xff]  ;;  %v683_v59 = vld [vmem:[%s4798_s1 + $0x1068] sm:$0xff]  ;;  %v74_v7 = vld [vmem:[%s4799_s0 + $0x1e0] sm:$0xff] }
  0xe5   :  { %2010 = vmatpush1.bf16.msra.mxu1 %v2009_v15  ;;  %v406_v15 = vld [vmem:[%s4798_s1 + $0x7c0] sm:$0xff]  ;;  %v680_v55 = vld [vmem:[%s4798_s1 + $0x1050] sm:$0xff]  ;;  %v2307_v3 = vpack.c.bf16 %v685_v60, %v683_v59  ;;  %v83_v4 = vld [vmem:[%s4799_s0 + $0x228] sm:$0xff] }
  0xe6   :  { %2266 = vmatpush1.bf16.msra.mxu0 %v2265_v17  ;;  %2012 = vmatprep.subr.bf16.mxu1 %v2011_v18  ;;  %v662_v17 = vld [vmem:[%s4798_s1 + $0xfc0] sm:$0xff]  ;;  %v2287_v18 = vpack.c.bf16 %v665_v11, %v663_v10  ;;  %v2033_v24 = vpack.c.bf16 %v408_v16, %v406_v15  ;;  %v56_v61 = vld [vmem:[%s4799_s0 + $0x150] sm:$0xff]  ;;  %v687_v5 = vld [vmem:[%s4798_s1 + $0x1088] sm:$0xff] }
  0xe7   :  { %2268 = vmatprep.subr.bf16.mxu0 %v2267_v22  ;;  %v667_v22 = vld [vmem:[%s4798_s1 + $0xfe8] sm:$0xff]  ;;  %v2289_v25 = vpack.c.bf16 %v664_v19, %v662_v17  ;;  %v64_v63 = vld [vmem:[%s4799_s0 + $0x190] sm:$0xff]  ;;  %v82_v9 = vld [vmem:[%s4799_s0 + $0x220] sm:$0xff] }
  0xe8   :  { %v686_v10 = vld [vmem:[%s4798_s1 + $0x1080] sm:$0xff]  ;;  %v688_v11 = vld [vmem:[%s4798_s1 + $0x1090] sm:$0xff]  ;;  %v691_v15 = vld [vmem:[%s4798_s1 + $0x10a8] sm:$0xff] }
  0xe9   :  { %2014 = vmatpush1.bf16.msra.mxu1 %v2013_v28  ;;  %v412_v28 = vld [vmem:[%s4798_s1 + $0x7f0] sm:$0xff]  ;;  %v693_v16 = vld [vmem:[%s4798_s1 + $0x10b8] sm:$0xff]  ;;  %v690_v20 = vld [vmem:[%s4798_s1 + $0x10a0] sm:$0xff] }
  0xea   :  { %2270 = vmatpush1.bf16.msra.mxu0 %v2269_v29  ;;  %2016 = vmatprep.subr.bf16.mxu1 %v2015_v30  ;;  %v666_v29 = vld [vmem:[%s4798_s1 + $0xfe0] sm:$0xff]  ;;  %v2291_v30 = vpack.c.bf16 %v669_v23, %v667_v22  ;;  %v92_v17 = vld [vmem:[%s4799_s0 + $0x270] sm:$0xff]  ;;  %v111_v22 = vld [vmem:[%s4799_s0 + $0x308] sm:$0xff]  ;;  %v2315_v23 = vpack.c.bf16 %v693_v16, %v691_v15 }
  0xeb   :  { %2272 = vmatprep.subr.bf16.mxu0 %v2271_v34  ;;  %v2037_v34 = vpack.c.bf16 %v412_v28, %v410_v27  ;;  %v2293_v35 = vpack.c.bf16 %v668_v31, %v666_v29  ;;  %v100_v19 = vld [vmem:[%s4799_s0 + $0x2b0] sm:$0xff]  ;;  %v110_v27 = vld [vmem:[%s4799_s0 + $0x300] sm:$0xff]  ;;  %v2317_v28 = vpack.c.bf16 %v692_v21, %v690_v20  ;;  %v129_v32 = vld [vmem:[%s4799_s0 + $0x398] sm:$0xff] }
  0xec   :  { %v118_v29 = vld [vmem:[%s4799_s0 + $0x340] sm:$0xff]  ;;  %v696_v31 = vld [vmem:[%s4798_s1 + $0x10d0] sm:$0xff]  ;;  %v723_v15 = vld [vmem:[%s4798_s1 + $0x11a8] sm:$0xff] }
  0xed   :  { %2018 = vmatpush1.bf16.msra.mxu1 %v2017_v40  ;;  %v677_v40 = vld [vmem:[%s4798_s1 + $0x1038] sm:$0xff]  ;;  %v154_v49 = vld [vmem:[%s4799_s0 + $0x460] sm:$0xff]  ;;  %v708_v60 = vld [vmem:[%s4798_s1 + $0x1130] sm:$0xff] }
  0xee   :  { %2274 = vmatpush1.bf16.msra.mxu0 %v2273_v41  ;;  %2020 = vmatprep.subr.bf16.mxu1 %v2019_v42  ;;  %v20_v41 = vld [vmem:[%s4799_s0 + $0x30] sm:$0xff]  ;;  %v2297_v42 = vpack.c.bf16 %v672_v38, %v670_v37  ;;  %v2299_v47 = vpack.c.bf16 %v677_v40, %v675_v39  ;;  %v698_v40 = vld [vmem:[%s4798_s1 + $0x10e0] sm:$0xff]  ;;  %v725_v16 = vld [vmem:[%s4798_s1 + $0x11b8] sm:$0xff] }
  0xef   :  { %2276 = vmatprep.subr.bf16.mxu0 %v2275_v46  ;;  %v39_v46 = vld [vmem:[%s4799_s0 + $0xc8] sm:$0xff]  ;;  %v128_v37 = vld [vmem:[%s4799_s0 + $0x390] sm:$0xff]  ;;  %v706_v59 = vld [vmem:[%s4798_s1 + $0x1120] sm:$0xff] }
  0xf0   :  { %v136_v39 = vld [vmem:[%s4799_s0 + $0x3d0] sm:$0xff]  ;;  %v727_v21 = vld [vmem:[%s4798_s1 + $0x11c8] sm:$0xff] }
  0xf1   :  { %2022 = vmatpush1.bf16.msra.mxu1 %v2021_v52  ;;  %v2301_v52 = vpack.c.bf16 %v676_v45, %v674_v44  ;;  %v703_v44 = vld [vmem:[%s4798_s1 + $0x1108] sm:$0xff]  ;;  %v705_v45 = vld [vmem:[%s4798_s1 + $0x1118] sm:$0xff]  ;;  %v724_v20 = vld [vmem:[%s4798_s1 + $0x11b0] sm:$0xff] }
  0xf2   :  { %2278 = vmatpush1.bf16.msra.mxu0 %v2277_v53  ;;  %2024 = vmatprep.subr.bf16.mxu1 %v2023_v54  ;;  %v46_v53 = vld [vmem:[%s4799_s0 + $0x100] sm:$0xff]  ;;  %v2327_v50 = vpack.c.bf16 %v705_v45, %v703_v44  ;;  %v157_v44 = vld [vmem:[%s4799_s0 + $0x478] sm:$0xff] }
  0xf3   :  { %2280 = vmatprep.subr.bf16.mxu0 %v2279_v58  ;;  %v678_v54 = vld [vmem:[%s4798_s1 + $0x1040] sm:$0xff]  ;;  %v65_v58 = vld [vmem:[%s4799_s0 + $0x198] sm:$0xff] }
  0xf4   :  { %v2305_v62 = vpack.c.bf16 %v680_v55, %v678_v54  ;;  %v709_v54 = vld [vmem:[%s4798_s1 + $0x1138] sm:$0xff]  ;;  %v31_v55 = vld [vmem:[%s4799_s0 + $0x88] sm:$0xff] }
  0xf5   :  { %2026 = vmatpush1.bf16.msra.mxu1 %v2025_v0  ;;  %v682_v0 = vld [vmem:[%s4798_s1 + $0x1060] sm:$0xff]  ;;  %v85_v45 = vld [vmem:[%s4799_s0 + $0x238] sm:$0xff] }
  0xf6   :  { %2282 = vmatpush1.bf16.msra.mxu0 %v2281_v1  ;;  %2028 = vmatprep.subr.bf16.mxu1 %v2027_v2  ;;  %v684_v1 = vld [vmem:[%s4798_s1 + $0x1070] sm:$0xff]  ;;  %v75_v2 = vld [vmem:[%s4799_s0 + $0x1e8] sm:$0xff] }
  0xf7   :  { %2284 = vmatprep.subr.bf16.mxu0 %v2283_v6  ;;  %v689_v6 = vld [vmem:[%s4798_s1 + $0x1098] sm:$0xff]  ;;  %v2309_v8 = vpack.c.bf16 %v684_v1, %v682_v0  ;;  %v710_v1 = vld [vmem:[%s4798_s1 + $0x1140] sm:$0xff] }
  0xf9   :  { %2030 = vmatpush1.bf16.msra.mxu1 %v2029_v12  ;;  %v93_v12 = vld [vmem:[%s4799_s0 + $0x278] sm:$0xff] }
  0xfa   :  { %2286 = vmatpush1.bf16.msra.mxu0 %v2285_v13  ;;  %2032 = vmatprep.subr.bf16.mxu1 %v2031_v14  ;;  %v2311_v13 = vpack.c.bf16 %v689_v6, %v687_v5  ;;  %v101_v14 = vld [vmem:[%s4799_s0 + $0x2b8] sm:$0xff] }
  0xfb   :  { %2288 = vmatprep.subr.bf16.mxu0 %v2287_v18  ;;  %v2313_v18 = vpack.c.bf16 %v688_v11, %v686_v10  ;;  %v721_v10 = vld [vmem:[%s4798_s1 + $0x1198] sm:$0xff] }
  0xfd   :  { %2034 = vmatpush1.bf16.msra.mxu1 %v2033_v24  ;;  %v119_v24 = vld [vmem:[%s4799_s0 + $0x348] sm:$0xff] }
  0xfe   :  { %2290 = vmatpush1.bf16.msra.mxu0 %v2289_v25  ;;  %2036 = vmatprep.subr.bf16.mxu1 %v2035_v26  ;;  %v695_v25 = vld [vmem:[%s4798_s1 + $0x10c8] sm:$0xff]  ;;  %v697_v26 = vld [vmem:[%s4798_s1 + $0x10d8] sm:$0xff] }
  0xff   :  { %2292 = vmatprep.subr.bf16.mxu0 %v2291_v30  ;;  %v694_v30 = vld [vmem:[%s4798_s1 + $0x10c0] sm:$0xff]  ;;  %v2319_v33 = vpack.c.bf16 %v697_v26, %v695_v25  ;;  %v728_v26 = vld [vmem:[%s4798_s1 + $0x11d0] sm:$0xff] }
 0x100   :  { %v2321_v38 = vpack.c.bf16 %v696_v31, %v694_v30  ;;  %v726_v25 = vld [vmem:[%s4798_s1 + $0x11c0] sm:$0xff] }
 0x101   :  { %2038 = vmatpush1.bf16.msra.mxu1 %v2037_v34  ;;  %v137_v34 = vld [vmem:[%s4799_s0 + $0x3d8] sm:$0xff]  ;;  %v730_v31 = vld [vmem:[%s4798_s1 + $0x11e0] sm:$0xff] }
 0x102   :  { %2294 = vmatpush1.bf16.msra.mxu0 %v2293_v35  ;;  %2359 = vmatprep.subr.bf16.mxu1 %v2295_v36  ;;  %v699_v35 = vld [vmem:[%s4798_s1 + $0x10e8] sm:$0xff] }
 0x103   :  { %2296 = vmatprep.subr.bf16.mxu0 %v2295_v36  ;;  %v701_v36 = vld [vmem:[%s4798_s1 + $0x10f8] sm:$0xff] }
 0x104   :  { %1150 = vmatmul.mubr.f32.vlgmr.msra.gmra.mrb[0].mxu1 %v20_v41  ;;  %v700_v41 = vld [vmem:[%s4798_s1 + $0x10f0] sm:$0xff] }
 0x105   :  { %1602 = vmatmul.mubr.f32.vlgmr.msra.gmra.mrb[0].mxu0 %v28_v43  ;;  %2375 = vmatpush1.bf16.msra.mxu1 %v2297_v42  ;;  %v2323_v43 = vpack.c.bf16 %v701_v36, %v699_v35  ;;  %v30_v35 = vld [vmem:[%s4799_s0 + $0x80] sm:$0xff]  ;;  %v121_v36 = vld [vmem:[%s4799_s0 + $0x358] sm:$0xff] }
 0x106   :  { %2298 = vmatpush1.bf16.msra.mxu0 %v2297_v42  ;;  %1155 = vmatprep.mubr.f32.mxu1 %v39_v46  ;;  %v147_v42 = vld [vmem:[%s4799_s0 + $0x428] sm:$0xff] }
 0x107   :  { %1607 = vmatprep.mubr.f32.mxu0 %v47_v48  ;;  %2300 = vmatprep.subr.bf16.mxu0 %v2299_v47  ;;  %v155_v46 = vld [vmem:[%s4799_s0 + $0x468] sm:$0xff]  ;;  %v2325_v48 = vpack.c.bf16 %v700_v41, %v698_v40 }
 0x108   :  { %1156 = vmatmul.mubr.f32.gmra.mrb[2].mxu1 %v38_v51  ;;  %2360 = vmatprep.subr.bf16.mxu1 %v2299_v47  ;;  %v146_v47 = vld [vmem:[%s4799_s0 + $0x420] sm:$0xff]  ;;  %v139_v40 = vld [vmem:[%s4799_s0 + $0x3e8] sm:$0xff] }
 0x109   :  { %1608 = vmatmul.mubr.f32.gmra.mrb[2].mxu0 %v46_v53  ;;  %2376 = vmatpush1.bf16.msra.mxu1 %v2301_v52  ;;  %v702_v51 = vld [vmem:[%s4798_s1 + $0x1100] sm:$0xff]  ;;  %v707_v53 = vld [vmem:[%s4798_s1 + $0x1128] sm:$0xff] }
 0x10a   :  { %2302 = vmatpush1.bf16.msra.mxu0 %v2301_v52  ;;  %1161 = vmatprep.mubr.f32.mxu1 %v57_v56  ;;  %v704_v52 = vld [vmem:[%s4798_s1 + $0x1110] sm:$0xff]  ;;  %v67_v41 = vld [vmem:[%s4799_s0 + $0x1a8] sm:$0xff] }
 0x10b   :  { %1613 = vmatprep.mubr.f32.mxu0 %v65_v58  ;;  %2304 = vmatprep.subr.bf16.mxu0 %v2303_v57  ;;  %v2329_v56 = vpack.c.bf16 %v704_v52, %v702_v51  ;;  %v2331_v58 = vpack.c.bf16 %v709_v54, %v707_v53 }
 0x10c   :  { %1162 = vmatmul.mubr.f32.gmra.mrb[4].mxu1 %v56_v61  ;;  %2361 = vmatprep.subr.bf16.mxu1 %v2303_v57  ;;  %v103_v57 = vld [vmem:[%s4799_s0 + $0x2c8] sm:$0xff] }
 0x10d   :  { %1614 = vmatmul.mubr.f32.gmra.mrb[4].mxu0 %v64_v63  ;;  %2377 = vmatpush1.bf16.msra.mxu1 %v2305_v62  ;;  %v711_v61 = vld [vmem:[%s4798_s1 + $0x1148] sm:$0xff]  ;;  %v2333_v63 = vpack.c.bf16 %v708_v60, %v706_v59 }
 0x10e   :  { %2306 = vmatpush1.bf16.msra.mxu0 %v2305_v62  ;;  %1167 = vmatprep.mubr.f32.mxu1 %v75_v2  ;;  %v713_v62 = vld [vmem:[%s4798_s1 + $0x1158] sm:$0xff]  ;;  %v712_v2 = vld [vmem:[%s4798_s1 + $0x1150] sm:$0xff] }
 0x10f   :  { %1619 = vmatprep.mubr.f32.mxu0 %v83_v4  ;;  %2308 = vmatprep.subr.bf16.mxu0 %v2307_v3  ;;  %v2335_v0 = vpack.c.bf16 %v713_v62, %v711_v61  ;;  %v717_v4 = vld [vmem:[%s4798_s1 + $0x1178] sm:$0xff]  ;;  %v2337_v5 = vpack.c.bf16 %v712_v2, %v710_v1 }
 0x110   :  { %1168 = vmatmul.mubr.f32.gmra.mrb[6].mxu1 %v74_v7  ;;  %2362 = vmatprep.subr.bf16.mxu1 %v2307_v3  ;;  %v715_v3 = vld [vmem:[%s4798_s1 + $0x1168] sm:$0xff]  ;;  %v714_v7 = vld [vmem:[%s4798_s1 + $0x1160] sm:$0xff] }
 0x111   :  { %1620 = vmatmul.mubr.f32.gmra.mrb[6].mxu0 %v82_v9  ;;  %2378 = vmatpush1.bf16.msra.mxu1 %v2309_v8  ;;  %v2339_v6 = vpack.c.bf16 %v717_v4, %v715_v3  ;;  %v719_v9 = vld [vmem:[%s4798_s1 + $0x1188] sm:$0xff] }
 0x112   :  { %2310 = vmatpush1.bf16.msra.mxu0 %v2309_v8  ;;  %1173 = vmatprep.mubr.f32.mxu1 %v93_v12  ;;  %v716_v8 = vld [vmem:[%s4798_s1 + $0x1170] sm:$0xff]  ;;  %v2343_v12 = vpack.c.bf16 %v721_v10, %v719_v9 }
 0x113   :  { %1625 = vmatprep.mubr.f32.mxu0 %v101_v14  ;;  %2312 = vmatprep.subr.bf16.mxu0 %v2311_v13  ;;  %v2341_v11 = vpack.c.bf16 %v716_v8, %v714_v7  ;;  %v720_v14 = vld [vmem:[%s4798_s1 + $0x1190] sm:$0xff] }
 0x114   :  { %1174 = vmatmul.mubr.f32.gmra.mrb[8].mxu1 %v92_v17  ;;  %2363 = vmatprep.subr.bf16.mxu1 %v2311_v13  ;;  %v718_v13 = vld [vmem:[%s4798_s1 + $0x1180] sm:$0xff] }
 0x115   :  { %1626 = vmatmul.mubr.f32.gmra.mrb[8].mxu0 %v100_v19  ;;  %2379 = vmatpush1.bf16.msra.mxu1 %v2313_v18  ;;  %v2345_v17 = vpack.c.bf16 %v720_v14, %v718_v13  ;;  %v722_v19 = vld [vmem:[%s4798_s1 + $0x11a0] sm:$0xff] }
 0x116   :  { %2314 = vmatpush1.bf16.msra.mxu0 %v2313_v18  ;;  %1179 = vmatprep.mubr.f32.mxu1 %v111_v22  ;;  %v2347_v18 = vpack.c.bf16 %v725_v16, %v723_v15  ;;  %v729_v22 = vld [vmem:[%s4798_s1 + $0x11d8] sm:$0xff] }
 0x117   :  { %1631 = vmatprep.mubr.f32.mxu0 %v119_v24  ;;  %2316 = vmatprep.subr.bf16.mxu0 %v2315_v23  ;;  %v2351_v24 = vpack.c.bf16 %v729_v22, %v727_v21 }
 0x118   :  { %1180 = vmatmul.mubr.f32.gmra.mrb[10].mxu1 %v110_v27  ;;  %2364 = vmatprep.subr.bf16.mxu1 %v2315_v23  ;;  %v2349_v23 = vpack.c.bf16 %v724_v20, %v722_v19  ;;  %v731_v27 = vld [vmem:[%s4798_s1 + $0x11e8] sm:$0xff] }
 0x119   :  { %1632 = vmatmul.mubr.f32.gmra.mrb[10].mxu0 %v118_v29  ;;  %2380 = vmatpush1.bf16.msra.mxu1 %v2317_v28  ;;  %v2353_v29 = vpack.c.bf16 %v728_v26, %v726_v25 }
 0x11a   :  { %2318 = vmatpush1.bf16.msra.mxu0 %v2317_v28  ;;  %1185 = vmatprep.mubr.f32.mxu1 %v129_v32  ;;  %v733_v28 = vld [vmem:[%s4798_s1 + $0x11f8] sm:$0xff]  ;;  %v732_v32 = vld [vmem:[%s4798_s1 + $0x11f0] sm:$0xff] }
 0x11b   :  { %1637 = vmatprep.mubr.f32.mxu0 %v137_v34  ;;  %2320 = vmatprep.subr.bf16.mxu0 %v2319_v33  ;;  %v2355_v30 = vpack.c.bf16 %v733_v28, %v731_v27  ;;  %v102_v34 = vld [vmem:[%s4799_s0 + $0x2c0] sm:$0xff] }
 0x11c   :  { %1186 = vmatmul.mubr.f32.gmra.mrb[12].mxu1 %v128_v37  ;;  %2365 = vmatprep.subr.bf16.mxu1 %v2319_v33  ;;  %v2357_v33 = vpack.c.bf16 %v732_v32, %v730_v31  ;;  %v49_v37 = vld [vmem:[%s4799_s0 + $0x118] sm:$0xff] }
 0x11d   :  { %1638 = vmatmul.mubr.f32.gmra.mrb[12].mxu0 %v136_v39  ;;  %2381 = vmatpush1.bf16.msra.mxu1 %v2321_v38  ;;  %v48_v39 = vld [vmem:[%s4799_s0 + $0x110] sm:$0xff] }
 0x11e   :  { %2322 = vmatpush1.bf16.msra.mxu0 %v2321_v38  ;;  %1191 = vmatprep.mubr.f32.mxu1 %v147_v42  ;;  %v120_v38 = vld [vmem:[%s4799_s0 + $0x350] sm:$0xff]  ;;  %v138_v42 = vld [vmem:[%s4799_s0 + $0x3e0] sm:$0xff] }
 0x11f   :  { %1643 = vmatprep.mubr.f32.mxu0 %v155_v46  ;;  %2324 = vmatprep.subr.bf16.mxu0 %v2323_v43  ;;  %v156_v46 = vld [vmem:[%s4799_s0 + $0x470] sm:$0xff] }
 0x120   :  { %1192 = vmatmul.mubr.f32.gmra.mrb[14].mxu1 %v146_v47  ;;  %2366 = vmatprep.subr.bf16.mxu1 %v2323_v43  ;;  %v66_v43 = vld [vmem:[%s4799_s0 + $0x1a0] sm:$0xff]  ;;  %v84_v47 = vld [vmem:[%s4799_s0 + $0x230] sm:$0xff] }
 0x121   :  { %1644 = vmatmul.mubr.f32.gmra.mrb[14].mxu0 %v154_v49  ;;  %2382 = vmatpush1.bf16.msra.mxu1 %v2325_v48 }
 0x122   :  { %2326 = vmatpush1.bf16.msra.mxu0 %v2325_v48  ;;  %2367 = vmatprep.subr.bf16.mxu1 %v2327_v50 }
 0x123   :  { %2328 = vmatprep.subr.bf16.mxu0 %v2327_v50  ;;  %1714 = vmatprep.mubr.f32.mxu0 %v31_v55  ;;  %v736_v50 = vlaneseq }
 0x124   :  { %1738 = vmatprep.mubr.f32.mxu1 %v103_v57  ;;  %v734_v57 = vld [vmem:[%s4800_s2] sm:$0x3] }
 0x125   :  { %2383 = vmatpush1.bf16.msra.mxu1 %v2329_v56  ;;  %v737_v53 = vshrl.u32 %v736_v50, 7 }
 0x126   :  { %2330 = vmatpush1.bf16.msra.mxu0 %v2329_v56  ;;  %2368 = vmatprep.subr.bf16.mxu1 %v2331_v58 }
 0x127   :  { %2332 = vmatprep.subr.bf16.mxu0 %v2331_v58  ;;  %v738_v56 = vsub.s32 0, %v737_v53  ;;  %v742_v58 = vsub.s32 1, %v737_v53 }
 0x129   :  { %2384 = vmatpush1.bf16.msra.mxu1 %v2333_v63  ;;  %v4726_v61 = vrot.slane %v734_v57, %v738_v56  ;;  %v4728_v62 = vrot.slane %v734_v57, %v742_v58 }
 0x12a   :  { %2334 = vmatpush1.bf16.msra.mxu0 %v2333_v63  ;;  %2369 = vmatprep.subr.bf16.mxu1 %v2335_v0 }
 0x12b   :  { %2336 = vmatprep.subr.bf16.mxu0 %v2335_v0 }
 0x12d   :  { %2385 = vmatpush1.bf16.msra.mxu1 %v2337_v5 }
 0x12e   :  { %2338 = vmatpush1.bf16.msra.mxu0 %v2337_v5  ;;  %2370 = vmatprep.subr.bf16.mxu1 %v2339_v6 }
 0x12f   :  { %2340 = vmatprep.subr.bf16.mxu0 %v2339_v6 }
 0x131   :  { %2386 = vmatpush1.bf16.msra.mxu1 %v2341_v11 }
 0x132   :  { %2342 = vmatpush1.bf16.msra.mxu0 %v2341_v11  ;;  %2371 = vmatprep.subr.bf16.mxu1 %v2343_v12 }
 0x133   :  { %2344 = vmatprep.subr.bf16.mxu0 %v2343_v12 }
 0x135   :  { %2387 = vmatpush1.bf16.msra.mxu1 %v2345_v17 }
 0x136   :  { %2346 = vmatpush1.bf16.msra.mxu0 %v2345_v17  ;;  %2372 = vmatprep.subr.bf16.mxu1 %v2347_v18 }
 0x137   :  { %2348 = vmatprep.subr.bf16.mxu0 %v2347_v18 }
 0x139   :  { %2388 = vmatpush1.bf16.msra.mxu1 %v2349_v23 }
 0x13a   :  { %2350 = vmatpush1.bf16.msra.mxu0 %v2349_v23  ;;  %2373 = vmatprep.subr.bf16.mxu1 %v2351_v24 }
 0x13b   :  { %2352 = vmatprep.subr.bf16.mxu0 %v2351_v24 }
 0x13d   :  { %2389 = vmatpush1.bf16.msra.mxu1 %v2353_v29 }
 0x13e   :  { %2354 = vmatpush1.bf16.msra.mxu0 %v2353_v29  ;;  %2374 = vmatprep.subr.bf16.mxu1 %v2355_v30 }
 0x13f   :  { %2356 = vmatprep.subr.bf16.mxu0 %v2355_v30 }
 0x141   :  { %2390 = vmatpush1.bf16.msra.mxu1 %v2357_v33 }
 0x142   :  { %2358 = vmatpush1.bf16.msra.mxu0 %v2357_v33 }
 0x144   :  { %1739 = vmatmul.mubr.f32.vlgmr.msra.gmra.mrb[16].mxu1 %v102_v34 }
 0x145   :  { %1715 = vmatmul.mubr.f32.vlgmr.msra.gmra.mrb[0].mxu0 %v30_v35  ;;  %1744 = vmatprep.mubr.f32.mxu1 %v121_v36 }
 0x146   :  { %1720 = vmatprep.mubr.f32.mxu0 %v49_v37 }
 0x148   :  { %1745 = vmatmul.mubr.f32.gmra.mrb[18].mxu1 %v120_v38 }
 0x149   :  { %1721 = vmatmul.mubr.f32.gmra.mrb[2].mxu0 %v48_v39  ;;  %1750 = vmatprep.mubr.f32.mxu1 %v139_v40 }
 0x14a   :  { %1726 = vmatprep.mubr.f32.mxu0 %v67_v41 }
 0x14c   :  { %1751 = vmatmul.mubr.f32.gmra.mrb[20].mxu1 %v138_v42 }
 0x14d   :  { %1727 = vmatmul.mubr.f32.gmra.mrb[4].mxu0 %v66_v43  ;;  %1756 = vmatprep.mubr.f32.mxu1 %v157_v44 }
 0x14e   :  { %1732 = vmatprep.mubr.f32.mxu0 %v85_v45 }
 0x150   :  { %1757 = vmatmul.mubr.f32.gmra.mrb[22].mxu1 %v156_v46 }
 0x151   :  { %1733 = vmatmul.mubr.f32.gmra.mrb[6].mxu0 %v84_v47 }
 0x1d7   :  { %v1151_v48 = vpop.f32.mrb[0].mxu1 }
 0x1d8   :  { %v1153_v49 = vpop.f32.mrb[1].mxu1  ;;  %v2391_v31 = vadd.f32 %v1151_v48, %v4726_v61 }
 0x1d9   :  { %v2393_v33 = vadd.f32 %v1153_v49, %v4728_v62 }
 0x1db   :  { %v1157_v51 = vpop.f32.mrb[2].mxu1 }
 0x1dc   :  { %v1159_v52 = vpop.f32.mrb[3].mxu1  ;;  %v2395_v41 = vadd.f32 %v1157_v51, %v4726_v61 }
 0x1dd   :  { %v2397_v43 = vadd.f32 %v1159_v52, %v4728_v62 }
 0x1df   :  { %v4715_v54 = vpop.f32.mrb[4].mxu1 }
 0x1e0   :  { %v4717_v55 = vpop.f32.mrb[5].mxu1  ;;  %v2399_v51 = vadd.f32 %v4715_v54, %v4726_v61 }
 0x1e1   :  { %v2401_v53 = vadd.f32 %v4717_v55, %v4728_v62 }
 0x1e3   :  { %v4722_v59 = vpop.f32.mrb[6].mxu1 }
 0x1e4   :  { %v4724_v60 = vpop.f32.mrb[7].mxu1 }
 0x1e7   :  { %v1175_v63 = vpop.f32.mrb[8].mxu1 }
 0x1e8   :  { %v2407_v0 = vadd.f32 %v1175_v63, %v4726_v61  ;;  %v1627_v1 = vpop.f32.mrb[8].mxu0  ;;  %v1177_v2 = vpop.f32.mrb[9].mxu1 }
 0x1e9   :  { %v2410_v3 = vadd.f32 %v1177_v2, %v4728_v62  ;;  %v1629_v4 = vpop.f32.mrb[9].mxu0  ;;  %v2403_v2 = vadd.f32 %v4722_v59, %v4726_v61 }
 0x1ea   :  { %v2408_v5 = vadd.f32 %v2407_v0, %v1627_v1 }
 0x1eb   :  { %v2411_v6 = vadd.f32 %v2410_v3, %v1629_v4  ;;  %v1181_v7 = vpop.f32.mrb[10].mxu1  ;;  %v2405_v3 = vadd.f32 %v4724_v60, %v4728_v62 }
 0x1ec   :  { %v2413_v8 = vadd.f32 %v1181_v7, %v4726_v61  ;;  %v1633_v9 = vpop.f32.mrb[10].mxu0  ;;  %v1183_v10 = vpop.f32.mrb[11].mxu1 }
 0x1ed   :  { %v2416_v11 = vadd.f32 %v1183_v10, %v4728_v62  ;;  %v1635_v12 = vpop.f32.mrb[11].mxu0 }
 0x1ee   :  { %v2414_v13 = vadd.f32 %v2413_v8, %v1633_v9 }
 0x1ef   :  { %v2417_v14 = vadd.f32 %v2416_v11, %v1635_v12  ;;  %v1187_v15 = vpop.f32.mrb[12].mxu1 }
 0x1f0   :  { %v2419_v16 = vadd.f32 %v1187_v15, %v4726_v61  ;;  %v1639_v17 = vpop.f32.mrb[12].mxu0  ;;  %v1189_v18 = vpop.f32.mrb[13].mxu1 }
 0x1f1   :  { %v2422_v19 = vadd.f32 %v1189_v18, %v4728_v62  ;;  %v1641_v20 = vpop.f32.mrb[13].mxu0 }
 0x1f2   :  { %v2420_v21 = vadd.f32 %v2419_v16, %v1639_v17 }
 0x1f3   :  { %v2423_v22 = vadd.f32 %v2422_v19, %v1641_v20  ;;  %v1193_v23 = vpop.f32.mrb[14].mxu1 }
 0x1f4   :  { %v2425_v24 = vadd.f32 %v1193_v23, %v4726_v61  ;;  %v1645_v25 = vpop.f32.mrb[14].mxu0  ;;  %v1195_v26 = vpop.f32.mrb[15].mxu1 }
 0x1f5   :  { %v2428_v27 = vadd.f32 %v1195_v26, %v4728_v62  ;;  %v1647_v28 = vpop.f32.mrb[15].mxu0 }
 0x1f6   :  { %v2426_v29 = vadd.f32 %v2425_v24, %v1645_v25 }
 0x1f7   :  { %v2429_v30 = vadd.f32 %v2428_v27, %v1647_v28 }
 0x217   :  { %v1740_v32 = vpop.f32.mrb[16].mxu1 }
 0x218   :  { %v1716_v34 = vpop.f32.mrb[0].mxu0  ;;  %v2409_v35 = vadd.f32 %v2408_v5, %v1740_v32  ;;  %v1742_v36 = vpop.f32.mrb[17].mxu1 }
 0x219   :  { %v2392_v37 = vadd.f32 %v2391_v31, %v1716_v34  ;;  %v1718_v38 = vpop.f32.mrb[1].mxu0  ;;  %v2412_v39 = vadd.f32 %v2411_v6, %v1742_v36 }
 0x21a   :  { %1771 = vst [vmem:[%s4801_s3 + $0x40] sm:$0xff] %v2409_v35  ;;  %v2394_v40 = vadd.f32 %v2393_v33, %v1718_v38 }
 0x21b   :  { %1763 = vst [vmem:[%s4801_s3] sm:$0xff] %v2392_v37  ;;  %1772 = vst [vmem:[%s4801_s3 + $0x48] sm:$0xff] %v2412_v39  ;;  %v1746_v42 = vpop.f32.mrb[18].mxu1 }
 0x21c   :  { %1764 = vst [vmem:[%s4801_s3 + $0x8] sm:$0xff] %v2394_v40  ;;  %v1722_v44 = vpop.f32.mrb[2].mxu0  ;;  %v2415_v45 = vadd.f32 %v2414_v13, %v1746_v42  ;;  %v1748_v46 = vpop.f32.mrb[19].mxu1 }
 0x21d   :  { %v2396_v47 = vadd.f32 %v2395_v41, %v1722_v44  ;;  %v1724_v48 = vpop.f32.mrb[3].mxu0  ;;  %v2418_v49 = vadd.f32 %v2417_v14, %v1748_v46 }
 0x21e   :  { %1773 = vst [vmem:[%s4801_s3 + $0x50] sm:$0xff] %v2415_v45  ;;  %v2398_v50 = vadd.f32 %v2397_v43, %v1724_v48 }
 0x21f   :  { %1765 = vst [vmem:[%s4801_s3 + $0x10] sm:$0xff] %v2396_v47  ;;  %1774 = vst [vmem:[%s4801_s3 + $0x58] sm:$0xff] %v2418_v49  ;;  %v1752_v52 = vpop.f32.mrb[20].mxu1 }
 0x220   :  { %1766 = vst [vmem:[%s4801_s3 + $0x18] sm:$0xff] %v2398_v50  ;;  %v1728_v56 = vpop.f32.mrb[4].mxu0  ;;  %v2421_v57 = vadd.f32 %v2420_v21, %v1752_v52  ;;  %v1754_v58 = vpop.f32.mrb[21].mxu1 }
 0x221   :  { %v2400_v54 = vadd.f32 %v2399_v51, %v1728_v56  ;;  %v1730_v63 = vpop.f32.mrb[5].mxu0  ;;  %v2424_v0 = vadd.f32 %v2423_v22, %v1754_v58 }
 0x222   :  { %1775 = vst [vmem:[%s4801_s3 + $0x60] sm:$0xff] %v2421_v57  ;;  %v2402_v1 = vadd.f32 %v2401_v53, %v1730_v63 }
 0x223   :  { %1767 = vst [vmem:[%s4801_s3 + $0x20] sm:$0xff] %v2400_v54  ;;  %1776 = vst [vmem:[%s4801_s3 + $0x68] sm:$0xff] %v2424_v0  ;;  %v1758_v55 = vpop.f32.mrb[22].mxu1 }
 0x224   :  { %1768 = vst [vmem:[%s4801_s3 + $0x28] sm:$0xff] %v2402_v1  ;;  %v1734_v4 = vpop.f32.mrb[6].mxu0  ;;  %v2427_v5 = vadd.f32 %v2426_v29, %v1758_v55  ;;  %v1760_v6 = vpop.f32.mrb[23].mxu1 }
 0x225   :  { %v2404_v59 = vadd.f32 %v2403_v2, %v1734_v4  ;;  %v1736_v61 = vpop.f32.mrb[7].mxu0  ;;  %v2430_v7 = vadd.f32 %v2429_v30, %v1760_v6 }
 0x226   :  { %1777 = vst [vmem:[%s4801_s3 + $0x70] sm:$0xff] %v2427_v5  ;;  %v2406_v8 = vadd.f32 %v2405_v3, %v1736_v61 }
 0x227   :  { %1769 = vst [vmem:[%s4801_s3 + $0x30] sm:$0xff] %v2404_v59  ;;  %1778 = vst [vmem:[%s4801_s3 + $0x78] sm:$0xff] %v2430_v7 }
 0x228   :  { %1770 = vst [vmem:[%s4801_s3 + $0x38] sm:$0xff] %v2406_v8 }

// kernel: d_word_region_forward.3
= control target key start
LH: loop header
LB: loop body
LE: loop exit
PB: predicated region body
PF: predicated region fallthrough
CT: control target
= control target key end

     0   :  { %s2651_s25 = smov 0   ;;  %s3291_s0 = inlined_call_operand.vmem [shape: f32[2,16,256], index: 0, kind: input, shape index: {}]   ;;  %s3292_s1 = inlined_call_operand.vmem [shape: f32[2,16,256], index: 1, kind: input, shape index: {}]   ;;  %s3293_s2 = inlined_call_operand.vmem [shape: f32[2,6,32], index: 2, kind: input, shape index: {}]   ;;  %s3294_s3 = inlined_call_operand.vmem [shape: f32[2,32,6], index: 3, kind: input, shape index: {}]   ;;  %s3295_s4 = inlined_call_operand.vmem [shape: f32[2,32,6], index: 4, kind: input, shape index: {}]   ;;  %s3296_s5 = inlined_call_operand.vmem [shape: f32[2,6,1], index: 5, kind: input, shape index: {}]   ;;  %s3297_s6 = inlined_call_operand.vmem [shape: f32[2,1,6], index: 6, kind: input, shape index: {}]   ;;  %s3298_s7 = inlined_call_operand.vmem [shape: f32[2,1,6], index: 7, kind: input, shape index: {}]   ;;  %s3299_s8 = inlined_call_operand.vmem [shape: f32[32,256], index: 8, kind: input, shape index: {}]   ;;  %s3300_s9 = inlined_call_operand.vmem [shape: f32[256,32], index: 9, kind: input, shape index: {}]   ;;  %s3301_s10 = inlined_call_operand.vmem [shape: f32[1,256], index: 10, kind: input, shape index: {}]   ;;  %s3302_s11 = inlined_call_operand.vmem [shape: f32[256,1], index: 11, kind: input, shape index: {}]   ;;  %s3303_s12 = inlined_call_operand.vmem [shape: f32[2,16,6], index: 12, kind: output, shape index: {0}]   ;;  %s3304_s13 = inlined_call_operand.vmem [shape: f32[2,16,6], index: 13, kind: output, shape index: {1}]  }
   0x1 LB: > { %s2019_s26 = sadd.s32 4294967295, %s2577_s25   ;;  %p2023_p0 = scmp.ge.s32.totalorder %s2577_s25, 1  ;;  %s2577_s25 = sphi %s2651_s25, %s24_s25  }
   0x2   : > { %p454_p1 = scmp.lt.s32.totalorder %s2577_s25, 3 }
   0x4   : > { %p455_p2 = pnand %p2023_p0, %p454_p1 }
   0x5   : > { %p532_p3 = scmp.lt.s32.totalorder (!%p455_p2), %s2019_s26, 1  ;;  %v2662_v0 = vld [vmem:[%s3300_s9] sm:$0xff] (!%p455_p2)  ;;  %vm668_vm0 = vcmask (!%p455_p2), 261120   ;;  %v2579_v1 = vmov (!%p455_p2), 0   ;;  %v2580_v13 = vmov (!%p455_p2), 0.0   ;;  %v618_v16 = vld [vmem:[%s3302_s11 + $0x8] sm:$0xff] (!%p455_p2) }
   0x6   : > { %458 = sbr.rel (%p455_p2) target bundleno = 1183 (0x49f), region = 68  ;;  %2549 = vset.pattern.permute.xlu0 (!%p455_p2), %v2579_v1  ;;  %2366 = vmatprep.mubr.msk.f32.mxu0 (!%p455_p2), %vm668_vm0, %v2662_v0  ;;  %v633_v8 = vld [vmem:[%s3302_s11 + $0x80] sm:$0xff] (!%p455_p2)  ;;  %v636_v17 = vld [vmem:[%s3302_s11 + $0x98] sm:$0xff] (!%p455_p2)  ;;  %v634_v18 = vld [vmem:[%s3302_s11 + $0x88] sm:$0xff] (!%p455_p2)  ;;  %vm1651_vm1 = vcmask (!%p455_p2), 46080   ;;  %vm1558_vm2 = vcmask (!%p455_p2), 48128  }
   0x7   : > { %2550 = vset.pattern.permute.xlu1 (!%p455_p2), %v2579_v1  ;;  %736 = vmatprep.mubr.f32.mxu1 (!%p455_p2), %v2580_v13  ;;  %v2700_v19 = vld [vmem:[%s3300_s9 + $0x8] sm:$0xff] (!%p455_p2)  ;;  %v2705_v20 = vld [vmem:[%s3300_s9 + $0x10] sm:$0xff] (!%p455_p2)  ;;  %v617_v21 = vld [vmem:[%s3302_s11] sm:$0xff] (!%p455_p2)  ;;  %vm1669_vm3 = vcmask (!%p455_p2), 1045504  }
   0x8   : > { %845 = vperm.xlu1 (!%p455_p2), %2550, %v634_v18   ;;  %v620_v22 = vld [vmem:[%s3302_s11 + $0x18] sm:$0xff] (!%p455_p2)  ;;  %v2725_v24 = vld [vmem:[%s3300_s9 + $0x20] sm:$0xff] (!%p455_p2)  ;;  %v638_v25 = vld [vmem:[%s3302_s11 + $0xa8] sm:$0xff] (!%p455_p2) }
   0x9   : > { %v2720_v23 = vld [vmem:[%s3300_s9 + $0x18] sm:$0xff] (!%p455_p2)  ;;  %v635_v26 = vld [vmem:[%s3302_s11 + $0x90] sm:$0xff] (!%p455_p2)  ;;  %v2736_v27 = vld [vmem:[%s3300_s9 + $0x28] sm:$0xff] (!%p455_p2) }
   0xa   : > { %v577_v28 = vld [vmem:[%s3299_s8 + $0x8] sm:$0xff] (!%p455_p2)  ;;  %v579_v29 = vld [vmem:[%s3299_s8 + $0x18] sm:$0xff] (!%p455_p2)  ;;  %v576_v30 = vld [vmem:[%s3299_s8] sm:$0xff] (!%p455_p2) }
   0xb   : > { %v2756_v31 = vld [vmem:[%s3300_s9 + $0x30] sm:$0xff] (!%p455_p2)  ;;  %v2419_v32 = vpack.c.bf16 (!%p455_p2), %v579_v29, %v577_v28  ;;  %v581_v34 = vld [vmem:[%s3299_s8 + $0x28] sm:$0xff] (!%p455_p2)  ;;  %v583_v36 = vld [vmem:[%s3299_s8 + $0x38] sm:$0xff] (!%p455_p2) }
   0xc   : > { %760 = vperm.xlu1 (!%p455_p2), %2550, %v617_v21   ;;  %v578_v33 = vld [vmem:[%s3299_s8 + $0x10] sm:$0xff] (!%p455_p2)  ;;  %v580_v37 = vld [vmem:[%s3299_s8 + $0x20] sm:$0xff] (!%p455_p2)  ;;  %v2423_v40 = vpack.c.bf16 (!%p455_p2), %v583_v36, %v581_v34  ;;  %v622_v47 = vld [vmem:[%s3302_s11 + $0x28] sm:$0xff] (!%p455_p2) }
   0xd   : > { %s3306_s26 = smov (!%p532_p3, %s2019_s26), 1  ;;  %v2421_v35 = vpack.c.bf16 %v578_v33, %v576_v30  ;;  %v582_v38 = vld [vmem:[%s3299_s8 + $0x30] sm:$0xff]  ;;  %2420 = vmatprep.subr.bf16.mxu1 %v2419_v32  ;;  %v2792_v51 = vld [vmem:[%s3300_s9 + $0x38] sm:$0xff]  ;;  %v2797_v53 = vld [vmem:[%s3300_s9 + $0x40] sm:$0xff] }
   0xe   : > { %s2028_s29 = sshll.u32 %s3306_s26, 3  ;;  %s2670_s30 = sshll.u32 %s3306_s26, 5  ;;  %v619_v39 = vld [vmem:[%s3302_s11 + $0x10] sm:$0xff]  ;;  %v2425_v43 = vpack.c.bf16 %v582_v38, %v580_v37  ;;  %v637_v54 = vld [vmem:[%s3302_s11 + $0xa0] sm:$0xff]  ;;  %v640_v57 = vld [vmem:[%s3302_s11 + $0xb8] sm:$0xff] }
   0xf   : > { %s559_s16 = scalar_lea.vmem %s3296_s5, %s2028_s29  ;;  %s555_s19 = scalar_lea.vmem %s3295_s4, %s2670_s30  ;;  %2422 = vmatpush1.bf16.msra.mxu1 %v2421_v35  ;;  %v2817_v58 = vld [vmem:[%s3300_s9 + $0x48] sm:$0xff]  ;;  %v2822_v59 = vld [vmem:[%s3300_s9 + $0x50] sm:$0xff]  ;;  %v621_v60 = vld [vmem:[%s3302_s11 + $0x20] sm:$0xff] }
  0x10   : > { %v650_v2 = vld [vmem:[%s559_s16] sm:$0x3f]  ;;  %s565_s22 = scalar_lea.vmem %s3298_s7, %s3306_s26  ;;  %v1240_v4 = vld [vmem:[%s555_s19 + $0x8] sm:$0xff]  ;;  %v1241_v6 = vld [vmem:[%s555_s19 + $0x10] sm:$0xff]  ;;  %s550_s18 = scalar_lea.vmem %s3294_s3, %s2670_s30  ;;  %850 = vperm.xlu1 %2550, %v635_v26   ;;  %2424 = vmatprep.subr.bf16.mxu1 %v2423_v40 }
  0x11   : > { %v1239_v3 = vld [vmem:[%s555_s19] sm:$0xff]  ;;  %653 = vperm.xlu0 %2549, %v650_v2   ;;  %v1242_v7 = vld [vmem:[%s555_s19 + $0x18] sm:$0xff]  ;;  %s562_s14 = scalar_lea.vmem %s3297_s6, %s3306_s26  ;;  %v744_v42 = vld [vmem:[%s550_s18 + $0x8] sm:$0xff]  ;;  %s545_s17 = scalar_lea.vmem %s3293_s2, %s2028_s29 }
  0x12   : > { %v2072_v5 = vld [vmem:[%s565_s22] ss:$0 sm:$0xff]  ;;  %v745_v45 = vld [vmem:[%s550_s18 + $0x10] sm:$0xff]  ;;  %v746_v46 = vld [vmem:[%s550_s18 + $0x18] sm:$0xff]  ;;  %s3211_s20 = scalar_lea.vmem %s3291_s0, %s2670_s30  ;;  %s541_s27 = scalar_lea.vmem %s3292_s1, %s2670_s30 }
  0x13   : > { %v1250_v9 = vmul.f32 %v2072_v5, %v1239_v3  ;;  %v1251_v10 = vmul.f32 %v2072_v5, %v1240_v4  ;;  %v1252_v11 = vmul.f32 %v2072_v5, %v1241_v6  ;;  %v1253_v12 = vmul.f32 %v2072_v5, %v1242_v7  ;;  %v743_v41 = vld [vmem:[%s550_s18] sm:$0xff]  ;;  %2426 = vmatpush1.bf16.msra.mxu1 %v2425_v43  ;;  %v624_v61 = vld [vmem:[%s3302_s11 + $0x38] sm:$0xff]  ;;  %v639_v1 = vld [vmem:[%s3302_s11 + $0xb0] sm:$0xff]  ;;  %s2114_s30 = sshll.u32 %s3306_s26, 4 }
  0x14   : > { %v2039_v44 = vld [vmem:[%s562_s14] ss:$0 sm:$0xff]  ;;  %770 = vperm.xlu1 %2550, %v619_v39   ;;  %v2837_v62 = vld [vmem:[%s3300_s9 + $0x58] sm:$0xff]  ;;  %v642_v2 = vld [vmem:[%s3302_s11 + $0xc8] sm:$0xff]  ;;  %s570_s18 = scalar_lea.vmem %s3303_s12, %s2114_s30 }
  0x15   : > { %v2435_v14 = vpack.c.bf16 %v1251_v10, %v1250_v9  ;;  %v2439_v15 = vpack.c.bf16 %v1253_v12, %v1252_v11  ;;  %840 = vperm.xlu0 %2549, %v633_v8   ;;  %v754_v48 = vmul.f32 %v2039_v44, %v743_v41  ;;  %v755_v49 = vmul.f32 %v2039_v44, %v744_v42  ;;  %v2842_v63 = vld [vmem:[%s3300_s9 + $0x60] sm:$0xff]  ;;  %v2857_v3 = vld [vmem:[%s3300_s9 + $0x68] sm:$0xff]  ;;  %v2862_v4 = vld [vmem:[%s3300_s9 + $0x70] sm:$0xff] }
  0x16   : > { %v756_v50 = vmul.f32 %v2039_v44, %v745_v45  ;;  %v757_v52 = vmul.f32 %v2039_v44, %v746_v46  ;;  %v623_v5 = vld [vmem:[%s3302_s11 + $0x30] sm:$0xff]  ;;  %v626_v6 = vld [vmem:[%s3302_s11 + $0x48] sm:$0xff]  ;;  %v2877_v7 = vld [vmem:[%s3300_s9 + $0x78] sm:$0xff] }
  0x17   : > { %2436 = vmatprep.subr.bf16.mxu0 %v2435_v14  ;;  %v2802_v55 = vpack.c.bf16 %v755_v49, %v754_v48  ;;  %v2882_v8 = vld [vmem:[%s3300_s9 + $0x80] sm:$0xff]  ;;  %v644_v10 = vld [vmem:[%s3302_s11 + $0xd8] sm:$0xff]  ;;  %v2897_v11 = vld [vmem:[%s3300_s9 + $0x88] sm:$0xff] }
  0x18   : > { %2438 = vmatpush3.bf16.msra.mxu0 %v2435_v14  ;;  %v2804_v56 = vpack.c.bf16 %v757_v52, %v756_v50  ;;  %860 = vperm.xlu1 %2550, %v637_v54   ;;  %v641_v9 = vld [vmem:[%s3302_s11 + $0xc0] sm:$0xff]  ;;  %v2902_v12 = vld [vmem:[%s3300_s9 + $0x90] sm:$0xff]  ;;  %v628_v14 = vld [vmem:[%s3302_s11 + $0x58] sm:$0xff] }
  0x19   : > { %2440 = vmatprep.subr.bf16.mxu0 %v2439_v15  ;;  %765 = vperm.xlu0 %2549, %v618_v16   ;;  %v625_v13 = vld [vmem:[%s3302_s11 + $0x40] sm:$0xff]  ;;  %v646_v18 = vld [vmem:[%s3302_s11 + $0xe8] sm:$0xff]  ;;  %v2957_v28 = vld [vmem:[%s3300_s9 + $0xb8] sm:$0xff] }
  0x1a   : > { %2428 = vmatprep.subr.bf16.mxu1 %v2802_v55  ;;  %v2922_v16 = vld [vmem:[%s3300_s9 + $0xa0] sm:$0xff]  ;;  %v2937_v21 = vld [vmem:[%s3300_s9 + $0xa8] sm:$0xff]  ;;  %v648_v32 = vld [vmem:[%s3302_s11 + $0xf8] sm:$0xff] }
  0x1b   : > { %v630_v26 = vld [vmem:[%s3302_s11 + $0x68] sm:$0xff]  ;;  %v2962_v29 = vld [vmem:[%s3300_s9 + $0xc0] sm:$0xff]  ;;  %v2982_v34 = vld [vmem:[%s3300_s9 + $0xd0] sm:$0xff] }
  0x1c   : > { %2442 = vmatpush3.bf16.msra.mxu0 %v2439_v15  ;;  %780 = vperm.xlu1 %2550, %v621_v60   ;;  %v2917_v15 = vld [vmem:[%s3300_s9 + $0x98] sm:$0xff]  ;;  %v645_v30 = vld [vmem:[%s3302_s11 + $0xe0] sm:$0xff]  ;;  %v2977_v33 = vld [vmem:[%s3300_s9 + $0xc8] sm:$0xff] }
  0x1d   : > { %855 = vperm.xlu0 %2549, %v636_v17   ;;  %v643_v17 = vld [vmem:[%s3302_s11 + $0xd0] sm:$0xff]  ;;  %v629_v35 = vld [vmem:[%s3302_s11 + $0x60] sm:$0xff]  ;;  %v632_v36 = vld [vmem:[%s3302_s11 + $0x78] sm:$0xff] }
  0x1e   : > { %v611_v37 = vld [vmem:[%s3300_s9 + $0xd8] sm:$0xff]  ;;  %v612_v38 = vld [vmem:[%s3300_s9 + $0xe0] sm:$0xff]  ;;  %v647_v39 = vld [vmem:[%s3302_s11 + $0xf0] sm:$0xff] }
  0x1f   : > { %2367 = vmatmul.mubr.msk.f32.vlgmr.msra.gmra.mrb[0].mxu0 %vm668_vm0, %v2700_v19  ;;  %v613_v40 = vld [vmem:[%s3300_s9 + $0xe8] sm:$0xff]  ;;  %v614_v41 = vld [vmem:[%s3300_s9 + $0xf0] sm:$0xff]  ;;  %v615_v43 = vld [vmem:[%s3300_s9 + $0xf8] sm:$0xff] }
  0x20   : > { %2369 = vmatprep.mubr.msk.f32.mxu0 %vm668_vm0, %v2705_v20  ;;  %870 = vperm.xlu1 %2550, %v639_v1   ;;  %v631_v42 = vld [vmem:[%s3302_s11 + $0x70] sm:$0xff]  ;;  %v649_v44 = vld [vmem:[%s545_s17] sm:$0x3f]  ;;  %s575_s17 = scalar_lea.vmem %s3304_s13, %s2114_s30 }
  0x21   : > { %775 = vperm.xlu0 %2549, %v620_v22   ;;  %v2942_v22 = vld [vmem:[%s3300_s9 + $0xb0] sm:$0xff] }
  0x23   : > { %2370 = vmatmul.mubr.msk.f32.gmra.mrb[2].mxu0 %vm668_vm0, %v2720_v23 }
  0x24   : > { %2372 = vmatprep.mubr.msk.f32.mxu0 %vm668_vm0, %v2725_v24  ;;  %790 = vperm.xlu1 %2550, %v623_v5  }
  0x25   : > { %865 = vperm.xlu0 %2549, %v638_v25   ;;  %v627_v25 = vld [vmem:[%s3302_s11 + $0x50] sm:$0xff] }
  0x27   : > { %2373 = vmatmul.mubr.msk.f32.gmra.mrb[4].mxu0 %vm668_vm0, %v2736_v27 }
  0x28   : > { %2375 = vmatprep.mubr.msk.f32.mxu0 %vm668_vm0, %v2756_v31  ;;  %880 = vperm.xlu1 %2550, %v641_v9  }
  0x29   : > { %785 = vperm.xlu0 %2549, %v622_v47  }
  0x2b   : > { %2376 = vmatmul.mubr.msk.f32.gmra.mrb[6].mxu0 %vm668_vm0, %v2792_v51 }
  0x2c   : > { %2378 = vmatprep.mubr.msk.f32.mxu0 %vm668_vm0, %v2797_v53  ;;  %800 = vperm.xlu1 %2550, %v625_v13  }
  0x2d   : > { %875 = vperm.xlu0 %2549, %v640_v57  }
  0x2f   : > { %2379 = vmatmul.mubr.msk.f32.gmra.mrb[8].mxu0 %vm668_vm0, %v2817_v58 }
  0x30   : > { %2381 = vmatprep.mubr.msk.f32.mxu0 %vm668_vm0, %v2822_v59  ;;  %890 = vperm.xlu1 %2550, %v643_v17  }
  0x31   : > { %795 = vperm.xlu0 %2549, %v624_v61  }
  0x33   : > { %2382 = vmatmul.mubr.msk.f32.gmra.mrb[10].mxu0 %vm668_vm0, %v2837_v62 }
  0x34   : > { %2384 = vmatprep.mubr.msk.f32.mxu0 %vm668_vm0, %v2842_v63  ;;  %810 = vperm.xlu1 %2550, %v627_v25  }
  0x35   : > { %885 = vperm.xlu0 %2549, %v642_v2  }
  0x37   : > { %2385 = vmatmul.mubr.msk.f32.gmra.mrb[12].mxu0 %vm668_vm0, %v2857_v3 }
  0x38   : > { %2387 = vmatprep.mubr.msk.f32.mxu0 %vm668_vm0, %v2862_v4  ;;  %900 = vperm.xlu1 %2550, %v645_v30  }
  0x39   : > { %805 = vperm.xlu0 %2549, %v626_v6  }
  0x3b   : > { %2388 = vmatmul.mubr.msk.f32.gmra.mrb[14].mxu0 %vm668_vm0, %v2877_v7 }
  0x3c   : > { %2390 = vmatprep.mubr.msk.f32.mxu0 %vm668_vm0, %v2882_v8  ;;  %820 = vperm.xlu1 %2550, %v629_v35  }
  0x3d   : > { %895 = vperm.xlu0 %2549, %v644_v10  }
  0x3f   : > { %2391 = vmatmul.mubr.msk.f32.gmra.mrb[16].mxu0 %vm668_vm0, %v2897_v11 }
  0x40   : > { %2393 = vmatprep.mubr.msk.f32.mxu0 %vm668_vm0, %v2902_v12  ;;  %910 = vperm.xlu1 %2550, %v647_v39  }
  0x41   : > { %815 = vperm.xlu0 %2549, %v628_v14  }
  0x43   : > { %2394 = vmatmul.mubr.msk.f32.gmra.mrb[18].mxu0 %vm668_vm0, %v2917_v15 }
  0x44   : > { %2396 = vmatprep.mubr.msk.f32.mxu0 %vm668_vm0, %v2922_v16  ;;  %830 = vperm.xlu1 %2550, %v631_v42  }
  0x45   : > { %905 = vperm.xlu0 %2549, %v646_v18  }
  0x47   : > { %2397 = vmatmul.mubr.msk.f32.gmra.mrb[20].mxu0 %vm668_vm0, %v2937_v21 }
  0x48   : > { %2399 = vmatprep.mubr.msk.f32.mxu0 %vm668_vm0, %v2942_v22 }
  0x49   : > { %825 = vperm.xlu0 %2549, %v630_v26  }
  0x4b   : > { %2400 = vmatmul.mubr.msk.f32.gmra.mrb[22].mxu0 %vm668_vm0, %v2957_v28 }
  0x4c   : > { %2402 = vmatprep.mubr.msk.f32.mxu0 %vm668_vm0, %v2962_v29 }
  0x4d   : > { %915 = vperm.xlu0 %2549, %v648_v32  }
  0x4f   : > { %2403 = vmatmul.mubr.msk.f32.gmra.mrb[24].mxu0 %vm668_vm0, %v2977_v33 }
  0x50   : > { %2405 = vmatprep.mubr.msk.f32.mxu0 %vm668_vm0, %v2982_v34 }
  0x51   : > { %835 = vperm.xlu0 %2549, %v632_v36  }
  0x53   : > { %2406 = vmatmul.mubr.msk.f32.gmra.mrb[26].mxu0 %vm668_vm0, %v611_v37 }
  0x54   : > { %2408 = vmatprep.mubr.msk.f32.mxu0 %vm668_vm0, %v612_v38 }
  0x57   : > { %2409 = vmatmul.mubr.msk.f32.gmra.mrb[28].mxu0 %vm668_vm0, %v613_v40 }
  0x58   : > { %2411 = vmatprep.mubr.msk.f32.mxu0 %vm668_vm0, %v614_v41 }
  0x5b   : > { %2412 = vmatmul.mubr.msk.f32.gmra.mrb[30].mxu0 %vm668_vm0, %v615_v43 }
  0x90   : > { %v654_v45 = vpop.permute.xlu0 %653 }
  0x91   : > { %v656_v46 = vmul.f32 %v654_v45, %v649_v44 }
  0x93   : > { %2038 = vmatmul.mubr.msk.f32.vlgmr.msra.gmra.mrb[0].mxu1 %vm668_vm0, %v656_v46 }
  0x94   : > { %2430 = vmatpush3.bf16.msra.mxu1 %v2802_v55  ;;  %2310 = vmatprep.mubr.msk.f32.mxu1 %vm668_vm0, %v2662_v0  ;;  %v3055_v0 = vpop.permute.xlu1 %845 }
  0x95   : > { %2432 = vmatprep.subr.bf16.mxu1 %v2804_v56 }
  0x98   : > { %2434 = vmatpush3.bf16.msra.mxu1 %v2804_v56 }
  0x9b   : > { %2311 = vmatmul.mubr.msk.f32.vlgmr.msra.gmra.mrb[2].mxu1 %vm668_vm0, %v2700_v19  ;;  %v3057_v19 = vpop.permute.xlu0 %840 }
  0x9c   : > { %2313 = vmatprep.mubr.msk.f32.mxu1 %vm668_vm0, %v2705_v20  ;;  %v3067_v20 = vpop.permute.xlu1 %760 }
  0x9f   : > { %2314 = vmatmul.mubr.msk.f32.gmra.mrb[4].mxu1 %vm668_vm0, %v2720_v23  ;;  %v3069_v23 = vpop.permute.xlu0 %765 }
  0xa0   : > { %2316 = vmatprep.mubr.msk.f32.mxu1 %vm668_vm0, %v2725_v24  ;;  %v3075_v24 = vpop.permute.xlu1 %850 }
  0xa3   : > { %2317 = vmatmul.mubr.msk.f32.gmra.mrb[6].mxu1 %vm668_vm0, %v2736_v27  ;;  %v3077_v27 = vpop.permute.xlu0 %855 }
  0xa4   : > { %2319 = vmatprep.mubr.msk.f32.mxu1 %vm668_vm0, %v2756_v31  ;;  %v3087_v31 = vpop.permute.xlu1 %770 }
  0xa7   : > { %2320 = vmatmul.mubr.msk.f32.gmra.mrb[8].mxu1 %vm668_vm0, %v2792_v51  ;;  %v3089_v47 = vpop.permute.xlu0 %775 }
  0xa8   : > { %2322 = vmatprep.mubr.msk.f32.mxu1 %vm668_vm0, %v2797_v53  ;;  %v3095_v48 = vpop.permute.xlu1 %860 }
  0xab   : > { %2323 = vmatmul.mubr.msk.f32.gmra.mrb[10].mxu1 %vm668_vm0, %v2817_v58  ;;  %v3097_v49 = vpop.permute.xlu0 %865 }
  0xac   : > { %2325 = vmatprep.mubr.msk.f32.mxu1 %vm668_vm0, %v2822_v59  ;;  %v3105_v50 = vpop.permute.xlu1 %780 }
  0xaf   : > { %2326 = vmatmul.mubr.msk.f32.gmra.mrb[12].mxu1 %vm668_vm0, %v2837_v62  ;;  %v3107_v51 = vpop.permute.xlu0 %785 }
  0xb0   : > { %2328 = vmatprep.mubr.msk.f32.mxu1 %vm668_vm0, %v2842_v63  ;;  %v3111_v52 = vpop.permute.xlu1 %870 }
  0xb3   : > { %2329 = vmatmul.mubr.msk.f32.gmra.mrb[14].mxu1 %vm668_vm0, %v2857_v3  ;;  %v3113_v53 = vpop.permute.xlu0 %875 }
  0xb4   : > { %2331 = vmatprep.mubr.msk.f32.mxu1 %vm668_vm0, %v2862_v4  ;;  %v3116_v54 = vpop.permute.xlu1 %790 }
  0xb7   : > { %2332 = vmatmul.mubr.msk.f32.gmra.mrb[16].mxu1 %vm668_vm0, %v2877_v7  ;;  %v3118_v55 = vpop.permute.xlu0 %795 }
  0xb8   : > { %2334 = vmatprep.mubr.msk.f32.mxu1 %vm668_vm0, %v2882_v8  ;;  %v3120_v56 = vpop.permute.xlu1 %880 }
  0xbb   : > { %2335 = vmatmul.mubr.msk.f32.gmra.mrb[18].mxu1 %vm668_vm0, %v2897_v11  ;;  %v3122_v57 = vpop.permute.xlu0 %885 }
  0xbc   : > { %2337 = vmatprep.mubr.msk.f32.mxu1 %vm668_vm0, %v2902_v12  ;;  %v3124_v58 = vpop.permute.xlu1 %800 }
  0xbf   : > { %2338 = vmatmul.mubr.msk.f32.gmra.mrb[20].mxu1 %vm668_vm0, %v2917_v15  ;;  %v3126_v59 = vpop.permute.xlu0 %805 }
  0xc0   : > { %2340 = vmatprep.mubr.msk.f32.mxu1 %vm668_vm0, %v2922_v16  ;;  %v3128_v60 = vpop.permute.xlu1 %890 }
  0xc3   : > { %2341 = vmatmul.mubr.msk.f32.gmra.mrb[22].mxu1 %vm668_vm0, %v2937_v21  ;;  %v3130_v61 = vpop.permute.xlu0 %895 }
  0xc4   : > { %2343 = vmatprep.mubr.msk.f32.mxu1 %vm668_vm0, %v2942_v22  ;;  %v3134_v3 = vpop.permute.xlu1 %810 }
  0xc7   : > { %2344 = vmatmul.mubr.msk.f32.gmra.mrb[24].mxu1 %vm668_vm0, %v2957_v28  ;;  %v3136_v4 = vpop.permute.xlu0 %815 }
  0xc8   : > { %2346 = vmatprep.mubr.msk.f32.mxu1 %vm668_vm0, %v2962_v29  ;;  %v3145_v14 = vpop.permute.xlu1 %900 }
  0xcb   : > { %2347 = vmatmul.mubr.msk.f32.gmra.mrb[26].mxu1 %vm668_vm0, %v2977_v33  ;;  %v3147_v15 = vpop.permute.xlu0 %905 }
  0xcc   : > { %2349 = vmatprep.mubr.msk.f32.mxu1 %vm668_vm0, %v2982_v34  ;;  %v3154_v26 = vpop.permute.xlu1 %820 }
  0xcf   : > { %2350 = vmatmul.mubr.msk.f32.gmra.mrb[28].mxu1 %vm668_vm0, %v611_v37  ;;  %v3156_v28 = vpop.permute.xlu0 %825 }
  0xd0   : > { %2352 = vmatprep.mubr.msk.f32.mxu1 %vm668_vm0, %v612_v38  ;;  %v3165_v39 = vpop.permute.xlu1 %910 }
  0xd3   : > { %2353 = vmatmul.mubr.msk.f32.gmra.mrb[30].mxu1 %vm668_vm0, %v613_v40  ;;  %v3167_v40 = vpop.permute.xlu0 %915 }
  0xd4   : > { %2355 = vmatprep.mubr.msk.f32.mxu1 %vm668_vm0, %v614_v41 }
  0xd7   : > { %2356 = vmatmul.mubr.msk.f32.gmra.mrb[32].mxu1 %vm668_vm0, %v615_v43 }
  0xf2   : > { %v2368_v62 = vpop.f32.mrb[0].mxu0 }
  0xf3   : > { %v1326_v63 = vadd.f32 %v2368_v62, %v3069_v23  ;;  %v1320_v1 = vpop.f32.mrb[1].mxu0  ;;  %v3174_v62 = vpop.permute.xlu1 %830 }
  0xf4   : > { %v1321_v2 = vadd.f32 %v1320_v1, %v3067_v20 }
  0xf6   : > { %v3138_v5 = vpack.c.bf16 %v1326_v63, %v1321_v2  ;;  %v2371_v6 = vpop.f32.mrb[2].mxu0  ;;  %v3176_v63 = vpop.permute.xlu0 %835 }
  0xf7   : > { %v1336_v7 = vadd.f32 %v2371_v6, %v3089_v47  ;;  %v1330_v8 = vpop.f32.mrb[3].mxu0 }
  0xf8   : > { %v1331_v9 = vadd.f32 %v1330_v8, %v3087_v31 }
  0xfa   : > { %v3142_v10 = vpack.c.bf16 %v1336_v7, %v1331_v9  ;;  %v2374_v11 = vpop.f32.mrb[4].mxu0 }
  0xfb   : > { %v1346_v12 = vadd.f32 %v2374_v11, %v3107_v51  ;;  %v1340_v13 = vpop.f32.mrb[5].mxu0 }
  0xfc   : > { %v1341_v16 = vadd.f32 %v1340_v13, %v3105_v50 }
  0xfe   : > { %v3150_v17 = vpack.c.bf16 %v1346_v12, %v1341_v16  ;;  %v2377_v18 = vpop.f32.mrb[6].mxu0 }
  0xff   : > { %v1356_v21 = vadd.f32 %v2377_v18, %v3118_v55  ;;  %v1350_v22 = vpop.f32.mrb[7].mxu0 }
 0x100   : > { %v1351_v25 = vadd.f32 %v1350_v22, %v3116_v54 }
 0x102   : > { %v3158_v29 = vpack.c.bf16 %v1356_v21, %v1351_v25  ;;  %v2380_v30 = vpop.f32.mrb[8].mxu0 }
 0x103   : > { %v1366_v32 = vadd.f32 %v2380_v30, %v3126_v59  ;;  %v1360_v33 = vpop.f32.mrb[9].mxu0 }
 0x104   : > { %v1361_v34 = vadd.f32 %v1360_v33, %v3124_v58 }
 0x106   : > { %v3162_v35 = vpack.c.bf16 %v1366_v32, %v1361_v34  ;;  %v2383_v36 = vpop.f32.mrb[10].mxu0 }
 0x107   : > { %v1376_v37 = vadd.f32 %v2383_v36, %v3136_v4  ;;  %v1370_v38 = vpop.f32.mrb[11].mxu0 }
 0x108   : > { %v1371_v41 = vadd.f32 %v1370_v38, %v3134_v3 }
 0x10a   : > { %v3170_v42 = vpack.c.bf16 %v1376_v37, %v1371_v41  ;;  %v2386_v43 = vpop.f32.mrb[12].mxu0 }
 0x10b   : > { %v1386_v44 = vadd.f32 %v2386_v43, %v3156_v28  ;;  %v1380_v45 = vpop.f32.mrb[13].mxu0 }
 0x10c   : > { %v1381_v46 = vadd.f32 %v1380_v45, %v3154_v26 }
 0x10e   : > { %v3178_v1 = vpack.c.bf16 %v1386_v44, %v1381_v46  ;;  %v2389_v2 = vpop.f32.mrb[14].mxu0 }
 0x10f   : > { %v1396_v6 = vadd.f32 %v2389_v2, %v3176_v63  ;;  %v1390_v7 = vpop.f32.mrb[15].mxu0 }
 0x110   : > { %v1391_v8 = vadd.f32 %v1390_v7, %v3174_v62 }
 0x112   : > { %v3182_v9 = vpack.c.bf16 %v1396_v6, %v1391_v8  ;;  %v2392_v11 = vpop.f32.mrb[16].mxu0 }
 0x113   : > { %v1406_v12 = vadd.f32 %v2392_v11, %v3055_v0  ;;  %v1400_v13 = vpop.f32.mrb[17].mxu0 }
 0x114   : > { %v1401_v16 = vadd.f32 %v1400_v13, %v3057_v19 }
 0x116   : > { %v2475_v18 = vpack.c.bf16 %v1406_v12, %v1401_v16  ;;  %v2395_v21 = vpop.f32.mrb[18].mxu0 }
 0x117   : > { %v1416_v22 = vadd.f32 %v2395_v21, %v3077_v27  ;;  %v1410_v25 = vpop.f32.mrb[19].mxu0 }
 0x118   : > { %v1411_v30 = vadd.f32 %v1410_v25, %v3075_v24  ;;  %2476 = vmatprep.subr.bf16.mxu0 %v2475_v18 }
 0x119   : > { %2478 = vmatpush3.bf16.msra.mxu0 %v3138_v5 }
 0x11a   : > { %v2479_v32 = vpack.c.bf16 %v1416_v22, %v1411_v30  ;;  %v2398_v33 = vpop.f32.mrb[20].mxu0 }
 0x11b   : > { %v1426_v34 = vadd.f32 %v2398_v33, %v3097_v49  ;;  %v1420_v36 = vpop.f32.mrb[21].mxu0 }
 0x11c   : > { %v1421_v37 = vadd.f32 %v1420_v36, %v3095_v48  ;;  %2480 = vmatprep.subr.bf16.mxu0 %v2479_v32 }
 0x11d   : > { %2482 = vmatpush3.bf16.msra.mxu0 %v3142_v10 }
 0x11e   : > { %v2483_v38 = vpack.c.bf16 %v1426_v34, %v1421_v37  ;;  %v2401_v41 = vpop.f32.mrb[22].mxu0 }
 0x11f   : > { %v1436_v43 = vadd.f32 %v2401_v41, %v3113_v53  ;;  %v1430_v44 = vpop.f32.mrb[23].mxu0 }
 0x120   : > { %v1431_v45 = vadd.f32 %v1430_v44, %v3111_v52  ;;  %2484 = vmatprep.subr.bf16.mxu0 %v2483_v38 }
 0x121   : > { %2486 = vmatpush3.bf16.msra.mxu0 %v3150_v17 }
 0x122   : > { %v2487_v46 = vpack.c.bf16 %v1436_v43, %v1431_v45  ;;  %v2404_v2 = vpop.f32.mrb[24].mxu0 }
 0x123   : > { %v1446_v6 = vadd.f32 %v2404_v2, %v3122_v57  ;;  %v1440_v7 = vpop.f32.mrb[25].mxu0  ;;  %v1480_v2 = vld [vmem:[%s3211_s20 + $0x8] sm:$0xff] }
 0x124   : > { %v1441_v8 = vadd.f32 %v1440_v7, %v3120_v56  ;;  %2488 = vmatprep.subr.bf16.mxu0 %v2487_v46  ;;  %1547 = vmatprep.mubr.f32.mxu1 %v1480_v2 }
 0x125   : > { %2490 = vmatpush3.bf16.msra.mxu0 %v3158_v29 }
 0x126   : > { %v2491_v11 = vpack.c.bf16 %v1446_v6, %v1441_v8  ;;  %v2407_v12 = vpop.f32.mrb[26].mxu0  ;;  %v658_v6 = vlaneseq }
 0x127   : > { %v1456_v13 = vadd.f32 %v2407_v12, %v3130_v61  ;;  %v1450_v16 = vpop.f32.mrb[27].mxu0  ;;  %v616_v12 = vld [vmem:[%s3301_s10] sm:$0x3] }
 0x128   : > { %v1451_v21 = vadd.f32 %v1450_v16, %v3128_v60  ;;  %2492 = vmatprep.subr.bf16.mxu0 %v2491_v11  ;;  %v659_v7 = vshrl.u32 %v658_v6, 7 }
 0x129   : > { %2494 = vmatpush3.bf16.msra.mxu0 %v3162_v35 }
 0x12a   : > { %v2495_v22 = vpack.c.bf16 %v1456_v13, %v1451_v21  ;;  %v2410_v25 = vpop.f32.mrb[28].mxu0  ;;  %v664_v8 = vsub.s32 1, %v659_v7  ;;  %v660_v13 = vsub.s32 0, %v659_v7 }
 0x12b   : > { %v1466_v30 = vadd.f32 %v2410_v25, %v3147_v15  ;;  %v1460_v33 = vpop.f32.mrb[29].mxu0 }
 0x12c   : > { %v1461_v34 = vadd.f32 %v1460_v33, %v3145_v14  ;;  %2496 = vmatprep.subr.bf16.mxu0 %v2495_v22  ;;  %v665_v16 = vrot.slane %v616_v12, %v664_v8  ;;  %v661_v21 = vrot.slane %v616_v12, %v660_v13 }
 0x12d   : > { %2498 = vmatpush3.bf16.msra.mxu0 %v3170_v42 }
 0x12e   : > { %v2499_v36 = vpack.c.bf16 %v1466_v30, %v1461_v34  ;;  %v2413_v37 = vpop.f32.mrb[30].mxu0 }
 0x12f   : > { %v1476_v41 = vadd.f32 %v2413_v37, %v3167_v40  ;;  %v1470_v43 = vpop.f32.mrb[31].mxu0 }
 0x130   : > { %v1471_v44 = vadd.f32 %v1470_v43, %v3165_v39  ;;  %2500 = vmatprep.subr.bf16.mxu0 %v2499_v36 }
 0x131   : > { %2502 = vmatpush3.bf16.msra.mxu0 %v3178_v1 }
 0x132   : > { %v2503_v45 = vpack.c.bf16 %v1476_v41, %v1471_v44 }
 0x134   : > { %2504 = vmatprep.subr.bf16.mxu0 %v2503_v45 }
 0x135   : > { %2506 = vmatpush3.bf16.msra.mxu0 %v3182_v9 }
 0x136   : > { %2508 = vmatprep.subr.bf16.mxu0 %v2475_v18 }
 0x166   : > { %v738_v25 = vpop.f32.mrb[0].mxu1 }
 0x167   : > { %v740_v30 = vpop.f32.mrb[1].mxu1  ;;  %v739_v34 = vadd.f32 %v738_v25, %v661_v21 }
 0x168   : > { %v741_v33 = vadd.f32 %v740_v30, %v665_v16 }
 0x16a   : > { %1645 = vmatprep.mubr.f32.mxu0 %v741_v33 }
 0x16b   : > { %1646 = vmatmul.mubr.f32.vlgmr.msra.gmra.mrb[32].mxu0 %v739_v34 }
 0x16c   : > { %2510 = vmatpush3.bf16.msra.mxu0 %v3138_v5 }
 0x16d   : > { %2512 = vmatprep.subr.bf16.mxu0 %v2479_v32 }
 0x16e   : > { %v2312_v18 = vpop.f32.mrb[2].mxu1 }
 0x16f   : > { %v1086_v37 = vadd.f32 %v2312_v18, %v3069_v23  ;;  %v1080_v41 = vpop.f32.mrb[3].mxu1 }
 0x170   : > { %v1081_v43 = vadd.f32 %v1080_v41, %v3067_v20  ;;  %2514 = vmatpush3.bf16.msra.mxu0 %v3142_v10 }
 0x171   : > { %2516 = vmatprep.subr.bf16.mxu0 %v2483_v38 }
 0x172   : > { %v2445_v44 = vpack.c.bf16 %v1086_v37, %v1081_v43  ;;  %v2315_v2 = vpop.f32.mrb[4].mxu1 }
 0x173   : > { %v1096_v6 = vadd.f32 %v2315_v2, %v3089_v47  ;;  %v1090_v7 = vpop.f32.mrb[5].mxu1 }
 0x174   : > { %v1091_v8 = vadd.f32 %v1090_v7, %v3087_v31  ;;  %2518 = vmatpush3.bf16.msra.mxu0 %v3150_v17 }
 0x175   : > { %2520 = vmatprep.subr.bf16.mxu0 %v2487_v46 }
 0x176   : > { %v2449_v5 = vpack.c.bf16 %v1096_v6, %v1091_v8  ;;  %v2318_v32 = vpop.f32.mrb[6].mxu1 }
 0x177   : > { %v1106_v23 = vadd.f32 %v2318_v32, %v3107_v51  ;;  %v1100_v12 = vpop.f32.mrb[7].mxu1 }
 0x178   : > { %v1101_v20 = vadd.f32 %v1100_v12, %v3105_v50  ;;  %2522 = vmatpush3.bf16.msra.mxu0 %v3158_v29 }
 0x179   : > { %2524 = vmatprep.subr.bf16.mxu0 %v2491_v11 }
 0x17a   : > { %v2453_v10 = vpack.c.bf16 %v1106_v23, %v1101_v20  ;;  %v2321_v38 = vpop.f32.mrb[8].mxu1 }
 0x17b   : > { %v1116_v47 = vadd.f32 %v2321_v38, %v3118_v55  ;;  %v1110_v13 = vpop.f32.mrb[9].mxu1 }
 0x17c   : > { %v1111_v31 = vadd.f32 %v1110_v13, %v3116_v54  ;;  %2526 = vmatpush3.bf16.msra.mxu0 %v3162_v35 }
 0x17d   : > { %2528 = vmatprep.subr.bf16.mxu0 %v2495_v22 }
 0x17e   : > { %v2457_v17 = vpack.c.bf16 %v1116_v47, %v1111_v31  ;;  %v2324_v46 = vpop.f32.mrb[10].mxu1 }
 0x17f   : > { %v1126_v51 = vadd.f32 %v2324_v46, %v3126_v59  ;;  %v1120_v16 = vpop.f32.mrb[11].mxu1  ;;  %v1482_v46 = vld [vmem:[%s3211_s20 + $0x18] sm:$0xff] }
 0x180   : > { %v1121_v50 = vadd.f32 %v1120_v16, %v3124_v58  ;;  %2530 = vmatpush3.bf16.msra.mxu0 %v3170_v42  ;;  %v1753_v16 = vld [vmem:[%s541_s27 + $0x18] sm:$0xff] }
 0x181   : > { %2532 = vmatprep.subr.bf16.mxu0 %v2499_v36 }
 0x182   : > { %v2461_v29 = vpack.c.bf16 %v1126_v51, %v1121_v50  ;;  %v2327_v11 = vpop.f32.mrb[12].mxu1  ;;  %v1751_v51 = vld [vmem:[%s541_s27 + $0x8] sm:$0xff] }
 0x183   : > { %v1136_v55 = vadd.f32 %v2327_v11, %v3136_v4  ;;  %v1130_v21 = vpop.f32.mrb[13].mxu1  ;;  %1818 = vmatprep.mubr.f32.mxu0 %v1751_v51 }
 0x184   : > { %v1131_v54 = vadd.f32 %v1130_v21, %v3134_v3  ;;  %2534 = vmatpush3.bf16.msra.mxu0 %v3178_v1 }
 0x185   : > { %2536 = vmatprep.subr.bf16.mxu0 %v2503_v45 }
 0x186   : > { %v2465_v35 = vpack.c.bf16 %v1136_v55, %v1131_v54  ;;  %v2330_v22 = vpop.f32.mrb[14].mxu1 }
 0x187   : > { %v1146_v59 = vadd.f32 %v2330_v22, %v3156_v28  ;;  %v1140_v25 = vpop.f32.mrb[15].mxu1 }
 0x188   : > { %v1141_v58 = vadd.f32 %v1140_v25, %v3154_v26  ;;  %2538 = vmatpush3.bf16.msra.mxu0 %v3182_v9 }
 0x18a   : > { %v2469_v42 = vpack.c.bf16 %v1146_v59, %v1141_v58  ;;  %v2333_v36 = vpop.f32.mrb[16].mxu1 }
 0x18b   : > { %v1156_v30 = vadd.f32 %v2333_v36, %v3176_v63  ;;  %v1150_v4 = vpop.f32.mrb[17].mxu1 }
 0x18c   : > { %v1151_v33 = vadd.f32 %v1150_v4, %v3174_v62 }
 0x18e   : > { %v2473_v3 = vpack.c.bf16 %v1156_v30, %v1151_v33  ;;  %v2336_v34 = vpop.f32.mrb[18].mxu1 }
 0x18f   : > { %v1166_v1 = vadd.f32 %v2336_v34, %v3055_v0  ;;  %v1160_v45 = vpop.f32.mrb[19].mxu1 }
 0x190   : > { %v1161_v18 = vadd.f32 %v1160_v45, %v3057_v19 }
 0x192   : > { %v2443_v28 = vpack.c.bf16 %v1166_v1, %v1161_v18  ;;  %v2339_v37 = vpop.f32.mrb[20].mxu1 }
 0x193   : > { %v1176_v26 = vadd.f32 %v2339_v37, %v3077_v27  ;;  %v1170_v41 = vpop.f32.mrb[21].mxu1 }
 0x194   : > { %v1171_v9 = vadd.f32 %v1170_v41, %v3075_v24  ;;  %2444 = vmatprep.subr.bf16.mxu1 %v2443_v28 }
 0x195   : > { %2446 = vmatpush3.bf16.msra.mxu1 %v2445_v44 }
 0x196   : > { %v2447_v63 = vpack.c.bf16 %v1176_v26, %v1171_v9  ;;  %v2342_v43 = vpop.f32.mrb[22].mxu1 }
 0x197   : > { %v1186_v62 = vadd.f32 %v2342_v43, %v3097_v49  ;;  %v1180_v2 = vpop.f32.mrb[23].mxu1 }
 0x198   : > { %v1181_v6 = vadd.f32 %v1180_v2, %v3095_v48  ;;  %2448 = vmatprep.subr.bf16.mxu1 %v2447_v63 }
 0x199   : > { %2450 = vmatpush3.bf16.msra.mxu1 %v2449_v5 }
 0x19a   : > { %v2451_v0 = vpack.c.bf16 %v1186_v62, %v1181_v6  ;;  %v2345_v19 = vpop.f32.mrb[24].mxu1 }
 0x19b   : > { %v1196_v7 = vadd.f32 %v2345_v19, %v3113_v53  ;;  %v1190_v8 = vpop.f32.mrb[25].mxu1 }
 0x19c   : > { %v1191_v27 = vadd.f32 %v1190_v8, %v3111_v52  ;;  %2452 = vmatprep.subr.bf16.mxu1 %v2451_v0 }
 0x19d   : > { %2454 = vmatpush3.bf16.msra.mxu1 %v2453_v10 }
 0x19e   : > { %v2455_v24 = vpack.c.bf16 %v1196_v7, %v1191_v27  ;;  %v2348_v44 = vpop.f32.mrb[26].mxu1 }
 0x19f   : > { %v1206_v32 = vadd.f32 %v2348_v44, %v3122_v57  ;;  %v1200_v23 = vpop.f32.mrb[27].mxu1 }
 0x1a0   : > { %v1201_v49 = vadd.f32 %v1200_v23, %v3120_v56  ;;  %2456 = vmatprep.subr.bf16.mxu1 %v2455_v24 }
 0x1a1   : > { %2458 = vmatpush3.bf16.msra.mxu1 %v2457_v17 }
 0x1a2   : > { %v2459_v48 = vpack.c.bf16 %v1206_v32, %v1201_v49  ;;  %v2351_v5 = vpop.f32.mrb[28].mxu1 }
 0x1a3   : > { %v1216_v12 = vadd.f32 %v2351_v5, %v3130_v61  ;;  %v1210_v20 = vpop.f32.mrb[29].mxu1 }
 0x1a4   : > { %v1211_v53 = vadd.f32 %v1210_v20, %v3128_v60  ;;  %2460 = vmatprep.subr.bf16.mxu1 %v2459_v48 }
 0x1a5   : > { %2462 = vmatpush3.bf16.msra.mxu1 %v2461_v29 }
 0x1a6   : > { %v2463_v52 = vpack.c.bf16 %v1216_v12, %v1211_v53  ;;  %v2354_v10 = vpop.f32.mrb[30].mxu1 }
 0x1a7   : > { %v1226_v38 = vadd.f32 %v2354_v10, %v3147_v15  ;;  %v1220_v57 = vpop.f32.mrb[31].mxu1  ;;  %v1479_v15 = vld [vmem:[%s3211_s20] sm:$0xff] }
 0x1a8   : > { %v1221_v56 = vadd.f32 %v1220_v57, %v3145_v14  ;;  %2464 = vmatprep.subr.bf16.mxu1 %v2463_v52  ;;  %v1481_v14 = vld [vmem:[%s3211_s20 + $0x10] sm:$0xff] }
 0x1a9   : > { %2466 = vmatpush3.bf16.msra.mxu1 %v2465_v35 }
 0x1aa   : > { %v2467_v47 = vpack.c.bf16 %v1226_v38, %v1221_v56  ;;  %v2357_v61 = vpop.f32.mrb[32].mxu1 }
 0x1ab   : > { %v1236_v13 = vadd.f32 %v2357_v61, %v3167_v40  ;;  %v1230_v60 = vpop.f32.mrb[33].mxu1  ;;  %v1750_v40 = vld [vmem:[%s541_s27] sm:$0xff] }
 0x1ac   : > { %v1231_v31 = vadd.f32 %v1230_v60, %v3165_v39  ;;  %2468 = vmatprep.subr.bf16.mxu1 %v2467_v47  ;;  %1819 = vmatmul.mubr.f32.vlgmr.msra.gmra.mrb[34].mxu0 %v1750_v40  ;;  %v1752_v39 = vld [vmem:[%s541_s27 + $0x10] sm:$0xff] }
 0x1ad   : > { %2470 = vmatpush3.bf16.msra.mxu1 %v2469_v42  ;;  %1823 = vmatprep.mubr.f32.mxu0 %v1753_v16 }
 0x1ae   : > { %v2471_v17 = vpack.c.bf16 %v1236_v13, %v1231_v31 }
 0x1b0   : > { %2472 = vmatprep.subr.bf16.mxu1 %v2471_v17  ;;  %1824 = vmatmul.mubr.f32.gmra.mrb[36].mxu0 %v1752_v39 }
 0x1b1   : > { %2474 = vmatpush3.bf16.msra.mxu1 %v2473_v3 }
 0x1b4   : > { %1548 = vmatmul.mubr.f32.vlgmr.msra.gmra.mrb[34].mxu1 %v1479_v15 }
 0x1b5   : > { %1552 = vmatprep.mubr.f32.mxu1 %v1482_v46 }
 0x1b8   : > { %1553 = vmatmul.mubr.f32.gmra.mrb[36].mxu1 %v1481_v14 }
 0x23e   : > { %v2258_v50 = vpop.f32.mrb[32].mxu0 }
 0x23f   : > { %v2259_v29 = vpop.f32.mrb[33].mxu0 }
 0x240   : > { %v2260_v11 = vadd.f32 %v2259_v29, %v2258_v50 }
 0x242   : > { %v1652_v55 = vsel %vm1651_vm1, %v2260_v11, -inf }
 0x243   : > { %1653 = vmax.xlane.f32.xlu1 %v1652_v55 }
 0x27f   : > { %v2296_v36 = vpop.f32.mrb[34].mxu0 }
 0x280   : > { %v2297_v30 = vpop.f32.mrb[35].mxu0 }
 0x281   : > { %v2298_v4 = vadd.f32 %v2297_v30, %v2296_v36 }
 0x283   : > { %v2299_v33 = vpop.f32.mrb[36].mxu0  ;;  %v1829_v0 = vsel %vm1558_vm2, %v2298_v4, -inf }
 0x284   : > { %v2300_v3 = vpop.f32.mrb[37].mxu0 }
 0x285   : > { %v2301_v34 = vadd.f32 %v2300_v3, %v2299_v33 }
 0x287   : > { %v2220_v21 = vpop.f32.mrb[34].mxu1  ;;  %v1832_v8 = vsel %vm1558_vm2, %v2301_v34, -inf }
 0x288   : > { %v2221_v54 = vpop.f32.mrb[35].mxu1 }
 0x289   : > { %v2222_v35 = vadd.f32 %v2221_v54, %v2220_v21 }
 0x28b   : > { %v2223_v22 = vpop.f32.mrb[36].mxu1  ;;  %v1559_v59 = vsel %vm1558_vm2, %v2222_v35, -inf }
 0x28c   : > { %v2224_v25 = vpop.f32.mrb[37].mxu1  ;;  %1560 = vmax.xlane.f32.xlu0 %v1559_v59 }
 0x28d   : > { %v2225_v58 = vadd.f32 %v2224_v25, %v2223_v22 }
 0x28f   : > { %v1562_v42 = vsel %vm1558_vm2, %v2225_v58, -inf }
 0x290   : > { %1563 = vmax.xlane.f32.xlu0 %v1562_v42 }
 0x2d0   : > { %v1654_v1 = vpop.xlane.xlu1 %1653 }
 0x2d1   : > { %v1655_v45 = vsub.f32 %v2260_v11, %v1654_v1 }
 0x2d3   : > { %v1656_v18 = vmul.f32 1.442695, %v1655_v45 }
 0x2d5   : > { %2551 = vpow2.f32 %v1656_v18 }
 0x2df   : > { %v2552_v28 = vpop.eup %2551 }
 0x2e0   : > { %v1658_v37 = vsel %vm1651_vm1, %v2552_v28, 0.0 }
 0x2e1   : > { %1659 = vadd.xlane.f32.xlu1 %v1658_v37 }
 0x319   : > { %v1561_v26 = vpop.xlane.xlu0 %1560 }
 0x31a   : > { %v1565_v41 = vsub.f32 %v2222_v35, %v1561_v26 }
 0x31c   : > { %v1567_v9 = vmul.f32 1.442695, %v1565_v41 }
 0x31d   : > { %v1564_v63 = vpop.xlane.xlu0 %1563 }
 0x31e   : > { %2553 = vpow2.f32 %v1567_v9  ;;  %v1566_v43 = vsub.f32 %v2225_v58, %v1564_v63 }
 0x320   : > { %v1569_v62 = vmul.f32 1.442695, %v1566_v43 }
 0x322   : > { %2555 = vpow2.f32 %v1569_v62 }
 0x328   : > { %v2554_v2 = vpop.eup %2553 }
 0x329   : > { %v1571_v6 = vsel %vm1558_vm2, %v2554_v2, 0.0 }
 0x32a   : > { %1572 = vadd.xlane.f32.xlu0 %v1571_v6 }
 0x32c   : > { %v2556_v19 = vpop.eup %2555 }
 0x32d   : > { %v1574_v7 = vsel %vm1558_vm2, %v2556_v19, 0.0 }
 0x32e   : > { %1830 = vmax.xlane.f32.xlu0 %v1829_v0  ;;  %1575 = vadd.xlane.f32.xlu1 %v1574_v7 }
 0x332   : > { %1833 = vmax.xlane.f32.xlu1 %v1832_v8 }
 0x36e   : > { %v1660_v27 = vpop.xlane.xlu1 %1659 }
 0x36f   : > { %2557 = vrcp.f32 %v1660_v27 }
 0x379   : > { %v2558_v24 = vpop.eup %2557 }
 0x37a   : > { %v1662_v44 = vmul.f32 %v2558_v24, %v2552_v28 }
 0x37c   : > { %2414 = vmatprep.subr.msk.mxu1 %vm1669_vm3, %v1662_v44 }
 0x37d   : > { %2415 = vmatpush3.msk.msra.mxu1 %vm1669_vm3, %v1662_v44 }
 0x3b7   : > { %v1573_v32 = vpop.xlane.xlu0 %1572 }
 0x3b8   : > { %2559 = vrcp.f32 %v1573_v32 }
 0x3bb   : > { %v1576_v23 = vpop.xlane.xlu1 %1575  ;;  %v1831_v49 = vpop.xlane.xlu0 %1830 }
 0x3bc   : > { %2561 = vrcp.f32 %v1576_v23  ;;  %v1835_v48 = vsub.f32 %v2298_v4, %v1831_v49 }
 0x3be   : > { %v1837_v5 = vmul.f32 1.442695, %v1835_v48 }
 0x3bf   : > { %v1834_v12 = vpop.xlane.xlu1 %1833 }
 0x3c0   : > { %2563 = vpow2.f32 %v1837_v5  ;;  %v1836_v20 = vsub.f32 %v2301_v34, %v1834_v12 }
 0x3c2   : > { %v2560_v53 = vpop.eup %2559  ;;  %v1839_v52 = vmul.f32 1.442695, %v1836_v20 }
 0x3c3   : > { %v1579_v10 = vmul.f32 %v2560_v53, %v2554_v2 }
 0x3c4   : > { %2565 = vpow2.f32 %v1839_v52 }
 0x3c5   : > { %2416 = vmatprep.mubr.msk.f32.mxu1 %vm1558_vm2, %v1579_v10 }
 0x3c6   : > { %v2562_v38 = vpop.eup %2561 }
 0x3c7   : > { %v1580_v57 = vmul.f32 %v2562_v38, %v2556_v19 }
 0x3c9   : > { %2417 = vmatmul.mubr.msk.f32.vlgmr.msra.gmra.mrb[38].mxu1 %vm1558_vm2, %v1580_v57 }
 0x3ca   : > { %v2564_v56 = vpop.eup %2563 }
 0x3cb   : > { %v1841_v47 = vsel %vm1558_vm2, %v2564_v56, 0.0 }
 0x3cc   : > { %1842 = vadd.xlane.f32.xlu0 %v1841_v47 }
 0x3ce   : > { %v2566_v61 = vpop.eup %2565 }
 0x3cf   : > { %v1844_v13 = vsel %vm1558_vm2, %v2566_v61, 0.0 }
 0x3d0   : > { %1845 = vadd.xlane.f32.xlu1 %v1844_v13 }
 0x459   : > { %v1843_v60 = vpop.xlane.xlu0 %1842 }
 0x45a   : > { %2567 = vrcp.f32 %v1843_v60 }
 0x45d   : > { %v1846_v31 = vpop.xlane.xlu1 %1845 }
 0x45e   : > { %2569 = vrcp.f32 %v1846_v31 }
 0x464   : > { %v2568_v17 = vpop.eup %2567 }
 0x465   : > { %v1849_v15 = vmul.f32 %v2568_v17, %v2564_v56 }
 0x467   : > { %1851 = vst.msk [vmem:[%s570_s18] sm:$0xff] %vm1558_vm2, %v1849_v15 }
 0x468   : > { %v2570_v46 = vpop.eup %2569 }
 0x469   : > { %v1850_v14 = vmul.f32 %v2570_v46, %v2566_v61 }
 0x46b   : > { %1852 = vst.msk [vmem:[%s570_s18 + $0x8] sm:$0xff] %vm1558_vm2, %v1850_v14 }
 0x49c   : > { %v2418_v51 = vpop.f32.mrb[38].mxu1 }
 0x49d   : > { %1749 = vst.msk [vmem:[%s575_s17 + $0x8] sm:$0xff] %vm1558_vm2, %v2418_v51  ;;  %v1739_v40 = vpop.f32.mrb[39].mxu1 }
 0x49e   : > { %1748 = vst.msk [vmem:[%s575_s17] sm:$0xff] %vm1558_vm2, %v1739_v40 }
 0x49f PF: > { %s24_s25 = sadd.s32 1, %s2577_s25  }
 0x4a0   : > { %p21_p4 = scmp.ge.s32.totalorder %s24_s25, 4  }
 0x4a2   :  { %23 = sbr.rel (!%p21_p4) target bundleno = 1 (0x1), region = 131 }

</bundles_post_ra>
